<compile_context>
chip_gen: v6e
topology: v6e:2x2x1
jax: 0.10.0
libtpu: 0.0.40
codegen_flags: <defaults>
</compile_context>

<pallas_src>
import functools

import numpy as np
import jax
import jax.numpy as jnp
from jax.experimental import pallas as pl
from jax.experimental.pallas import tpu as pltpu

NEG_SLOPE = 0.01  # nn.LeakyReLU() default negative_slope


def _leaky_relu(x):
    return jnp.where(x > 0, x, NEG_SLOPE * x)


def _generator_kernel(x_ref, xtrue_ref,
                      w1_ref, b1_ref, w2_ref, b2_ref,
                      w3_ref, b3_ref, w4_ref, b4_ref,
                      out_ref, *, keep):
    """One batch tile: 4-layer MLP + (static) leading-column overwrite from x_true."""
    x = x_ref[...].astype(jnp.float32)

    h = _leaky_relu(jnp.dot(x, w1_ref[...].astype(jnp.float32),
                            preferred_element_type=jnp.float32) + b1_ref[...])
    h = _leaky_relu(jnp.dot(h, w2_ref[...].astype(jnp.float32),
                            preferred_element_type=jnp.float32) + b2_ref[...])
    h = _leaky_relu(jnp.dot(h, w3_ref[...].astype(jnp.float32),
                            preferred_element_type=jnp.float32) + b3_ref[...])
    y = jnp.dot(h, w4_ref[...].astype(jnp.float32),
                preferred_element_type=jnp.float32) + b4_ref[...]

    if keep > 0:  # static Python branch; mask below is a compile-time constant
        col = jax.lax.broadcasted_iota(jnp.int32, y.shape, 1)
        y = jnp.where(col < keep, xtrue_ref[...].astype(jnp.float32), y)

    out_ref[...] = y.astype(out_ref.dtype)


def init_params(key, in_dim=4, n_hidden_1=8, n_hidden_2=32, n_hidden_3=128, n_hidden_4=512):
    """Deterministic synthetic parameters. Weights (in, out) in bf16, biases f32."""
    dims = [(n_hidden_4, n_hidden_3),
            (n_hidden_3, n_hidden_2),
            (n_hidden_2, n_hidden_1),
            (n_hidden_1, in_dim)]
    params = {}
    keys = jax.random.split(key, 2 * len(dims))
    for i, (din, dout) in enumerate(dims):
        bound = 1.0 / np.sqrt(din)  # mimic PyTorch Linear init scale
        w = jax.random.uniform(keys[2 * i], (din, dout),
                               minval=-bound, maxval=bound, dtype=jnp.float32)
        b = jax.random.uniform(keys[2 * i + 1], (1, dout),
                               minval=-bound, maxval=bound, dtype=jnp.float32)
        params[f"w{i+1}"] = w.astype(jnp.bfloat16)   # halves dominant HBM->VMEM traffic
        params[f"b{i+1}"] = b                        # biases stay f32 (tiny)
    return params


def _pick_tile(batch):
    """Largest batch tile (multiple of 256 preferred for v6e/v7x MXU, else of 8)."""
    for t in (1024, 512, 256, 128, 64, 32, 16, 8):
        if batch >= t and batch % t == 0:
            return t
    return batch  # not a multiple of 8 -> single full-array block


def generator_forward(x, x_true, missing_item, batch_size, params):
    """Pallas forward pass for Generator_mimic_3_4clients."""
    B, din = x.shape
    in_dim = params["w4"].shape[1]

    # Mirror the PyTorch batch-size check (cheap, static, host-side).
    if B != batch_size:
        raise ValueError("batch size does not match")
    # TODO(synk): the PyTorch host-side NaN check (np.isnan(np.sum(x))) is dropped:
    # it forces a device->host sync that dominates wall-clock; do it asynchronously
    # on-device (jnp.any(jnp.isnan(x))) in the caller if it is really needed.

    keep = in_dim - int(missing_item)   # static; keep == 0 <=> Missing_item == in_dim
    tile_b = _pick_tile(B)
    grid = (B // tile_b,)

    weight_args = [params["w1"], params["b1"], params["w2"], params["b2"],
                   params["w3"], params["b3"], params["w4"], params["b4"]]

    def resident_spec(a):
        # Full-array block with a constant index_map: DMA'd once, stays VMEM-resident
        # across all grid steps.
        nd = a.ndim
        return pl.BlockSpec(a.shape, lambda i, _nd=nd: (0,) * _nd)

    kernel = functools.partial(_generator_kernel, keep=keep)

    out = pl.pallas_call(
        kernel,
        out_shape=jax.ShapeDtypeStruct((B, in_dim), jnp.float32),
        grid_spec=pl.GridSpec(
            grid=grid,
            in_specs=[pl.BlockSpec((tile_b, din), lambda i: (i, 0)),
                      pl.BlockSpec((tile_b, in_dim), lambda i: (i, 0))]
                     + [resident_spec(a) for a in weight_args],
            out_specs=pl.BlockSpec((tile_b, in_dim), lambda i: (i, 0)),
        ),
        compiler_params=pltpu.CompilerParams(
            dimension_semantics=("parallel",)),   # batch tiles shard across v7x's 2 TCs
    )(x, x_true, *weight_args)
    return out


def _reference_forward(x, x_true, missing_item, params):
    """Pure-JAX reference (same bf16 weights upcast to f32)."""
    def lin(h, w, b):
        return jnp.dot(h, w.astype(jnp.float32),
                       preferred_element_type=jnp.float32) + b
    h = _leaky_relu(lin(x, params["w1"], params["b1"]))
    h = _leaky_relu(lin(h, params["w2"], params["b2"]))
    h = _leaky_relu(lin(h, params["w3"], params["b3"]))
    y = lin(h, params["w4"], params["b4"])
    in_dim = params["w4"].shape[1]
    keep = in_dim - missing_item
    if keep > 0:
        y = y.at[:, :keep].set(x_true[:, :keep])
    return y


if __name__ == "__main__":
    in_dim, n_h1, n_h2, n_h3, n_h4 = 4, 8, 32, 128, 512
    batch_size = 512  # -> tile_b = 256, grid = (2,): exercises the tiled/resident-weight path

    key = jax.random.PRNGKey(0)
    kp, kx, kt = jax.random.split(key, 3)

    params = init_params(kp, in_dim, n_h1, n_h2, n_h3, n_h4)
    x = jax.random.normal(kx, (batch_size, n_h4), dtype=jnp.float32)
    x_true = jax.random.normal(kt, (batch_size, in_dim), dtype=jnp.float32)

    # Case 1: Missing_item < in_dim -> leading columns overwritten with x_true.
    missing_item = 2
    out = jax.block_until_ready(generator_forward(x, x_true, missing_item, batch_size, params))
    ref = _reference_forward(x, x_true, missing_item, params)
    np.testing.assert_allclose(np.asarray(out), np.asarray(ref), rtol=1e-4, atol=1e-4)

    # Case 2: Missing_item == in_dim -> no overwrite branch.
    out2 = jax.block_until_ready(generator_forward(x, x_true, in_dim, batch_size, params))
    ref2 = _reference_forward(x, x_true, in_dim, params)
    np.testing.assert_allclose(np.asarray(out2), np.asarray(ref2), rtol=1e-4, atol=1e-4)

    print("KERNEL_OK")
</pallas_src>

<mosaic_0001>
module attributes {stable_mosaic.version = 11 : i64} {
  func.func @_generator_kernel(%arg0: i32, %arg1: memref<512x512xf32, #tpu.memory_space<vmem>>, %arg2: memref<512x4xf32, #tpu.memory_space<vmem>>, %arg3: memref<512x128xbf16, #tpu.memory_space<vmem>>, %arg4: memref<1x128xf32, #tpu.memory_space<vmem>>, %arg5: memref<128x32xbf16, #tpu.memory_space<vmem>>, %arg6: memref<1x32xf32, #tpu.memory_space<vmem>>, %arg7: memref<32x8xbf16, #tpu.memory_space<vmem>>, %arg8: memref<1x8xf32, #tpu.memory_space<vmem>>, %arg9: memref<8x4xbf16, #tpu.memory_space<vmem>>, %arg10: memref<1x4xf32, #tpu.memory_space<vmem>>, %arg11: memref<512x4xf32, #tpu.memory_space<vmem>>) attributes {dimension_semantics = [#tpu.dimension_semantics<parallel>], iteration_bounds = array<i64: 1>, scalar_prefetch = 0 : i64, scratch_operands = 0 : i64, tpu.core_type = #tpu.core_type<tc>, window_params = [{transform_indices = @transform_0, window_bounds = array<i64: 512, 512>}, {transform_indices = @transform_1, window_bounds = array<i64: 512, 4>}, {pipeline_mode = #tpu.pipeline_mode<synchronous>, transform_indices = @transform_2, window_bounds = array<i64: 512, 128>}, {pipeline_mode = #tpu.pipeline_mode<synchronous>, transform_indices = @transform_3, window_bounds = array<i64: 1, 128>}, {pipeline_mode = #tpu.pipeline_mode<synchronous>, transform_indices = @transform_4, window_bounds = array<i64: 128, 32>}, {pipeline_mode = #tpu.pipeline_mode<synchronous>, transform_indices = @transform_5, window_bounds = array<i64: 1, 32>}, {pipeline_mode = #tpu.pipeline_mode<synchronous>, transform_indices = @transform_6, window_bounds = array<i64: 32, 8>}, {pipeline_mode = #tpu.pipeline_mode<synchronous>, transform_indices = @transform_7, window_bounds = array<i64: 1, 8>}, {pipeline_mode = #tpu.pipeline_mode<synchronous>, transform_indices = @transform_8, window_bounds = array<i64: 8, 4>}, {pipeline_mode = #tpu.pipeline_mode<synchronous>, transform_indices = @transform_9, window_bounds = array<i64: 1, 4>}, {transform_indices = @transform_10, window_bounds = array<i64: 512, 4>}]} {
    %c0 = arith.constant 0 : index
    %c0_0 = arith.constant 0 : index
    %0 = vector.load %arg1[%c0, %c0_0] : memref<512x512xf32, #tpu.memory_space<vmem>>, vector<512x512xf32>
    %c0_1 = arith.constant 0 : index
    %c0_2 = arith.constant 0 : index
    %1 = vector.load %arg3[%c0_1, %c0_2] : memref<512x128xbf16, #tpu.memory_space<vmem>>, vector<512x128xbf16>
    %2 = arith.extf %1 : vector<512x128xbf16> to vector<512x128xf32>
    %cst = arith.constant dense<0.000000e+00> : vector<512x128xf32>
    %3 = tpu.matmul %0, %2, %cst {dimension_numbers = #tpu.dot_dimension_numbers<[1], [0], [0], [1], [0, 0, 1, 1], [], []>} : vector<512x512xf32>, vector<512x128xf32>, vector<512x128xf32> -> vector<512x128xf32>
    %c0_3 = arith.constant 0 : index
    %c0_4 = arith.constant 0 : index
    %4 = vector.load %arg4[%c0_3, %c0_4] : memref<1x128xf32, #tpu.memory_space<vmem>>, vector<1x128xf32>
    %5 = vector.broadcast %4 : vector<1x128xf32> to vector<512x128xf32>
    %6 = arith.addf %3, %5 : vector<512x128xf32>
    %cst_5 = arith.constant 0.000000e+00 : f32
    %7 = vector.broadcast %cst_5 : f32 to vector<512x128xf32>
    %8 = arith.cmpf ogt, %6, %7 : vector<512x128xf32>
    %cst_6 = arith.constant 0.00999999977 : f32
    %9 = vector.broadcast %cst_6 : f32 to vector<512x128xf32>
    %10 = arith.mulf %9, %6 : vector<512x128xf32>
    %11 = arith.select %8, %6, %10 : vector<512x128xi1>, vector<512x128xf32>
    %c0_7 = arith.constant 0 : index
    %c0_8 = arith.constant 0 : index
    %12 = vector.load %arg5[%c0_7, %c0_8] : memref<128x32xbf16, #tpu.memory_space<vmem>>, vector<128x32xbf16>
    %13 = arith.extf %12 : vector<128x32xbf16> to vector<128x32xf32>
    %cst_9 = arith.constant dense<0.000000e+00> : vector<512x32xf32>
    %14 = tpu.matmul %11, %13, %cst_9 {dimension_numbers = #tpu.dot_dimension_numbers<[1], [0], [0], [1], [0, 0, 1, 1], [], []>} : vector<512x128xf32>, vector<128x32xf32>, vector<512x32xf32> -> vector<512x32xf32>
    %c0_10 = arith.constant 0 : index
    %c0_11 = arith.constant 0 : index
    %15 = vector.load %arg6[%c0_10, %c0_11] : memref<1x32xf32, #tpu.memory_space<vmem>>, vector<1x32xf32>
    %16 = vector.broadcast %15 : vector<1x32xf32> to vector<512x32xf32>
    %17 = arith.addf %14, %16 : vector<512x32xf32>
    %cst_12 = arith.constant 0.000000e+00 : f32
    %18 = vector.broadcast %cst_12 : f32 to vector<512x32xf32>
    %19 = arith.cmpf ogt, %17, %18 : vector<512x32xf32>
    %cst_13 = arith.constant 0.00999999977 : f32
    %20 = vector.broadcast %cst_13 : f32 to vector<512x32xf32>
    %21 = arith.mulf %20, %17 : vector<512x32xf32>
    %22 = arith.select %19, %17, %21 : vector<512x32xi1>, vector<512x32xf32>
    %c0_14 = arith.constant 0 : index
    %c0_15 = arith.constant 0 : index
    %23 = vector.load %arg7[%c0_14, %c0_15] : memref<32x8xbf16, #tpu.memory_space<vmem>>, vector<32x8xbf16>
    %24 = arith.extf %23 : vector<32x8xbf16> to vector<32x8xf32>
    %cst_16 = arith.constant dense<0.000000e+00> : vector<512x8xf32>
    %25 = tpu.matmul %22, %24, %cst_16 {dimension_numbers = #tpu.dot_dimension_numbers<[1], [0], [0], [1], [0, 0, 1, 1], [], []>} : vector<512x32xf32>, vector<32x8xf32>, vector<512x8xf32> -> vector<512x8xf32>
    %c0_17 = arith.constant 0 : index
    %c0_18 = arith.constant 0 : index
    %26 = vector.load %arg8[%c0_17, %c0_18] : memref<1x8xf32, #tpu.memory_space<vmem>>, vector<1x8xf32>
    %27 = vector.broadcast %26 : vector<1x8xf32> to vector<512x8xf32>
    %28 = arith.addf %25, %27 : vector<512x8xf32>
    %cst_19 = arith.constant 0.000000e+00 : f32
    %29 = vector.broadcast %cst_19 : f32 to vector<512x8xf32>
    %30 = arith.cmpf ogt, %28, %29 : vector<512x8xf32>
    %cst_20 = arith.constant 0.00999999977 : f32
    %31 = vector.broadcast %cst_20 : f32 to vector<512x8xf32>
    %32 = arith.mulf %31, %28 : vector<512x8xf32>
    %33 = arith.select %30, %28, %32 : vector<512x8xi1>, vector<512x8xf32>
    %c0_21 = arith.constant 0 : index
    %c0_22 = arith.constant 0 : index
    %34 = vector.load %arg9[%c0_21, %c0_22] : memref<8x4xbf16, #tpu.memory_space<vmem>>, vector<8x4xbf16>
    %35 = arith.extf %34 : vector<8x4xbf16> to vector<8x4xf32>
    %cst_23 = arith.constant dense<0.000000e+00> : vector<512x4xf32>
    %36 = tpu.matmul %33, %35, %cst_23 {dimension_numbers = #tpu.dot_dimension_numbers<[1], [0], [0], [1], [0, 0, 1, 1], [], []>} : vector<512x8xf32>, vector<8x4xf32>, vector<512x4xf32> -> vector<512x4xf32>
    %c0_24 = arith.constant 0 : index
    %c0_25 = arith.constant 0 : index
    %37 = vector.load %arg10[%c0_24, %c0_25] : memref<1x4xf32, #tpu.memory_space<vmem>>, vector<1x4xf32>
    %38 = vector.broadcast %37 : vector<1x4xf32> to vector<512x4xf32>
    %39 = arith.addf %36, %38 : vector<512x4xf32>
    %40 = tpu.iota {dimensions = array<i32: 1>} : vector<512x4xi32>
    %c2_i32 = arith.constant 2 : i32
    %41 = vector.broadcast %c2_i32 : i32 to vector<512x4xi32>
    %42 = arith.cmpi slt, %40, %41 : vector<512x4xi32>
    %c0_26 = arith.constant 0 : index
    %c0_27 = arith.constant 0 : index
    %43 = vector.load %arg2[%c0_26, %c0_27] : memref<512x4xf32, #tpu.memory_space<vmem>>, vector<512x4xf32>
    %44 = arith.select %42, %43, %39 : vector<512x4xi1>, vector<512x4xf32>
    %c0_28 = arith.constant 0 : index
    %c0_29 = arith.constant 0 : index
    %45 = vector.load %arg11[%c0_28, %c0_29] : memref<512x4xf32, #tpu.memory_space<vmem>>, vector<512x4xf32>
    tpu.vector_store %arg11[%c0_28, %c0_29], %44 {strides = array<i32>} : memref<512x4xf32, #tpu.memory_space<vmem>>, vector<512x4xf32>,
    return
  }
  func.func @transform_0(%arg0: i32) -> (i32, i32) {
    %c0_i32 = arith.constant 0 : i32
    %c0_i32_0 = arith.constant 0 : i32
    return %arg0, %c0_i32 : i32, i32
  }
  func.func @transform_1(%arg0: i32) -> (i32, i32) {
    %c0_i32 = arith.constant 0 : i32
    %c0_i32_0 = arith.constant 0 : i32
    return %arg0, %c0_i32 : i32, i32
  }
  func.func @transform_2(%arg0: i32) -> (i32, i32) {
    %c0_i32 = arith.constant 0 : i32
    %c0_i32_0 = arith.constant 0 : i32
    %c0_i32_1 = arith.constant 0 : i32
    return %c0_i32, %c0_i32_0 : i32, i32
  }
  func.func @transform_3(%arg0: i32) -> (i32, i32) {
    %c0_i32 = arith.constant 0 : i32
    %c0_i32_0 = arith.constant 0 : i32
    %c0_i32_1 = arith.constant 0 : i32
    return %c0_i32, %c0_i32_0 : i32, i32
  }
  func.func @transform_4(%arg0: i32) -> (i32, i32) {
    %c0_i32 = arith.constant 0 : i32
    %c0_i32_0 = arith.constant 0 : i32
    %c0_i32_1 = arith.constant 0 : i32
    return %c0_i32, %c0_i32_0 : i32, i32
  }
  func.func @transform_5(%arg0: i32) -> (i32, i32) {
    %c0_i32 = arith.constant 0 : i32
    %c0_i32_0 = arith.constant 0 : i32
    %c0_i32_1 = arith.constant 0 : i32
    return %c0_i32, %c0_i32_0 : i32, i32
  }
  func.func @transform_6(%arg0: i32) -> (i32, i32) {
    %c0_i32 = arith.constant 0 : i32
    %c0_i32_0 = arith.constant 0 : i32
    %c0_i32_1 = arith.constant 0 : i32
    return %c0_i32, %c0_i32_0 : i32, i32
  }
  func.func @transform_7(%arg0: i32) -> (i32, i32) {
    %c0_i32 = arith.constant 0 : i32
    %c0_i32_0 = arith.constant 0 : i32
    %c0_i32_1 = arith.constant 0 : i32
    return %c0_i32, %c0_i32_0 : i32, i32
  }
  func.func @transform_8(%arg0: i32) -> (i32, i32) {
    %c0_i32 = arith.constant 0 : i32
    %c0_i32_0 = arith.constant 0 : i32
    %c0_i32_1 = arith.constant 0 : i32
    return %c0_i32, %c0_i32_0 : i32, i32
  }
  func.func @transform_9(%arg0: i32) -> (i32, i32) {
    %c0_i32 = arith.constant 0 : i32
    %c0_i32_0 = arith.constant 0 : i32
    %c0_i32_1 = arith.constant 0 : i32
    return %c0_i32, %c0_i32_0 : i32, i32
  }
  func.func @transform_10(%arg0: i32) -> (i32, i32) {
    %c0_i32 = arith.constant 0 : i32
    %c0_i32_0 = arith.constant 0 : i32
    return %arg0, %c0_i32 : i32, i32
  }
}

</mosaic_0001>

<bundles_post_ra>
// kernel: tpu_custom_call.1
= control target key start
LH: loop header
LB: loop body
LE: loop exit
PB: predicated region body
PF: predicated region fallthrough
CT: control target
= control target key end

     0   :  { %15 = vsyncpa [#allocation3], 0  ;;  %s4566_s13 = smov [#allocation2]   ;;  %s6035_s0 = inlined_call_operand.hbm [shape: f32[512,512], index: 0, kind: input, shape index: {}]   ;;  %s6036_s1 = inlined_call_operand.vmem [shape: f32[512,4], index: 1, kind: input, shape index: {}]   ;;  %s6037_s2 = inlined_call_operand.vmem [shape: bf16[512,128], index: 2, kind: input, shape index: {}]   ;;  %s6038_s3 = inlined_call_operand.vmem [shape: f32[1,128], index: 3, kind: input, shape index: {}]   ;;  %s6039_s4 = inlined_call_operand.vmem [shape: bf16[128,32], index: 4, kind: input, shape index: {}]   ;;  %s6040_s5 = inlined_call_operand.vmem [shape: f32[1,32], index: 5, kind: input, shape index: {}]   ;;  %s6041_s6 = inlined_call_operand.vmem [shape: bf16[32,8], index: 6, kind: input, shape index: {}]   ;;  %s6042_s7 = inlined_call_operand.vmem [shape: f32[1,8], index: 7, kind: input, shape index: {}]   ;;  %s6043_s8 = inlined_call_operand.vmem [shape: bf16[8,4], index: 8, kind: input, shape index: {}]   ;;  %s6044_s9 = inlined_call_operand.vmem [shape: f32[1,4], index: 9, kind: input, shape index: {}]   ;;  %s6045_s10 = inlined_call_operand.vmem [shape: f32[512,4], index: 10, kind: output, shape index: {}]  }
   0x1   :  { %s21_s14 = sshll.u32 %s4566_s13, 4  ;;  %s22_s14 = int_to_ptr.vmem [resolvable:$true] %s21_s14 }
   0x2   :  { %s4552_s15 = scalar_lea.vmem %s22_s14, 32768  ;;  %p4557_p1 = scmp.lt.s32.totalorder %s22_s14, %s22_s14 }
   0x3   :  { %p4553_p0 = scmp.ne.s32.totalorder %s22_s14, %s4552_s15  ;;  %p4558_p2 = scmp.lt.s32.totalorder %s4552_s15, %s4552_s15 }
   0x5   :  { %p4559_p3 = por %p4558_p2, %p4557_p1 }
   0x7   :  { %p4560_p4 = pnand %p4559_p3, %p4553_p0 }
   0x9   :  { %4563 = shalt.err (!%p4560_p4)
}
   0xa   :  { %s4567_s16 = smov 512   ;;  %s4568_s17 = smov 32  }
   0xb   :  { %27 = dma.hbm_to_vmem [thread:$0]  %s6035_s0, 32768, %s22_s14, [#allocation3], %s4567_s16, %s4567_s16, %s4568_s17  }
   0xc   :  { %4564 = dma.done.wait [#allocation3], 32768  }
   0xd   :  { %4565 = vsyncadd [#allocation3], 4294934528  ;;  %v4569_v0 = vmov 0.0   ;;  %v3897_v1 = vld [vmem:[%s6037_s2 + $0x38] sm:$0xff]   ;;  %v3896_v2 = vld [vmem:[%s6037_s2 + $0x30] sm:$0xff]  }
   0xe   :  { %4473 = vmatprep.subr.mxu1 %v4569_v0  ;;  %440 = vmatprep.subr.mxu0 %v4569_v0  ;;  %v3753_v3 = vunpack.c.l.bf16 %v3897_v1  ;;  %v3754_v4 = vunpack.c.h.bf16 %v3897_v1  ;;  %v3750_v5 = vunpack.c.h.bf16 %v3896_v2  ;;  %v3895_v6 = vld [vmem:[%s6037_s2 + $0x28] sm:$0xff]   ;;  %v3749_v7 = vunpack.c.l.bf16 %v3896_v2  ;;  %v3894_v10 = vld [vmem:[%s6037_s2 + $0x20] sm:$0xff]   ;;  %v3893_v13 = vld [vmem:[%s6037_s2 + $0x18] sm:$0xff]  }
   0xf   :  { %v242_v8 = vld [vmem:[#allocation2 + $0x608] sm:$0xff]  ;;  %v3746_v9 = vunpack.c.h.bf16 %v3895_v6  ;;  %v3745_v11 = vunpack.c.l.bf16 %v3895_v6  ;;  %v3742_v12 = vunpack.c.h.bf16 %v3894_v10  ;;  %v3741_v14 = vunpack.c.l.bf16 %v3894_v10  ;;  %v3892_v16 = vld [vmem:[%s6037_s2 + $0x10] sm:$0xff]   ;;  %v3724_v22 = vld [vmem:[%s6037_s2] sm:$0xff]  }
  0x10   :  { %4505 = vmatpush1.msra.mxu1 %v3754_v4  ;;  %441 = vmatpush1.msra.mxu0 %v3754_v4  ;;  %v3738_v15 = vunpack.c.h.bf16 %v3893_v13  ;;  %v3737_v17 = vunpack.c.l.bf16 %v3893_v13  ;;  %v3734_v18 = vunpack.c.h.bf16 %v3892_v16  ;;  %v3891_v19 = vld [vmem:[%s6037_s2 + $0x8] sm:$0xff]   ;;  %v3733_v20 = vunpack.c.l.bf16 %v3892_v16  ;;  %v3905_v25 = vld [vmem:[%s6037_s2 + $0x78] sm:$0xff]   ;;  %v3904_v28 = vld [vmem:[%s6037_s2 + $0x70] sm:$0xff]  }
  0x11   :  { %4474 = vmatprep.subr.mxu1 %v4569_v0  ;;  %442 = vmatprep.subr.mxu0 %v4569_v0  ;;  %v3730_v21 = vunpack.c.h.bf16 %v3891_v19  ;;  %v3729_v23 = vunpack.c.l.bf16 %v3891_v19  ;;  %v3726_v24 = vunpack.c.h.bf16 %v3724_v22  ;;  %v3725_v26 = vunpack.c.l.bf16 %v3724_v22  ;;  %v3903_v31 = vld [vmem:[%s6037_s2 + $0x68] sm:$0xff]   ;;  %v3902_v34 = vld [vmem:[%s6037_s2 + $0x60] sm:$0xff]   ;;  %v3901_v37 = vld [vmem:[%s6037_s2 + $0x58] sm:$0xff]  }
  0x12   :  { %4506 = vmatpush1.msra.mxu1 %v3753_v3  ;;  %443 = vmatpush1.msra.mxu0 %v3753_v3  ;;  %v3786_v27 = vunpack.c.h.bf16 %v3905_v25  ;;  %v3785_v29 = vunpack.c.l.bf16 %v3905_v25  ;;  %v3782_v30 = vunpack.c.h.bf16 %v3904_v28  ;;  %v3781_v32 = vunpack.c.l.bf16 %v3904_v28  ;;  %v3900_v40 = vld [vmem:[%s6037_s2 + $0x50] sm:$0xff]   ;;  %v3899_v43 = vld [vmem:[%s6037_s2 + $0x48] sm:$0xff]   ;;  %v3898_v46 = vld [vmem:[%s6037_s2 + $0x40] sm:$0xff]  }
  0x13   :  { %4475 = vmatprep.subr.mxu1 %v4569_v0  ;;  %744 = vmatprep.mubr.f32.mxu1 %v242_v8  ;;  %v3778_v33 = vunpack.c.h.bf16 %v3903_v31  ;;  %v3777_v35 = vunpack.c.l.bf16 %v3903_v31  ;;  %v3774_v36 = vunpack.c.h.bf16 %v3902_v34  ;;  %v3773_v38 = vunpack.c.l.bf16 %v3902_v34  ;;  %v3913_v49 = vld [vmem:[%s6037_s2 + $0xb8] sm:$0xff]   ;;  %v241_v51 = vld [vmem:[#allocation2 + $0x600] sm:$0xff]  ;;  %v246_v53 = vld [vmem:[#allocation2 + $0x628] sm:$0xff] }
  0x14   :  { %4507 = vmatpush1.msra.mxu1 %v3750_v5  ;;  %444 = vmatprep.subr.mxu0 %v4569_v0  ;;  %v3770_v39 = vunpack.c.h.bf16 %v3901_v37  ;;  %v3769_v41 = vunpack.c.l.bf16 %v3901_v37  ;;  %v3766_v42 = vunpack.c.h.bf16 %v3900_v40  ;;  %v3765_v44 = vunpack.c.l.bf16 %v3900_v40  ;;  %v3912_v54 = vld [vmem:[%s6037_s2 + $0xb0] sm:$0xff]   ;;  %v50_v56 = vld [vmem:[#allocation2 + $0x8] sm:$0xff]  ;;  %v245_v57 = vld [vmem:[#allocation2 + $0x620] sm:$0xff] }
  0x15   :  { %4476 = vmatprep.subr.mxu1 %v4569_v0  ;;  %445 = vmatpush1.msra.mxu0 %v3750_v5  ;;  %v3762_v45 = vunpack.c.h.bf16 %v3899_v43  ;;  %v3761_v47 = vunpack.c.l.bf16 %v3899_v43  ;;  %v3758_v48 = vunpack.c.h.bf16 %v3898_v46  ;;  %v3757_v50 = vunpack.c.l.bf16 %v3898_v46  ;;  %v250_v59 = vld [vmem:[#allocation2 + $0x648] sm:$0xff]  ;;  %v49_v62 = vld [vmem:[#allocation2] sm:$0xff]  ;;  %v3920_v46 = vld [vmem:[%s6037_s2 + $0xf0] sm:$0xff]  }
  0x16   :  { %4508 = vmatpush1.msra.mxu1 %v3749_v7  ;;  %446 = vmatprep.subr.mxu0 %v4569_v0  ;;  %v3818_v52 = vunpack.c.h.bf16 %v3913_v49  ;;  %v3817_v55 = vunpack.c.l.bf16 %v3913_v49  ;;  %v3814_v58 = vunpack.c.h.bf16 %v3912_v54  ;;  %v3911_v60 = vld [vmem:[%s6037_s2 + $0xa8] sm:$0xff]   ;;  %v3813_v61 = vunpack.c.l.bf16 %v3912_v54  ;;  %v249_v1 = vld [vmem:[#allocation2 + $0x640] sm:$0xff] }
  0x17   :  { %4477 = vmatprep.subr.mxu1 %v4569_v0  ;;  %447 = vmatpush1.msra.mxu0 %v3749_v7  ;;  %v54_v63 = vld [vmem:[#allocation2 + $0x28] sm:$0xff]  ;;  %v3810_v2 = vunpack.c.h.bf16 %v3911_v60  ;;  %v3910_v4 = vld [vmem:[%s6037_s2 + $0xa0] sm:$0xff]   ;;  %v3809_v5 = vunpack.c.l.bf16 %v3911_v60  ;;  %v3845_v54 = vunpack.c.l.bf16 %v3920_v46 }
  0x18   :  { %4509 = vmatpush1.msra.mxu1 %v3746_v9  ;;  %448 = vmatprep.subr.mxu0 %v4569_v0  ;;  %v254_v3 = vld [vmem:[#allocation2 + $0x668] sm:$0xff]  ;;  %v53_v6 = vld [vmem:[#allocation2 + $0x20] sm:$0xff] }
  0x19   :  { %4478 = vmatprep.subr.mxu1 %v4569_v0  ;;  %449 = vmatpush1.msra.mxu0 %v3746_v9  ;;  %v58_v7 = vld [vmem:[#allocation2 + $0x48] sm:$0xff]  ;;  %v253_v8 = vld [vmem:[#allocation2 + $0x660] sm:$0xff]  ;;  %v3806_v9 = vunpack.c.h.bf16 %v3910_v4 }
  0x1a   :  { %4510 = vmatpush1.msra.mxu1 %v3745_v11  ;;  %450 = vmatprep.subr.mxu0 %v4569_v0  ;;  %v258_v10 = vld [vmem:[#allocation2 + $0x688] sm:$0xff]  ;;  %v57_v13 = vld [vmem:[#allocation2 + $0x40] sm:$0xff] }
  0x1b   :  { %4479 = vmatprep.subr.mxu1 %v4569_v0  ;;  %451 = vmatpush1.msra.mxu0 %v3745_v11  ;;  %v3909_v11 = vld [vmem:[%s6037_s2 + $0x98] sm:$0xff]   ;;  %v261_v22 = vld [vmem:[#allocation2 + $0x6a0] sm:$0xff]  ;;  %v3907_v25 = vld [vmem:[%s6037_s2 + $0x88] sm:$0xff]  }
  0x1c   :  { %4511 = vmatpush1.msra.mxu1 %v3742_v12  ;;  %452 = vmatprep.subr.mxu0 %v4569_v0  ;;  %v3802_v16 = vunpack.c.h.bf16 %v3909_v11  ;;  %v3801_v19 = vunpack.c.l.bf16 %v3909_v11  ;;  %v70_v28 = vld [vmem:[#allocation2 + $0xa8] sm:$0xff]  ;;  %v69_v34 = vld [vmem:[#allocation2 + $0xa0] sm:$0xff]  ;;  %v3916_v11 = vld [vmem:[%s6037_s2 + $0xd0] sm:$0xff]  }
  0x1d   :  { %4480 = vmatprep.subr.mxu1 %v4569_v0  ;;  %453 = vmatpush1.msra.mxu0 %v3742_v12  ;;  %v3805_v12 = vunpack.c.l.bf16 %v3910_v4  ;;  %v270_v31 = vld [vmem:[#allocation2 + $0x6e8] sm:$0xff]  ;;  %v273_v43 = vld [vmem:[#allocation2 + $0x700] sm:$0xff]  ;;  %v3917_v4 = vld [vmem:[%s6037_s2 + $0xd8] sm:$0xff]  }
  0x1e   :  { %4512 = vmatpush1.msra.mxu1 %v3741_v14  ;;  %454 = vmatprep.subr.mxu0 %v4569_v0  ;;  %v82_v49 = vld [vmem:[#allocation2 + $0x108] sm:$0xff]  ;;  %v3918_v60 = vld [vmem:[%s6037_s2 + $0xe0] sm:$0xff]  }
  0x1f   :  { %4481 = vmatprep.subr.mxu1 %v4569_v0  ;;  %455 = vmatpush1.msra.mxu0 %v3741_v14  ;;  %v62_v14 = vld [vmem:[#allocation2 + $0x68] sm:$0xff] }
  0x20   :  { %4513 = vmatpush1.msra.mxu1 %v3738_v15  ;;  %456 = vmatprep.subr.mxu0 %v4569_v0 }
  0x21   :  { %4482 = vmatprep.subr.mxu1 %v4569_v0  ;;  %457 = vmatpush1.msra.mxu0 %v3738_v15  ;;  %v257_v15 = vld [vmem:[#allocation2 + $0x680] sm:$0xff] }
  0x22   :  { %4514 = vmatpush1.msra.mxu1 %v3737_v17  ;;  %458 = vmatprep.subr.mxu0 %v4569_v0 }
  0x23   :  { %4483 = vmatprep.subr.mxu1 %v4569_v0  ;;  %459 = vmatpush1.msra.mxu0 %v3737_v17  ;;  %v262_v17 = vld [vmem:[#allocation2 + $0x6a8] sm:$0xff] }
  0x24   :  { %4515 = vmatpush1.msra.mxu1 %v3734_v18  ;;  %460 = vmatprep.subr.mxu0 %v4569_v0 }
  0x25   :  { %4484 = vmatprep.subr.mxu1 %v4569_v0  ;;  %461 = vmatpush1.msra.mxu0 %v3734_v18  ;;  %v3908_v18 = vld [vmem:[%s6037_s2 + $0x90] sm:$0xff]  }
  0x26   :  { %4516 = vmatpush1.msra.mxu1 %v3733_v20  ;;  %462 = vmatprep.subr.mxu0 %v4569_v0 }
  0x27   :  { %4485 = vmatprep.subr.mxu1 %v4569_v0  ;;  %463 = vmatpush1.msra.mxu0 %v3733_v20  ;;  %v61_v20 = vld [vmem:[#allocation2 + $0x60] sm:$0xff] }
  0x28   :  { %4517 = vmatpush1.msra.mxu1 %v3730_v21  ;;  %464 = vmatprep.subr.mxu0 %v4569_v0 }
  0x29   :  { %4486 = vmatprep.subr.mxu1 %v4569_v0  ;;  %465 = vmatpush1.msra.mxu0 %v3730_v21  ;;  %v66_v21 = vld [vmem:[#allocation2 + $0x88] sm:$0xff] }
  0x2a   :  { %4518 = vmatpush1.msra.mxu1 %v3729_v23  ;;  %466 = vmatprep.subr.mxu0 %v4569_v0 }
  0x2b   :  { %4487 = vmatprep.subr.mxu1 %v4569_v0  ;;  %467 = vmatpush1.msra.mxu0 %v3729_v23  ;;  %v3798_v23 = vunpack.c.h.bf16 %v3908_v18 }
  0x2c   :  { %4519 = vmatpush1.msra.mxu1 %v3726_v24  ;;  %468 = vmatprep.subr.mxu0 %v4569_v0 }
  0x2d   :  { %4488 = vmatprep.subr.mxu1 %v4569_v0  ;;  %469 = vmatpush1.msra.mxu0 %v3726_v24  ;;  %v266_v24 = vld [vmem:[#allocation2 + $0x6c8] sm:$0xff] }
  0x2e   :  { %4520 = vmatpush1.msra.mxu1 %v3725_v26  ;;  %470 = vmatprep.subr.mxu0 %v4569_v0 }
  0x2f   :  { %4489 = vmatprep.subr.mxu1 %v4569_v0  ;;  %471 = vmatpush1.msra.mxu0 %v3725_v26  ;;  %v3797_v26 = vunpack.c.l.bf16 %v3908_v18  ;;  %v3915_v18 = vld [vmem:[%s6037_s2 + $0xc8] sm:$0xff]  }
  0x30   :  { %4521 = vmatpush2.msra.mxu1 %v3786_v27  ;;  %472 = vmatprep.subr.mxu0 %v4569_v0 }
  0x31   :  { %4490 = vmatprep.subr.mxu1 %v4569_v0  ;;  %473 = vmatpush2.msra.mxu0 %v3786_v27  ;;  %v65_v27 = vld [vmem:[#allocation2 + $0x80] sm:$0xff] }
  0x32   :  { %4522 = vmatpush2.msra.mxu1 %v3785_v29  ;;  %474 = vmatprep.subr.mxu0 %v4569_v0 }
  0x33   :  { %4491 = vmatprep.subr.mxu1 %v4569_v0  ;;  %475 = vmatpush2.msra.mxu0 %v3785_v29  ;;  %v265_v29 = vld [vmem:[#allocation2 + $0x6c0] sm:$0xff] }
  0x34   :  { %4523 = vmatpush2.msra.mxu1 %v3782_v30  ;;  %476 = vmatprep.subr.mxu0 %v4569_v0 }
  0x35   :  { %4492 = vmatprep.subr.mxu1 %v4569_v0  ;;  %477 = vmatpush2.msra.mxu0 %v3782_v30  ;;  %v3794_v30 = vunpack.c.h.bf16 %v3907_v25 }
  0x36   :  { %4524 = vmatpush2.msra.mxu1 %v3781_v32  ;;  %478 = vmatprep.subr.mxu0 %v4569_v0 }
  0x37   :  { %4493 = vmatprep.subr.mxu1 %v4569_v0  ;;  %479 = vmatpush2.msra.mxu0 %v3781_v32  ;;  %v3906_v32 = vld [vmem:[%s6037_s2 + $0x80] sm:$0xff]  }
  0x38   :  { %4525 = vmatpush2.msra.mxu1 %v3778_v33  ;;  %480 = vmatprep.subr.mxu0 %v4569_v0  ;;  %v3790_v37 = vunpack.c.h.bf16 %v3906_v32  ;;  %v3789_v40 = vunpack.c.l.bf16 %v3906_v32 }
  0x39   :  { %4494 = vmatprep.subr.mxu1 %v4569_v0  ;;  %481 = vmatpush2.msra.mxu0 %v3778_v33  ;;  %v3793_v33 = vunpack.c.l.bf16 %v3907_v25  ;;  %v3914_v25 = vld [vmem:[%s6037_s2 + $0xc0] sm:$0xff]  }
  0x3a   :  { %4526 = vmatpush2.msra.mxu1 %v3777_v35  ;;  %482 = vmatprep.subr.mxu0 %v4569_v0  ;;  %v3821_v32 = vunpack.c.l.bf16 %v3914_v25 }
  0x3b   :  { %4495 = vmatprep.subr.mxu1 %v4569_v0  ;;  %483 = vmatpush2.msra.mxu0 %v3777_v35  ;;  %v74_v35 = vld [vmem:[#allocation2 + $0xc8] sm:$0xff] }
  0x3c   :  { %4527 = vmatpush2.msra.mxu1 %v3774_v36  ;;  %484 = vmatprep.subr.mxu0 %v4569_v0 }
  0x3d   :  { %4496 = vmatprep.subr.mxu1 %v4569_v0  ;;  %485 = vmatpush2.msra.mxu0 %v3774_v36  ;;  %v269_v36 = vld [vmem:[#allocation2 + $0x6e0] sm:$0xff] }
  0x3e   :  { %4528 = vmatpush2.msra.mxu1 %v3773_v38  ;;  %486 = vmatprep.subr.mxu0 %v4569_v0 }
  0x3f   :  { %4497 = vmatprep.subr.mxu1 %v4569_v0  ;;  %487 = vmatpush2.msra.mxu0 %v3773_v38  ;;  %v274_v38 = vld [vmem:[#allocation2 + $0x708] sm:$0xff] }
  0x40   :  { %4529 = vmatpush2.msra.mxu1 %v3770_v39  ;;  %488 = vmatprep.subr.mxu0 %v4569_v0 }
  0x41   :  { %4498 = vmatprep.subr.mxu1 %v4569_v0  ;;  %489 = vmatpush2.msra.mxu0 %v3770_v39  ;;  %v3921_v39 = vld [vmem:[%s6037_s2 + $0xf8] sm:$0xff]  }
  0x42   :  { %4530 = vmatpush2.msra.mxu1 %v3769_v41  ;;  %490 = vmatprep.subr.mxu0 %v4569_v0 }
  0x43   :  { %4499 = vmatprep.subr.mxu1 %v4569_v0  ;;  %491 = vmatpush2.msra.mxu0 %v3769_v41  ;;  %v73_v41 = vld [vmem:[#allocation2 + $0xc0] sm:$0xff] }
  0x44   :  { %4531 = vmatpush2.msra.mxu1 %v3766_v42  ;;  %492 = vmatprep.subr.mxu0 %v4569_v0 }
  0x45   :  { %4500 = vmatprep.subr.mxu1 %v4569_v0  ;;  %493 = vmatpush2.msra.mxu0 %v3766_v42  ;;  %v78_v42 = vld [vmem:[#allocation2 + $0xe8] sm:$0xff] }
  0x46   :  { %4532 = vmatpush2.msra.mxu1 %v3765_v44  ;;  %494 = vmatprep.subr.mxu0 %v4569_v0 }
  0x47   :  { %4501 = vmatprep.subr.mxu1 %v4569_v0  ;;  %495 = vmatpush2.msra.mxu0 %v3765_v44  ;;  %v3850_v44 = vunpack.c.h.bf16 %v3921_v39 }
  0x48   :  { %4533 = vmatpush2.msra.mxu1 %v3762_v45  ;;  %496 = vmatprep.subr.mxu0 %v4569_v0 }
  0x49   :  { %4502 = vmatprep.subr.mxu1 %v4569_v0  ;;  %497 = vmatpush2.msra.mxu0 %v3762_v45  ;;  %v278_v45 = vld [vmem:[#allocation2 + $0x728] sm:$0xff] }
  0x4a   :  { %4534 = vmatpush2.msra.mxu1 %v3761_v47  ;;  %498 = vmatprep.subr.mxu0 %v4569_v0 }
  0x4b   :  { %4503 = vmatprep.subr.mxu1 %v4569_v0  ;;  %499 = vmatpush2.msra.mxu0 %v3761_v47  ;;  %v3849_v47 = vunpack.c.l.bf16 %v3921_v39  ;;  %v55_v39 = vld [vmem:[#allocation2 + $0x30] sm:$0xff] }
  0x4c   :  { %4535 = vmatpush2.msra.mxu1 %v3758_v48  ;;  %500 = vmatprep.subr.mxu0 %v4569_v0 }
  0x4d   :  { %4504 = vmatprep.subr.mxu1 %v4569_v0  ;;  %501 = vmatpush2.msra.mxu0 %v3758_v48  ;;  %v77_v48 = vld [vmem:[#allocation2 + $0xe0] sm:$0xff] }
  0x4e   :  { %4536 = vmatpush2.msra.mxu1 %v3757_v50  ;;  %502 = vmatprep.subr.mxu0 %v4569_v0 }
  0x4f   :  { %745 = vmatmul.mubr.f32.vlgmr.msra.gmra.mxu1 %v241_v51  ;;  %825 = vmatprep.subr.mxu1 %v4569_v0  ;;  %v3846_v51 = vunpack.c.h.bf16 %v3920_v46 }
  0x50   :  { %826 = vmatpush1.msra.mxu1 %v3818_v52  ;;  %749 = vmatprep.mubr.f32.mxu1 %v246_v53  ;;  %v282_v52 = vld [vmem:[#allocation2 + $0x748] sm:$0xff] }
  0x51   :  { %827 = vmatprep.subr.mxu1 %v4569_v0  ;;  %503 = vmatpush2.msra.mxu0 %v3757_v50  ;;  %v277_v50 = vld [vmem:[#allocation2 + $0x720] sm:$0xff]  ;;  %v3919_v53 = vld [vmem:[%s6037_s2 + $0xe8] sm:$0xff]  }
  0x52   :  { %828 = vmatpush1.msra.mxu1 %v3817_v55  ;;  %504 = vmatprep.mubr.f32.mxu0 %v50_v56  ;;  %v81_v55 = vld [vmem:[#allocation2 + $0x100] sm:$0xff]  ;;  %v86_v56 = vld [vmem:[#allocation2 + $0x128] sm:$0xff] }
  0x53   :  { %750 = vmatmul.mubr.f32.gmra.mxu1 %v245_v57  ;;  %829 = vmatprep.subr.mxu1 %v4569_v0  ;;  %v281_v57 = vld [vmem:[#allocation2 + $0x740] sm:$0xff] }
  0x54   :  { %830 = vmatpush1.msra.mxu1 %v3814_v58  ;;  %754 = vmatprep.mubr.f32.mxu1 %v250_v59  ;;  %v3842_v58 = vunpack.c.h.bf16 %v3919_v53  ;;  %v286_v59 = vld [vmem:[#allocation2 + $0x768] sm:$0xff] }
  0x55   :  { %831 = vmatprep.subr.mxu1 %v4569_v0  ;;  %505 = vmatmul.mubr.f32.vlgmr.msra.gmra.mxu0 %v49_v62  ;;  %v85_v62 = vld [vmem:[#allocation2 + $0x120] sm:$0xff] }
  0x56   :  { %832 = vmatpush1.msra.mxu1 %v3813_v61  ;;  %509 = vmatprep.mubr.f32.mxu0 %v54_v63  ;;  %v3841_v61 = vunpack.c.l.bf16 %v3919_v53  ;;  %v90_v63 = vld [vmem:[#allocation2 + $0x148] sm:$0xff]  ;;  %v72_v53 = vld [vmem:[#allocation2 + $0xb8] sm:$0xff] }
  0x57   :  { %755 = vmatmul.mubr.f32.gmra.mxu1 %v249_v1  ;;  %833 = vmatprep.subr.mxu1 %v4569_v0  ;;  %v285_v1 = vld [vmem:[#allocation2 + $0x760] sm:$0xff] }
  0x58   :  { %834 = vmatpush1.msra.mxu1 %v3810_v2  ;;  %759 = vmatprep.mubr.f32.mxu1 %v254_v3  ;;  %v3838_v2 = vunpack.c.h.bf16 %v3918_v60  ;;  %v290_v3 = vld [vmem:[#allocation2 + $0x788] sm:$0xff] }
  0x59   :  { %835 = vmatprep.subr.mxu1 %v4569_v0  ;;  %510 = vmatmul.mubr.f32.gmra.mxu0 %v53_v6  ;;  %v89_v6 = vld [vmem:[#allocation2 + $0x140] sm:$0xff] }
  0x5a   :  { %836 = vmatpush1.msra.mxu1 %v3809_v5  ;;  %514 = vmatprep.mubr.f32.mxu0 %v58_v7  ;;  %v3837_v5 = vunpack.c.l.bf16 %v3918_v60  ;;  %v94_v7 = vld [vmem:[#allocation2 + $0x168] sm:$0xff] }
  0x5b   :  { %760 = vmatmul.mubr.f32.gmra.mxu1 %v253_v8  ;;  %837 = vmatprep.subr.mxu1 %v4569_v0  ;;  %v289_v8 = vld [vmem:[#allocation2 + $0x780] sm:$0xff]  ;;  %v134_v60 = vld [vmem:[#allocation2 + $0x2a8] sm:$0xff] }
  0x5c   :  { %838 = vmatpush1.msra.mxu1 %v3806_v9  ;;  %764 = vmatprep.mubr.f32.mxu1 %v258_v10  ;;  %v3834_v9 = vunpack.c.h.bf16 %v3917_v4  ;;  %v294_v10 = vld [vmem:[#allocation2 + $0x7a8] sm:$0xff] }
  0x5d   :  { %839 = vmatprep.subr.mxu1 %v4569_v0  ;;  %515 = vmatmul.mubr.f32.gmra.mxu0 %v57_v13  ;;  %v93_v13 = vld [vmem:[#allocation2 + $0x160] sm:$0xff] }
  0x5e   :  { %840 = vmatpush1.msra.mxu1 %v3805_v12  ;;  %519 = vmatprep.mubr.f32.mxu0 %v62_v14  ;;  %v3833_v12 = vunpack.c.l.bf16 %v3917_v4  ;;  %v98_v14 = vld [vmem:[#allocation2 + $0x188] sm:$0xff]  ;;  %v137_v4 = vld [vmem:[#allocation2 + $0x2c0] sm:$0xff] }
  0x5f   :  { %765 = vmatmul.mubr.f32.gmra.mxu1 %v257_v15  ;;  %841 = vmatprep.subr.mxu1 %v4569_v0  ;;  %v293_v15 = vld [vmem:[#allocation2 + $0x7a0] sm:$0xff] }
  0x60   :  { %842 = vmatpush1.msra.mxu1 %v3802_v16  ;;  %769 = vmatprep.mubr.f32.mxu1 %v262_v17  ;;  %v3830_v16 = vunpack.c.h.bf16 %v3916_v11  ;;  %v298_v17 = vld [vmem:[#allocation2 + $0x7c8] sm:$0xff] }
  0x61   :  { %843 = vmatprep.subr.mxu1 %v4569_v0  ;;  %520 = vmatmul.mubr.f32.gmra.mxu0 %v61_v20  ;;  %v97_v20 = vld [vmem:[#allocation2 + $0x180] sm:$0xff] }
  0x62   :  { %844 = vmatpush1.msra.mxu1 %v3801_v19  ;;  %524 = vmatprep.mubr.f32.mxu0 %v66_v21  ;;  %v3829_v19 = vunpack.c.l.bf16 %v3916_v11  ;;  %v102_v21 = vld [vmem:[#allocation2 + $0x1a8] sm:$0xff] }
  0x63   :  { %770 = vmatmul.mubr.f32.gmra.mxu1 %v261_v22  ;;  %845 = vmatprep.subr.mxu1 %v4569_v0  ;;  %v297_v22 = vld [vmem:[#allocation2 + $0x7c0] sm:$0xff]  ;;  %v146_v11 = vld [vmem:[#allocation2 + $0x308] sm:$0xff] }
  0x64   :  { %846 = vmatpush1.msra.mxu1 %v3798_v23  ;;  %774 = vmatprep.mubr.f32.mxu1 %v266_v24  ;;  %v3826_v23 = vunpack.c.h.bf16 %v3915_v18  ;;  %v302_v24 = vld [vmem:[#allocation2 + $0x7e8] sm:$0xff] }
  0x65   :  { %847 = vmatprep.subr.mxu1 %v4569_v0  ;;  %525 = vmatmul.mubr.f32.gmra.mxu0 %v65_v27  ;;  %v101_v27 = vld [vmem:[#allocation2 + $0x1a0] sm:$0xff] }
  0x66   :  { %848 = vmatpush1.msra.mxu1 %v3797_v26  ;;  %529 = vmatprep.mubr.f32.mxu0 %v70_v28  ;;  %v3825_v26 = vunpack.c.l.bf16 %v3915_v18  ;;  %v106_v28 = vld [vmem:[#allocation2 + $0x1c8] sm:$0xff]  ;;  %v149_v18 = vld [vmem:[#allocation2 + $0x320] sm:$0xff] }
  0x67   :  { %775 = vmatmul.mubr.f32.gmra.mxu1 %v265_v29  ;;  %849 = vmatprep.subr.mxu1 %v4569_v0  ;;  %v301_v29 = vld [vmem:[#allocation2 + $0x7e0] sm:$0xff] }
  0x68   :  { %850 = vmatpush1.msra.mxu1 %v3794_v30  ;;  %779 = vmatprep.mubr.f32.mxu1 %v270_v31  ;;  %v3822_v30 = vunpack.c.h.bf16 %v3914_v25  ;;  %v52_v31 = vld [vmem:[#allocation2 + $0x18] sm:$0xff]  ;;  %v99_v25 = vld [vmem:[#allocation2 + $0x190] sm:$0xff] }
  0x69   :  { %851 = vmatprep.subr.mxu1 %v4569_v0  ;;  %530 = vmatmul.mubr.f32.gmra.mxu0 %v69_v34  ;;  %v110_v34 = vld [vmem:[#allocation2 + $0x1e8] sm:$0xff] }
  0x6a   :  { %852 = vmatpush1.msra.mxu1 %v3793_v33  ;;  %534 = vmatprep.mubr.f32.mxu0 %v74_v35  ;;  %v105_v33 = vld [vmem:[#allocation2 + $0x1c0] sm:$0xff]  ;;  %v51_v35 = vld [vmem:[#allocation2 + $0x10] sm:$0xff] }
  0x6b   :  { %780 = vmatmul.mubr.f32.gmra.mxu1 %v269_v36  ;;  %853 = vmatprep.subr.mxu1 %v4569_v0  ;;  %v56_v36 = vld [vmem:[#allocation2 + $0x38] sm:$0xff] }
  0x6c   :  { %854 = vmatpush1.msra.mxu1 %v3790_v37  ;;  %784 = vmatprep.mubr.f32.mxu1 %v274_v38  ;;  %v109_v37 = vld [vmem:[#allocation2 + $0x1e0] sm:$0xff]  ;;  %v114_v38 = vld [vmem:[#allocation2 + $0x208] sm:$0xff] }
  0x6d   :  { %855 = vmatprep.subr.mxu1 %v4569_v0  ;;  %535 = vmatmul.mubr.f32.gmra.mxu0 %v73_v41  ;;  %v113_v41 = vld [vmem:[#allocation2 + $0x200] sm:$0xff] }
  0x6e   :  { %856 = vmatpush1.msra.mxu1 %v3789_v40  ;;  %539 = vmatprep.mubr.f32.mxu0 %v78_v42  ;;  %v60_v40 = vld [vmem:[#allocation2 + $0x58] sm:$0xff]  ;;  %v118_v42 = vld [vmem:[#allocation2 + $0x228] sm:$0xff] }
  0x6f   :  { %785 = vmatmul.mubr.f32.gmra.mxu1 %v273_v43  ;;  %857 = vmatprep.subr.mxu1 %v4569_v0  ;;  %v59_v43 = vld [vmem:[#allocation2 + $0x50] sm:$0xff] }
  0x70   :  { %858 = vmatpush2.msra.mxu1 %v3850_v44  ;;  %789 = vmatprep.mubr.f32.mxu1 %v278_v45  ;;  %v64_v44 = vld [vmem:[#allocation2 + $0x78] sm:$0xff]  ;;  %v117_v45 = vld [vmem:[#allocation2 + $0x220] sm:$0xff] }
  0x71   :  { %859 = vmatprep.subr.mxu1 %v4569_v0  ;;  %540 = vmatmul.mubr.f32.gmra.mxu0 %v77_v48  ;;  %v63_v48 = vld [vmem:[#allocation2 + $0x70] sm:$0xff] }
  0x72   :  { %860 = vmatpush2.msra.mxu1 %v3849_v47  ;;  %544 = vmatprep.mubr.f32.mxu0 %v82_v49  ;;  %v122_v47 = vld [vmem:[#allocation2 + $0x248] sm:$0xff]  ;;  %v68_v49 = vld [vmem:[#allocation2 + $0x98] sm:$0xff] }
  0x73   :  { %790 = vmatmul.mubr.f32.gmra.mxu1 %v277_v50  ;;  %861 = vmatprep.subr.mxu1 %v4569_v0  ;;  %v121_v50 = vld [vmem:[#allocation2 + $0x240] sm:$0xff] }
  0x74   :  { %862 = vmatpush2.msra.mxu1 %v3846_v51  ;;  %794 = vmatprep.mubr.f32.mxu1 %v282_v52  ;;  %v126_v51 = vld [vmem:[#allocation2 + $0x268] sm:$0xff]  ;;  %v67_v52 = vld [vmem:[#allocation2 + $0x90] sm:$0xff] }
  0x75   :  { %863 = vmatprep.subr.mxu1 %v4569_v0  ;;  %545 = vmatmul.mubr.f32.gmra.mxu0 %v81_v55  ;;  %v130_v55 = vld [vmem:[#allocation2 + $0x288] sm:$0xff] }
  0x76   :  { %864 = vmatpush2.msra.mxu1 %v3845_v54  ;;  %549 = vmatprep.mubr.f32.mxu0 %v86_v56  ;;  %v125_v54 = vld [vmem:[#allocation2 + $0x260] sm:$0xff]  ;;  %v71_v56 = vld [vmem:[#allocation2 + $0xb0] sm:$0xff] }
  0x77   :  { %795 = vmatmul.mubr.f32.gmra.mxu1 %v281_v57  ;;  %865 = vmatprep.subr.mxu1 %v4569_v0  ;;  %v76_v57 = vld [vmem:[#allocation2 + $0xd8] sm:$0xff] }
  0x78   :  { %866 = vmatpush2.msra.mxu1 %v3842_v58  ;;  %799 = vmatprep.mubr.f32.mxu1 %v286_v59  ;;  %v129_v59 = vld [vmem:[#allocation2 + $0x280] sm:$0xff] }
  0x79   :  { %867 = vmatprep.subr.mxu1 %v4569_v0  ;;  %550 = vmatmul.mubr.f32.gmra.mxu0 %v85_v62  ;;  %v80_v62 = vld [vmem:[#allocation2 + $0xf8] sm:$0xff] }
  0x7a   :  { %868 = vmatpush2.msra.mxu1 %v3841_v61  ;;  %554 = vmatprep.mubr.f32.mxu0 %v90_v63  ;;  %v75_v61 = vld [vmem:[#allocation2 + $0xd0] sm:$0xff]  ;;  %v133_v63 = vld [vmem:[#allocation2 + $0x2a0] sm:$0xff] }
  0x7b   :  { %800 = vmatmul.mubr.f32.gmra.mxu1 %v285_v1  ;;  %869 = vmatprep.subr.mxu1 %v4569_v0  ;;  %v138_v1 = vld [vmem:[#allocation2 + $0x2c8] sm:$0xff] }
  0x7c   :  { %870 = vmatpush2.msra.mxu1 %v3838_v2  ;;  %804 = vmatprep.mubr.f32.mxu1 %v290_v3  ;;  %v79_v2 = vld [vmem:[#allocation2 + $0xf0] sm:$0xff]  ;;  %v84_v3 = vld [vmem:[#allocation2 + $0x118] sm:$0xff] }
  0x7d   :  { %871 = vmatprep.subr.mxu1 %v4569_v0  ;;  %555 = vmatmul.mubr.f32.gmra.mxu0 %v89_v6  ;;  %v83_v6 = vld [vmem:[#allocation2 + $0x110] sm:$0xff] }
  0x7e   :  { %872 = vmatpush2.msra.mxu1 %v3837_v5  ;;  %559 = vmatprep.mubr.f32.mxu0 %v94_v7  ;;  %v142_v5 = vld [vmem:[#allocation2 + $0x2e8] sm:$0xff]  ;;  %v88_v7 = vld [vmem:[#allocation2 + $0x138] sm:$0xff] }
  0x7f   :  { %805 = vmatmul.mubr.f32.gmra.mxu1 %v289_v8  ;;  %873 = vmatprep.subr.mxu1 %v4569_v0  ;;  %v3927_v8 = vld [vmem:[%s6039_s4 + $0x30] sm:$0xff]  }
  0x80   :  { %874 = vmatpush2.msra.mxu1 %v3834_v9  ;;  %809 = vmatprep.mubr.f32.mxu1 %v294_v10  ;;  %v141_v9 = vld [vmem:[#allocation2 + $0x2e0] sm:$0xff]  ;;  %v3878_v10 = vunpack.c.h.bf16 %v3927_v8 }
  0x81   :  { %875 = vmatprep.subr.mxu1 %v4569_v0  ;;  %560 = vmatmul.mubr.f32.gmra.mxu0 %v93_v13  ;;  %v92_v13 = vld [vmem:[#allocation2 + $0x158] sm:$0xff] }
  0x82   :  { %876 = vmatpush2.msra.mxu1 %v3833_v12  ;;  %564 = vmatprep.mubr.f32.mxu0 %v98_v14  ;;  %v87_v12 = vld [vmem:[#allocation2 + $0x130] sm:$0xff]  ;;  %v145_v14 = vld [vmem:[#allocation2 + $0x300] sm:$0xff] }
  0x83   :  { %810 = vmatmul.mubr.f32.gmra.mxu1 %v293_v15  ;;  %877 = vmatprep.subr.mxu1 %v4569_v0  ;;  %v150_v15 = vld [vmem:[#allocation2 + $0x328] sm:$0xff] }
  0x84   :  { %878 = vmatpush2.msra.mxu1 %v3830_v16  ;;  %814 = vmatprep.mubr.f32.mxu1 %v298_v17  ;;  %v91_v16 = vld [vmem:[#allocation2 + $0x150] sm:$0xff]  ;;  %v96_v17 = vld [vmem:[#allocation2 + $0x178] sm:$0xff] }
  0x85   :  { %879 = vmatprep.subr.mxu1 %v4569_v0  ;;  %565 = vmatmul.mubr.f32.gmra.mxu0 %v97_v20  ;;  %v95_v20 = vld [vmem:[#allocation2 + $0x170] sm:$0xff] }
  0x86   :  { %880 = vmatpush2.msra.mxu1 %v3829_v19  ;;  %569 = vmatprep.mubr.f32.mxu0 %v102_v21  ;;  %v154_v19 = vld [vmem:[#allocation2 + $0x348] sm:$0xff]  ;;  %v100_v21 = vld [vmem:[#allocation2 + $0x198] sm:$0xff] }
  0x87   :  { %815 = vmatmul.mubr.f32.gmra.mxu1 %v297_v22  ;;  %881 = vmatprep.subr.mxu1 %v4569_v0  ;;  %v3877_v22 = vunpack.c.l.bf16 %v3927_v8  ;;  %v132_v8 = vld [vmem:[#allocation2 + $0x298] sm:$0xff] }
  0x88   :  { %882 = vmatpush2.msra.mxu1 %v3826_v23  ;;  %819 = vmatprep.mubr.f32.mxu1 %v302_v24  ;;  %v153_v23 = vld [vmem:[#allocation2 + $0x340] sm:$0xff]  ;;  %v158_v24 = vld [vmem:[#allocation2 + $0x368] sm:$0xff] }
  0x89   :  { %883 = vmatprep.subr.mxu1 %v4569_v0  ;;  %570 = vmatmul.mubr.f32.gmra.mxu0 %v101_v27  ;;  %v157_v27 = vld [vmem:[#allocation2 + $0x360] sm:$0xff] }
  0x8a   :  { %884 = vmatpush2.msra.mxu1 %v3825_v26  ;;  %574 = vmatprep.mubr.f32.mxu0 %v106_v28  ;;  %v104_v26 = vld [vmem:[#allocation2 + $0x1b8] sm:$0xff]  ;;  %v3926_v28 = vld [vmem:[%s6039_s4 + $0x28] sm:$0xff]  }
  0x8b   :  { %820 = vmatmul.mubr.f32.gmra.mxu1 %v301_v29  ;;  %885 = vmatprep.subr.mxu1 %v4569_v0  ;;  %v162_v29 = vld [vmem:[#allocation2 + $0x388] sm:$0xff] }
  0x8c   :  { %886 = vmatpush2.msra.mxu1 %v3822_v30  ;;  %889 = vmatprep.mubr.f32.mxu1 %v52_v31  ;;  %v3874_v30 = vunpack.c.h.bf16 %v3926_v28  ;;  %v103_v31 = vld [vmem:[#allocation2 + $0x1b0] sm:$0xff] }
  0x8d   :  { %887 = vmatprep.subr.mxu1 %v4569_v0  ;;  %575 = vmatmul.mubr.f32.gmra.mxu0 %v105_v33  ;;  %v3928_v0 = vld [vmem:[%s6039_s4 + $0x38] sm:$0xff]   ;;  %v3873_v33 = vunpack.c.l.bf16 %v3926_v28 }
  0x8e   :  { %888 = vmatpush2.msra.mxu1 %v3821_v32  ;;  %579 = vmatprep.mubr.f32.mxu0 %v110_v34  ;;  %v3882_v46 = vunpack.c.h.bf16 %v3928_v0  ;;  %v3881_v58 = vunpack.c.l.bf16 %v3928_v0  ;;  %v108_v32 = vld [vmem:[#allocation2 + $0x1d8] sm:$0xff]  ;;  %v161_v34 = vld [vmem:[#allocation2 + $0x380] sm:$0xff]  ;;  %v111_v0 = vld [vmem:[#allocation2 + $0x1f0] sm:$0xff] }
  0x8f   :  { %890 = vmatmul.mubr.f32.vlgmr.msra.gmra.mxu1 %v51_v35  ;;  %v3925_v35 = vld [vmem:[%s6039_s4 + $0x20] sm:$0xff]   ;;  %v152_v28 = vld [vmem:[#allocation2 + $0x338] sm:$0xff] }
  0x90   :  { %894 = vmatprep.mubr.f32.mxu1 %v56_v36  ;;  %4143 = vmatprep.subr.mxu0 %v3882_v46  ;;  %v166_v36 = vld [vmem:[#allocation2 + $0x3a8] sm:$0xff] }
  0x91   :  { %580 = vmatmul.mubr.f32.gmra.mxu0 %v109_v37  ;;  %v3870_v37 = vunpack.c.h.bf16 %v3925_v35 }
  0x92   :  { %584 = vmatprep.mubr.f32.mxu0 %v114_v38  ;;  %4144 = vmatpush3.msra.mxu0 %v3882_v46  ;;  %v107_v38 = vld [vmem:[#allocation2 + $0x1d0] sm:$0xff] }
  0x93   :  { %895 = vmatmul.mubr.f32.gmra.mxu1 %v55_v39  ;;  %4145 = vmatprep.subr.mxu0 %v3881_v58  ;;  %v112_v39 = vld [vmem:[#allocation2 + $0x1f8] sm:$0xff] }
  0x94   :  { %899 = vmatprep.mubr.f32.mxu1 %v60_v40  ;;  %4146 = vmatpush3.msra.mxu0 %v3881_v58  ;;  %v3869_v40 = vunpack.c.l.bf16 %v3925_v35  ;;  %v119_v58 = vld [vmem:[#allocation2 + $0x230] sm:$0xff] }
  0x95   :  { %585 = vmatmul.mubr.f32.gmra.mxu0 %v113_v41  ;;  %4147 = vmatprep.subr.mxu0 %v3878_v10  ;;  %v165_v41 = vld [vmem:[#allocation2 + $0x3a0] sm:$0xff]  ;;  %v155_v35 = vld [vmem:[#allocation2 + $0x350] sm:$0xff] }
  0x96   :  { %589 = vmatprep.mubr.f32.mxu0 %v118_v42  ;;  %4148 = vmatpush3.msra.mxu0 %v3878_v10  ;;  %v3924_v42 = vld [vmem:[%s6039_s4 + $0x18] sm:$0xff]   ;;  %v190_v10 = vld [vmem:[#allocation2 + $0x468] sm:$0xff] }
  0x97   :  { %900 = vmatmul.mubr.f32.gmra.mxu1 %v59_v43  ;;  %4149 = vmatprep.subr.mxu0 %v3877_v22  ;;  %v170_v43 = vld [vmem:[#allocation2 + $0x3c8] sm:$0xff]  ;;  %v3865_v46 = vunpack.c.l.bf16 %v3924_v42 }
  0x98   :  { %904 = vmatprep.mubr.f32.mxu1 %v64_v44  ;;  %4150 = vmatpush3.msra.mxu0 %v3877_v22  ;;  %v3866_v44 = vunpack.c.h.bf16 %v3924_v42  ;;  %v202_v22 = vld [vmem:[#allocation2 + $0x4c8] sm:$0xff] }
  0x99   :  { %590 = vmatmul.mubr.f32.gmra.mxu0 %v117_v45  ;;  %4151 = vmatprep.subr.mxu0 %v3874_v30  ;;  %v116_v45 = vld [vmem:[#allocation2 + $0x218] sm:$0xff]  ;;  %v222_v42 = vld [vmem:[#allocation2 + $0x568] sm:$0xff] }
  0x9a   :  { %594 = vmatprep.mubr.f32.mxu0 %v122_v47  ;;  %4152 = vmatpush3.msra.mxu0 %v3874_v30  ;;  %v169_v47 = vld [vmem:[#allocation2 + $0x3c0] sm:$0xff]  ;;  %v210_v30 = vld [vmem:[#allocation2 + $0x508] sm:$0xff] }
  0x9b   :  { %905 = vmatmul.mubr.f32.gmra.mxu1 %v63_v48  ;;  %4153 = vmatprep.subr.mxu0 %v3873_v33  ;;  %v3923_v48 = vld [vmem:[%s6039_s4 + $0x10] sm:$0xff]  }
  0x9c   :  { %909 = vmatprep.mubr.f32.mxu1 %v68_v49  ;;  %4154 = vmatpush3.msra.mxu0 %v3873_v33  ;;  %v174_v49 = vld [vmem:[#allocation2 + $0x3e8] sm:$0xff]  ;;  %v209_v33 = vld [vmem:[#allocation2 + $0x500] sm:$0xff] }
  0x9d   :  { %595 = vmatmul.mubr.f32.gmra.mxu0 %v121_v50  ;;  %4155 = vmatprep.subr.mxu0 %v3870_v37  ;;  %v3862_v50 = vunpack.c.h.bf16 %v3923_v48 }
  0x9e   :  { %599 = vmatprep.mubr.f32.mxu0 %v126_v51  ;;  %4156 = vmatpush3.msra.mxu0 %v3870_v37  ;;  %v115_v51 = vld [vmem:[#allocation2 + $0x210] sm:$0xff]  ;;  %v213_v37 = vld [vmem:[#allocation2 + $0x520] sm:$0xff] }
  0x9f   :  { %910 = vmatmul.mubr.f32.gmra.mxu1 %v67_v52  ;;  %4157 = vmatprep.subr.mxu0 %v3869_v40  ;;  %v120_v52 = vld [vmem:[#allocation2 + $0x238] sm:$0xff] }
  0xa0   :  { %914 = vmatprep.mubr.f32.mxu1 %v72_v53  ;;  %4158 = vmatpush3.msra.mxu0 %v3869_v40  ;;  %v3861_v53 = vunpack.c.l.bf16 %v3923_v48  ;;  %v164_v40 = vld [vmem:[#allocation2 + $0x398] sm:$0xff]  ;;  %v225_v48 = vld [vmem:[#allocation2 + $0x580] sm:$0xff] }
  0xa1   :  { %600 = vmatmul.mubr.f32.gmra.mxu0 %v125_v54  ;;  %4159 = vmatprep.subr.mxu0 %v3866_v44  ;;  %v173_v54 = vld [vmem:[#allocation2 + $0x3e0] sm:$0xff] }
  0xa2   :  { %604 = vmatprep.mubr.f32.mxu0 %v130_v55  ;;  %4160 = vmatpush3.msra.mxu0 %v3866_v44  ;;  %v3922_v55 = vld [vmem:[%s6039_s4 + $0x8] sm:$0xff]   ;;  %v168_v44 = vld [vmem:[#allocation2 + $0x3b8] sm:$0xff] }
  0xa3   :  { %915 = vmatmul.mubr.f32.gmra.mxu1 %v71_v56  ;;  %4161 = vmatprep.subr.mxu0 %v3865_v46  ;;  %v178_v56 = vld [vmem:[#allocation2 + $0x408] sm:$0xff] }
  0xa4   :  { %919 = vmatprep.mubr.f32.mxu1 %v76_v57  ;;  %4162 = vmatpush3.msra.mxu0 %v3865_v46  ;;  %v3858_v57 = vunpack.c.h.bf16 %v3922_v55  ;;  %v167_v46 = vld [vmem:[#allocation2 + $0x3b0] sm:$0xff] }
  0xa5   :  { %605 = vmatmul.mubr.f32.gmra.mxu0 %v129_v59  ;;  %4163 = vmatprep.subr.mxu0 %v3862_v50  ;;  %v124_v59 = vld [vmem:[#allocation2 + $0x258] sm:$0xff] }
  0xa6   :  { %609 = vmatprep.mubr.f32.mxu0 %v134_v60  ;;  %4164 = vmatpush3.msra.mxu0 %v3862_v50  ;;  %v3857_v60 = vunpack.c.l.bf16 %v3922_v55  ;;  %v171_v50 = vld [vmem:[#allocation2 + $0x3d0] sm:$0xff]  ;;  %v180_v55 = vld [vmem:[#allocation2 + $0x418] sm:$0xff] }
  0xa7   :  { %920 = vmatmul.mubr.f32.gmra.mxu1 %v75_v61  ;;  %4165 = vmatprep.subr.mxu0 %v3861_v53  ;;  %v177_v61 = vld [vmem:[#allocation2 + $0x400] sm:$0xff] }
  0xa8   :  { %924 = vmatprep.mubr.f32.mxu1 %v80_v62  ;;  %4166 = vmatpush3.msra.mxu0 %v3861_v53  ;;  %v3852_v62 = vld [vmem:[%s6039_s4] sm:$0xff]   ;;  %v234_v53 = vld [vmem:[#allocation2 + $0x5c8] sm:$0xff] }
  0xa9   :  { %610 = vmatmul.mubr.f32.gmra.mxu0 %v133_v63  ;;  %4167 = vmatprep.subr.mxu0 %v3858_v57  ;;  %v182_v63 = vld [vmem:[#allocation2 + $0x428] sm:$0xff] }
  0xaa   :  { %614 = vmatprep.mubr.f32.mxu0 %v138_v1  ;;  %4168 = vmatpush3.msra.mxu0 %v3858_v57  ;;  %v3854_v1 = vunpack.c.h.bf16 %v3852_v62  ;;  %v238_v57 = vld [vmem:[#allocation2 + $0x5e8] sm:$0xff] }
  0xab   :  { %925 = vmatmul.mubr.f32.gmra.mxu1 %v79_v2  ;;  %4169 = vmatprep.subr.mxu0 %v3857_v60  ;;  %v123_v2 = vld [vmem:[#allocation2 + $0x250] sm:$0xff] }
  0xac   :  { %929 = vmatprep.mubr.f32.mxu1 %v84_v3  ;;  %4170 = vmatpush3.msra.mxu0 %v3857_v60  ;;  %v128_v3 = vld [vmem:[#allocation2 + $0x278] sm:$0xff]  ;;  %v237_v60 = vld [vmem:[#allocation2 + $0x5e0] sm:$0xff] }
  0xad   :  { %615 = vmatmul.mubr.f32.gmra.mxu0 %v137_v4  ;;  %4171 = vmatprep.subr.mxu0 %v3854_v1  ;;  %v3853_v4 = vunpack.c.l.bf16 %v3852_v62  ;;  %v183_v62 = vld [vmem:[#allocation2 + $0x430] sm:$0xff] }
  0xae   :  { %619 = vmatprep.mubr.f32.mxu0 %v142_v5  ;;  %v181_v5 = vld [vmem:[#allocation2 + $0x420] sm:$0xff]  ;;  %4172 = vmatpush3.msra.mxu0 %v3854_v1  ;;  %v188_v1 = vld [vmem:[#allocation2 + $0x458] sm:$0xff] }
  0xaf   :  { %930 = vmatmul.mubr.f32.gmra.mxu1 %v83_v6  ;;  %v186_v6 = vld [vmem:[#allocation2 + $0x448] sm:$0xff]  ;;  %4173 = vmatprep.subr.mxu0 %v3853_v4 }
  0xb0   :  { %934 = vmatprep.mubr.f32.mxu1 %v88_v7  ;;  %v127_v7 = vld [vmem:[#allocation2 + $0x270] sm:$0xff]  ;;  %4174 = vmatpush3.msra.mxu0 %v3853_v4 }
  0xb1   :  { %620 = vmatmul.mubr.f32.gmra.mxu0 %v141_v9  ;;  %v185_v9 = vld [vmem:[#allocation2 + $0x440] sm:$0xff] }
  0xb2   :  { %624 = vmatprep.mubr.f32.mxu0 %v146_v11  ;;  %v131_v11 = vld [vmem:[#allocation2 + $0x290] sm:$0xff] }
  0xb3   :  { %935 = vmatmul.mubr.f32.gmra.mxu1 %v87_v12  ;;  %v136_v12 = vld [vmem:[#allocation2 + $0x2b8] sm:$0xff] }
  0xb4   :  { %939 = vmatprep.mubr.f32.mxu1 %v92_v13  ;;  %v189_v13 = vld [vmem:[#allocation2 + $0x460] sm:$0xff] }
  0xb5   :  { %625 = vmatmul.mubr.f32.gmra.mxu0 %v145_v14  ;;  %v194_v14 = vld [vmem:[#allocation2 + $0x488] sm:$0xff] }
  0xb6   :  { %629 = vmatprep.mubr.f32.mxu0 %v150_v15  ;;  %v135_v15 = vld [vmem:[#allocation2 + $0x2b0] sm:$0xff] }
  0xb7   :  { %940 = vmatmul.mubr.f32.gmra.mxu1 %v91_v16  ;;  %v140_v16 = vld [vmem:[#allocation2 + $0x2d8] sm:$0xff] }
  0xb8   :  { %944 = vmatprep.mubr.f32.mxu1 %v96_v17  ;;  %v193_v17 = vld [vmem:[#allocation2 + $0x480] sm:$0xff] }
  0xb9   :  { %630 = vmatmul.mubr.f32.gmra.mxu0 %v149_v18  ;;  %v198_v18 = vld [vmem:[#allocation2 + $0x4a8] sm:$0xff] }
  0xba   :  { %634 = vmatprep.mubr.f32.mxu0 %v154_v19  ;;  %v139_v19 = vld [vmem:[#allocation2 + $0x2d0] sm:$0xff] }
  0xbb   :  { %945 = vmatmul.mubr.f32.gmra.mxu1 %v95_v20  ;;  %v144_v20 = vld [vmem:[#allocation2 + $0x2f8] sm:$0xff] }
  0xbc   :  { %949 = vmatprep.mubr.f32.mxu1 %v100_v21  ;;  %v197_v21 = vld [vmem:[#allocation2 + $0x4a0] sm:$0xff] }
  0xbd   :  { %635 = vmatmul.mubr.f32.gmra.mxu0 %v153_v23  ;;  %v143_v23 = vld [vmem:[#allocation2 + $0x2f0] sm:$0xff] }
  0xbe   :  { %639 = vmatprep.mubr.f32.mxu0 %v158_v24  ;;  %v148_v24 = vld [vmem:[#allocation2 + $0x318] sm:$0xff] }
  0xbf   :  { %950 = vmatmul.mubr.f32.gmra.mxu1 %v99_v25  ;;  %v201_v25 = vld [vmem:[#allocation2 + $0x4c0] sm:$0xff] }
  0xc0   :  { %954 = vmatprep.mubr.f32.mxu1 %v104_v26  ;;  %v206_v26 = vld [vmem:[#allocation2 + $0x4e8] sm:$0xff] }
  0xc1   :  { %640 = vmatmul.mubr.f32.gmra.mxu0 %v157_v27  ;;  %v147_v27 = vld [vmem:[#allocation2 + $0x310] sm:$0xff] }
  0xc2   :  { %644 = vmatprep.mubr.f32.mxu0 %v162_v29  ;;  %v205_v29 = vld [vmem:[#allocation2 + $0x4e0] sm:$0xff] }
  0xc3   :  { %955 = vmatmul.mubr.f32.gmra.mxu1 %v103_v31  ;;  %v151_v31 = vld [vmem:[#allocation2 + $0x330] sm:$0xff] }
  0xc4   :  { %959 = vmatprep.mubr.f32.mxu1 %v108_v32  ;;  %v156_v32 = vld [vmem:[#allocation2 + $0x358] sm:$0xff] }
  0xc5   :  { %645 = vmatmul.mubr.f32.gmra.mxu0 %v161_v34  ;;  %v214_v34 = vld [vmem:[#allocation2 + $0x528] sm:$0xff] }
  0xc6   :  { %649 = vmatprep.mubr.f32.mxu0 %v166_v36  ;;  %v160_v36 = vld [vmem:[#allocation2 + $0x378] sm:$0xff] }
  0xc7   :  { %960 = vmatmul.mubr.f32.gmra.mxu1 %v107_v38  ;;  %v218_v38 = vld [vmem:[#allocation2 + $0x548] sm:$0xff] }
  0xc8   :  { %964 = vmatprep.mubr.f32.mxu1 %v112_v39  ;;  %v159_v39 = vld [vmem:[#allocation2 + $0x370] sm:$0xff] }
  0xc9   :  { %650 = vmatmul.mubr.f32.gmra.mxu0 %v165_v41  ;;  %v217_v41 = vld [vmem:[#allocation2 + $0x540] sm:$0xff] }
  0xca   :  { %654 = vmatprep.mubr.f32.mxu0 %v170_v43  ;;  %v163_v43 = vld [vmem:[#allocation2 + $0x390] sm:$0xff] }
  0xcb   :  { %965 = vmatmul.mubr.f32.gmra.mxu1 %v111_v0  ;;  %v221_v0 = vld [vmem:[#allocation2 + $0x560] sm:$0xff] }
  0xcc   :  { %969 = vmatprep.mubr.f32.mxu1 %v116_v45  ;;  %v226_v45 = vld [vmem:[#allocation2 + $0x588] sm:$0xff] }
  0xcd   :  { %655 = vmatmul.mubr.f32.gmra.mxu0 %v169_v47  ;;  %v172_v47 = vld [vmem:[#allocation2 + $0x3d8] sm:$0xff] }
  0xce   :  { %659 = vmatprep.mubr.f32.mxu0 %v174_v49  ;;  %v230_v49 = vld [vmem:[#allocation2 + $0x5a8] sm:$0xff] }
  0xcf   :  { %970 = vmatmul.mubr.f32.gmra.mxu1 %v115_v51  ;;  %v176_v51 = vld [vmem:[#allocation2 + $0x3f8] sm:$0xff] }
  0xd0   :  { %974 = vmatprep.mubr.f32.mxu1 %v120_v52  ;;  %v229_v52 = vld [vmem:[#allocation2 + $0x5a0] sm:$0xff] }
  0xd1   :  { %660 = vmatmul.mubr.f32.gmra.mxu0 %v173_v54  ;;  %v175_v54 = vld [vmem:[#allocation2 + $0x3f0] sm:$0xff] }
  0xd2   :  { %664 = vmatprep.mubr.f32.mxu0 %v178_v56  ;;  %v233_v56 = vld [vmem:[#allocation2 + $0x5c0] sm:$0xff] }
  0xd3   :  { %975 = vmatmul.mubr.f32.gmra.mxu1 %v119_v58  ;;  %v179_v58 = vld [vmem:[#allocation2 + $0x410] sm:$0xff] }
  0xd4   :  { %979 = vmatprep.mubr.f32.mxu1 %v124_v59  ;;  %v184_v59 = vld [vmem:[#allocation2 + $0x438] sm:$0xff] }
  0xd5   :  { %665 = vmatmul.mubr.f32.gmra.mxu0 %v177_v61 }
  0xd6   :  { %669 = vmatprep.mubr.f32.mxu0 %v182_v63 }
  0xd7   :  { %980 = vmatmul.mubr.f32.gmra.mxu1 %v123_v2 }
  0xd8   :  { %984 = vmatprep.mubr.f32.mxu1 %v128_v3  ;;  %v187_v3 = vld [vmem:[#allocation2 + $0x450] sm:$0xff] }
  0xd9   :  { %670 = vmatmul.mubr.f32.gmra.mxu0 %v181_v5  ;;  %v192_v5 = vld [vmem:[#allocation2 + $0x478] sm:$0xff] }
  0xda   :  { %674 = vmatprep.mubr.f32.mxu0 %v186_v6 }
  0xdb   :  { %985 = vmatmul.mubr.f32.gmra.mxu1 %v127_v7 }
  0xdc   :  { %989 = vmatprep.mubr.f32.mxu1 %v132_v8 }
  0xdd   :  { %675 = vmatmul.mubr.f32.gmra.mxu0 %v185_v9  ;;  %v191_v9 = vld [vmem:[#allocation2 + $0x470] sm:$0xff] }
  0xde   :  { %679 = vmatprep.mubr.f32.mxu0 %v190_v10 }
  0xdf   :  { %990 = vmatmul.mubr.f32.gmra.mxu1 %v131_v11  ;;  %v196_v11 = vld [vmem:[#allocation2 + $0x498] sm:$0xff] }
  0xe0   :  { %994 = vmatprep.mubr.f32.mxu1 %v136_v12 }
  0xe1   :  { %680 = vmatmul.mubr.f32.gmra.mxu0 %v189_v13 }
  0xe2   :  { %684 = vmatprep.mubr.f32.mxu0 %v194_v14 }
  0xe3   :  { %995 = vmatmul.mubr.f32.gmra.mxu1 %v135_v15  ;;  %v195_v15 = vld [vmem:[#allocation2 + $0x490] sm:$0xff] }
  0xe4   :  { %999 = vmatprep.mubr.f32.mxu1 %v140_v16 }
  0xe5   :  { %685 = vmatmul.mubr.f32.gmra.mxu0 %v193_v17  ;;  %v200_v17 = vld [vmem:[#allocation2 + $0x4b8] sm:$0xff] }
  0xe6   :  { %689 = vmatprep.mubr.f32.mxu0 %v198_v18 }
  0xe7   :  { %1000 = vmatmul.mubr.f32.gmra.mxu1 %v139_v19  ;;  %v4861_v19 = vld [vmem:[%s6041_s6 + $0x8] sm:$0xff]  }
  0xe8   :  { %1004 = vmatprep.mubr.f32.mxu1 %v144_v20 }
  0xe9   :  { %690 = vmatmul.mubr.f32.gmra.mxu0 %v197_v21 }
  0xea   :  { %694 = vmatprep.mubr.f32.mxu0 %v202_v22  ;;  %v3890_v22 = vunpack.c.h.bf16 %v4861_v19 }
  0xeb   :  { %1005 = vmatmul.mubr.f32.gmra.mxu1 %v143_v23  ;;  %v199_v23 = vld [vmem:[#allocation2 + $0x4b0] sm:$0xff] }
  0xec   :  { %1009 = vmatprep.mubr.f32.mxu1 %v148_v24  ;;  %4271 = vmatprep.subr.mxu1 %v3890_v22 }
  0xed   :  { %695 = vmatmul.mubr.f32.gmra.mxu0 %v201_v25  ;;  %v204_v25 = vld [vmem:[#allocation2 + $0x4d8] sm:$0xff]  ;;  %4272 = vmatpush3.msra.mxu1 %v3890_v22  ;;  %v235_v22 = vld [vmem:[#allocation2 + $0x5d0] sm:$0xff] }
  0xee   :  { %699 = vmatprep.mubr.f32.mxu0 %v206_v26 }
  0xef   :  { %1010 = vmatmul.mubr.f32.gmra.mxu1 %v147_v27 }
  0xf0   :  { %1014 = vmatprep.mubr.f32.mxu1 %v152_v28 }
  0xf1   :  { %700 = vmatmul.mubr.f32.gmra.mxu0 %v205_v29  ;;  %v203_v29 = vld [vmem:[#allocation2 + $0x4d0] sm:$0xff] }
  0xf2   :  { %704 = vmatprep.mubr.f32.mxu0 %v210_v30 }
  0xf3   :  { %1015 = vmatmul.mubr.f32.gmra.mxu1 %v151_v31  ;;  %v208_v31 = vld [vmem:[#allocation2 + $0x4f8] sm:$0xff] }
  0xf4   :  { %1019 = vmatprep.mubr.f32.mxu1 %v156_v32 }
  0xf5   :  { %705 = vmatmul.mubr.f32.gmra.mxu0 %v209_v33 }
  0xf6   :  { %709 = vmatprep.mubr.f32.mxu0 %v214_v34 }
  0xf7   :  { %1020 = vmatmul.mubr.f32.gmra.mxu1 %v155_v35  ;;  %v207_v35 = vld [vmem:[#allocation2 + $0x4f0] sm:$0xff] }
  0xf8   :  { %1024 = vmatprep.mubr.f32.mxu1 %v160_v36 }
  0xf9   :  { %710 = vmatmul.mubr.f32.gmra.mxu0 %v213_v37  ;;  %v212_v37 = vld [vmem:[#allocation2 + $0x518] sm:$0xff] }
  0xfa   :  { %714 = vmatprep.mubr.f32.mxu0 %v218_v38 }
  0xfb   :  { %1025 = vmatmul.mubr.f32.gmra.mxu1 %v159_v39 }
  0xfc   :  { %1029 = vmatprep.mubr.f32.mxu1 %v164_v40 }
  0xfd   :  { %715 = vmatmul.mubr.f32.gmra.mxu0 %v217_v41  ;;  %v211_v41 = vld [vmem:[#allocation2 + $0x510] sm:$0xff] }
  0xfe   :  { %719 = vmatprep.mubr.f32.mxu0 %v222_v42 }
  0xff   :  { %1030 = vmatmul.mubr.f32.gmra.mxu1 %v163_v43  ;;  %v216_v43 = vld [vmem:[#allocation2 + $0x538] sm:$0xff] }
 0x100   :  { %1034 = vmatprep.mubr.f32.mxu1 %v168_v44 }
 0x101   :  { %720 = vmatmul.mubr.f32.gmra.mxu0 %v221_v0 }
 0x102   :  { %724 = vmatprep.mubr.f32.mxu0 %v226_v45 }
 0x103   :  { %1035 = vmatmul.mubr.f32.gmra.mxu1 %v167_v46  ;;  %v215_v46 = vld [vmem:[#allocation2 + $0x530] sm:$0xff] }
 0x104   :  { %1039 = vmatprep.mubr.f32.mxu1 %v172_v47 }
 0x105   :  { %725 = vmatmul.mubr.f32.gmra.mxu0 %v225_v48  ;;  %v220_v48 = vld [vmem:[#allocation2 + $0x558] sm:$0xff] }
 0x106   :  { %729 = vmatprep.mubr.f32.mxu0 %v230_v49 }
 0x107   :  { %1040 = vmatmul.mubr.f32.gmra.mxu1 %v171_v50 }
 0x108   :  { %1044 = vmatprep.mubr.f32.mxu1 %v176_v51 }
 0x109   :  { %730 = vmatmul.mubr.f32.gmra.mxu0 %v229_v52  ;;  %v219_v52 = vld [vmem:[#allocation2 + $0x550] sm:$0xff] }
 0x10a   :  { %734 = vmatprep.mubr.f32.mxu0 %v234_v53 }
 0x10b   :  { %1045 = vmatmul.mubr.f32.gmra.mxu1 %v175_v54  ;;  %v224_v54 = vld [vmem:[#allocation2 + $0x578] sm:$0xff] }
 0x10c   :  { %1049 = vmatprep.mubr.f32.mxu1 %v180_v55 }
 0x10d   :  { %735 = vmatmul.mubr.f32.gmra.mxu0 %v233_v56 }
 0x10e   :  { %739 = vmatprep.mubr.f32.mxu0 %v238_v57 }
 0x10f   :  { %v4844_v61 = vpop.f32.mrf.mxu1  ;;  %1050 = vmatmul.mubr.f32.gmra.mxu1 %v179_v58  ;;  %v223_v58 = vld [vmem:[#allocation2 + $0x570] sm:$0xff] }
 0x110   :  { %1054 = vmatprep.mubr.f32.mxu1 %v184_v59 }
 0x111   :  { %v748_v63 = vpop.f32.mrf.mxu1  ;;  %740 = vmatmul.mubr.f32.gmra.mxu0 %v237_v60  ;;  %v228_v60 = vld [vmem:[#allocation2 + $0x598] sm:$0xff] }
 0x113   :  { %v4846_v2 = vpop.f32.mrf.mxu1  ;;  %1055 = vmatmul.mubr.f32.gmra.mxu1 %v183_v62 }
 0x114   :  { %1059 = vmatprep.mubr.f32.mxu1 %v188_v1 }
 0x115   :  { %v753_v4 = vpop.f32.mrf.mxu1  ;;  %v4848_v6 = vpop.f32.mrf.mxu0 }
 0x117   :  { %v4850_v7 = vpop.f32.mrf.mxu1  ;;  %1060 = vmatmul.mubr.f32.gmra.mxu1 %v187_v3  ;;  %v508_v8 = vpop.f32.mrf.mxu0  ;;  %v227_v3 = vld [vmem:[#allocation2 + $0x590] sm:$0xff] }
 0x118   :  { %1064 = vmatprep.mubr.f32.mxu1 %v192_v5  ;;  %v232_v5 = vld [vmem:[#allocation2 + $0x5b8] sm:$0xff] }
 0x119   :  { %v758_v10 = vpop.f32.mrf.mxu1  ;;  %v4852_v12 = vpop.f32.mrf.mxu0 }
 0x11b   :  { %v4854_v13 = vpop.f32.mrf.mxu1  ;;  %1065 = vmatmul.mubr.f32.gmra.mxu1 %v191_v9  ;;  %v513_v14 = vpop.f32.mrf.mxu0 }
 0x11c   :  { %1069 = vmatprep.mubr.f32.mxu1 %v196_v11  ;;  %v231_v11 = vld [vmem:[#allocation2 + $0x5b0] sm:$0xff] }
 0x11d   :  { %v763_v16 = vpop.f32.mrf.mxu1  ;;  %v4856_v18 = vpop.f32.mrf.mxu0 }
 0x11f   :  { %v4863_v20 = vpop.f32.mrf.mxu1  ;;  %1070 = vmatmul.mubr.f32.gmra.mxu1 %v195_v15  ;;  %v518_v21 = vpop.f32.mrf.mxu0  ;;  %v236_v15 = vld [vmem:[#allocation2 + $0x5d8] sm:$0xff] }
 0x120   :  { %1074 = vmatprep.mubr.f32.mxu1 %v200_v17 }
 0x121   :  { %v768_v24 = vpop.f32.mrf.mxu1  ;;  %v4866_v26 = vpop.f32.mrf.mxu0 }
 0x122   :  { %v240_v24 = vld [vmem:[#allocation2 + $0x5f8] sm:$0xff] }
 0x123   :  { %v4868_v27 = vpop.f32.mrf.mxu1  ;;  %1075 = vmatmul.mubr.f32.gmra.mxu1 %v199_v23  ;;  %v523_v28 = vpop.f32.mrf.mxu0 }
 0x124   :  { %1079 = vmatprep.mubr.f32.mxu1 %v204_v25 }
 0x125   :  { %v773_v30 = vpop.f32.mrf.mxu1  ;;  %v4870_v32 = vpop.f32.mrf.mxu0 }
 0x126   :  { %v239_v30 = vld [vmem:[#allocation2 + $0x5f0] sm:$0xff] }
 0x127   :  { %v4872_v33 = vpop.f32.mrf.mxu1  ;;  %1080 = vmatmul.mubr.f32.gmra.mxu1 %v203_v29  ;;  %v528_v34 = vpop.f32.mrf.mxu0 }
 0x128   :  { %1084 = vmatprep.mubr.f32.mxu1 %v208_v31  ;;  %v244_v34 = vld [vmem:[#allocation2 + $0x618] sm:$0xff] }
 0x129   :  { %v778_v36 = vpop.f32.mrf.mxu1  ;;  %v4874_v38 = vpop.f32.mrf.mxu0 }
 0x12a   :  { %v4911_v36 = vld [vmem:[%s6038_s3] ss:$0 sm:$0xff] }
 0x12b   :  { %v4876_v39 = vpop.f32.mrf.mxu1  ;;  %1085 = vmatmul.mubr.f32.gmra.mxu1 %v207_v35  ;;  %v533_v40 = vpop.f32.mrf.mxu0 }
 0x12c   :  { %1089 = vmatprep.mubr.f32.mxu1 %v212_v37 }
 0x12d   :  { %v783_v42 = vpop.f32.mrf.mxu1  ;;  %v4878_v44 = vpop.f32.mrf.mxu0 }
 0x12e   :  { %v243_v42 = vld [vmem:[#allocation2 + $0x610] sm:$0xff] }
 0x12f   :  { %v4880_v0 = vpop.f32.mrf.mxu1  ;;  %1090 = vmatmul.mubr.f32.gmra.mxu1 %v211_v41  ;;  %v538_v45 = vpop.f32.mrf.mxu0  ;;  %v507_v41 = vadd.f32 %v4911_v36, %v4848_v6 }
 0x130   :  { %1094 = vmatprep.mubr.f32.mxu1 %v216_v43  ;;  %v248_v45 = vld [vmem:[#allocation2 + $0x638] sm:$0xff] }
 0x131   :  { %v788_v47 = vpop.f32.mrf.mxu1  ;;  %v4882_v49 = vpop.f32.mrf.mxu0 }
 0x133   :  { %v4884_v50 = vpop.f32.mrf.mxu1  ;;  %1095 = vmatmul.mubr.f32.gmra.mxu1 %v215_v46  ;;  %v543_v51 = vpop.f32.mrf.mxu0 }
 0x134   :  { %1099 = vmatprep.mubr.f32.mxu1 %v220_v48 }
 0x135   :  { %v793_v53 = vpop.f32.mrf.mxu1  ;;  %v4886_v55 = vpop.f32.mrf.mxu0 }
 0x136   :  { %v247_v53 = vld [vmem:[#allocation2 + $0x630] sm:$0xff] }
 0x137   :  { %v4888_v56 = vpop.f32.mrf.mxu1  ;;  %1100 = vmatmul.mubr.f32.gmra.mxu1 %v219_v52  ;;  %v548_v57 = vpop.f32.mrf.mxu0  ;;  %v512_v52 = vadd.f32 %v4911_v36, %v4852_v12  ;;  %v256_v12 = vld [vmem:[#allocation2 + $0x678] sm:$0xff] }
 0x138   :  { %1104 = vmatprep.mubr.f32.mxu1 %v224_v54  ;;  %v252_v57 = vld [vmem:[#allocation2 + $0x658] sm:$0xff] }
 0x139   :  { %v798_v59 = vpop.f32.mrf.mxu1  ;;  %v4890_v62 = vpop.f32.mrf.mxu0 }
 0x13b   :  { %v4892_v63 = vpop.f32.mrf.mxu1  ;;  %1105 = vmatmul.mubr.f32.gmra.mxu1 %v223_v58  ;;  %v553_v1 = vpop.f32.mrf.mxu0 }
 0x13c   :  { %1109 = vmatprep.mubr.f32.mxu1 %v228_v60 }
 0x13d   :  { %v803_v4 = vpop.f32.mrf.mxu1  ;;  %v4894_v8 = vpop.f32.mrf.mxu0 }
 0x13f   :  { %v4896_v9 = vpop.f32.mrf.mxu1  ;;  %1110 = vmatmul.mubr.f32.gmra.mxu1 %v227_v3  ;;  %v558_v10 = vpop.f32.mrf.mxu0  ;;  %v517_v3 = vadd.f32 %v4911_v36, %v4856_v18  ;;  %v255_v18 = vld [vmem:[#allocation2 + $0x670] sm:$0xff] }
 0x140   :  { %1114 = vmatprep.mubr.f32.mxu1 %v232_v5  ;;  %v251_v5 = vld [vmem:[#allocation2 + $0x650] sm:$0xff] }
 0x141   :  { %v808_v14 = vpop.f32.mrf.mxu1  ;;  %v4898_v16 = vpop.f32.mrf.mxu0 }
 0x143   :  { %v4900_v17 = vpop.f32.mrf.mxu1  ;;  %1115 = vmatmul.mubr.f32.gmra.mxu1 %v231_v11  ;;  %v563_v21 = vpop.f32.mrf.mxu0 }
 0x144   :  { %1119 = vmatprep.mubr.f32.mxu1 %v236_v15 }
 0x145   :  { %v813_v23 = vpop.f32.mrf.mxu1  ;;  %v4902_v25 = vpop.f32.mrf.mxu0 }
 0x147   :  { %v4904_v28 = vpop.f32.mrf.mxu1  ;;  %1120 = vmatmul.mubr.f32.gmra.mxu1 %v235_v22  ;;  %v568_v29 = vpop.f32.mrf.mxu0 }
 0x148   :  { %1124 = vmatprep.mubr.f32.mxu1 %v240_v24  ;;  %v522_v24 = vadd.f32 %v4911_v36, %v4866_v26 }
 0x149   :  { %v818_v31 = vpop.f32.mrf.mxu1  ;;  %v4906_v35 = vpop.f32.mrf.mxu0 }
 0x14b   :  { %v4913_v37 = vpop.f32.mrf.mxu1  ;;  %1125 = vmatmul.mubr.f32.gmra.mxu1 %v239_v30  ;;  %v573_v40 = vpop.f32.mrf.mxu0  ;;  %v260_v30 = vld [vmem:[#allocation2 + $0x698] sm:$0xff] }
 0x14c   :  { %1129 = vmatprep.mubr.f32.mxu1 %v244_v34 }
 0x14d   :  { %v823_v43 = vpop.f32.mrf.mxu1  ;;  %v4917_v46 = vpop.f32.mrf.mxu0 }
 0x14e   :  { %v527_v43 = vadd.f32 %v4911_v36, %v4870_v32 }
 0x14f   :  { %v891_v47 = vpop.f32.mrf.mxu1  ;;  %1130 = vmatmul.mubr.f32.gmra.mxu1 %v243_v42  ;;  %v578_v48 = vpop.f32.mrf.mxu0 }
 0x150   :  { %v892_v51 = vadd.f32 %v891_v47, %v507_v41  ;;  %1134 = vmatprep.mubr.f32.mxu1 %v248_v45  ;;  %v259_v47 = vld [vmem:[#allocation2 + $0x690] sm:$0xff]  ;;  %v264_v48 = vld [vmem:[#allocation2 + $0x6b8] sm:$0xff] }
 0x151   :  { %v893_v54 = vpop.f32.mrf.mxu1  ;;  %v4921_v58 = vpop.f32.mrf.mxu0 }
 0x152   :  { %v1274_v6 = vmul.f32 0.01, %v892_v51  ;;  %vm1210_vm0 = vcmp.gt.f32.partialorder %v892_v51, 0.0 }
 0x153   :  { %v896_v59 = vpop.f32.mrf.mxu1  ;;  %1135 = vmatmul.mubr.f32.gmra.mxu1 %v247_v53  ;;  %v583_v60 = vpop.f32.mrf.mxu0  ;;  %v3889_v53 = vunpack.c.l.bf16 %v4861_v19 }
 0x154   :  { %v897_v1 = vadd.f32 %v896_v59, %v512_v52  ;;  %v1338_v4 = vsel %vm1210_vm0, %v892_v51, %v1274_v6  ;;  %1139 = vmatprep.mubr.f32.mxu1 %v252_v57  ;;  %v532_v59 = vadd.f32 %v4911_v36, %v4874_v38  ;;  %v263_v60 = vld [vmem:[#allocation2 + $0x6b0] sm:$0xff] }
 0x155   :  { %v898_v10 = vpop.f32.mrf.mxu1  ;;  %4175 = vmatprep.mubr.f32.mxu0 %v1338_v4  ;;  %v4925_v11 = vpop.f32.mrf.mxu0  ;;  %4273 = vmatprep.subr.mxu1 %v3889_v53 }
 0x156   :  { %vm1211_vm1 = vcmp.gt.f32.partialorder %v897_v1, 0.0  ;;  %v1275_v14 = vmul.f32 0.01, %v897_v1  ;;  %4274 = vmatpush3.msra.mxu1 %v3889_v53 }
 0x157   :  { %v901_v15 = vpop.f32.mrf.mxu1  ;;  %1140 = vmatmul.mubr.f32.gmra.mxu1 %v251_v5  ;;  %v588_v21 = vpop.f32.mrf.mxu0 }
 0x158   :  { %v1339_v22 = vsel %vm1211_vm1, %v897_v1, %v1275_v14  ;;  %v902_v23 = vadd.f32 %v901_v15, %v517_v3  ;;  %1144 = vmatprep.mubr.f32.mxu1 %v256_v12  ;;  %v268_v3 = vld [vmem:[#allocation2 + $0x6d8] sm:$0xff]  ;;  %v537_v14 = vadd.f32 %v4911_v36, %v4878_v44  ;;  %v267_v15 = vld [vmem:[#allocation2 + $0x6d0] sm:$0xff] }
 0x159   :  { %v903_v29 = vpop.f32.mrf.mxu1  ;;  %4176 = vmatmul.mubr.f32.vlgmr.msra.gmra.mxu0 %v1339_v22  ;;  %v4929_v31 = vpop.f32.mrf.mxu0  ;;  %v272_v22 = vld [vmem:[#allocation2 + $0x6f8] sm:$0xff]  ;;  %v271_v44 = vld [vmem:[#allocation2 + $0x6f0] sm:$0xff] }
 0x15a   :  { %v1276_v34 = vmul.f32 0.01, %v902_v23  ;;  %vm1212_vm2 = vcmp.gt.f32.partialorder %v902_v23, 0.0 }
 0x15b   :  { %v906_v40 = vpop.f32.mrf.mxu1  ;;  %1145 = vmatmul.mubr.f32.gmra.mxu1 %v255_v18  ;;  %v593_v41 = vpop.f32.mrf.mxu0 }
 0x15c   :  { %v907_v42 = vadd.f32 %v906_v40, %v522_v24  ;;  %v1340_v45 = vsel %vm1212_vm2, %v902_v23, %v1276_v34  ;;  %1149 = vmatprep.mubr.f32.mxu1 %v260_v30  ;;  %v542_v34 = vadd.f32 %v4911_v36, %v4882_v49  ;;  %v275_v49 = vld [vmem:[#allocation2 + $0x710] sm:$0xff] }
 0x15d   :  { %v908_v26 = vpop.f32.mrf.mxu1  ;;  %4178 = vmatprep.mubr.f32.mxu0 %v1340_v45  ;;  %v4933_v51 = vpop.f32.mrf.mxu0 }
 0x15e   :  { %v1277_v52 = vmul.f32 0.01, %v907_v42  ;;  %vm1213_vm3 = vcmp.gt.f32.partialorder %v907_v42, 0.0 }
 0x15f   :  { %v911_v54 = vpop.f32.mrf.mxu1  ;;  %1150 = vmatmul.mubr.f32.gmra.mxu1 %v259_v47  ;;  %v598_v57 = vpop.f32.mrf.mxu0 }
 0x160   :  { %v912_v6 = vadd.f32 %v911_v54, %v527_v43  ;;  %v1341_v32 = vsel %vm1213_vm3, %v907_v42, %v1277_v52  ;;  %1154 = vmatprep.mubr.f32.mxu1 %v264_v48  ;;  %v276_v42 = vld [vmem:[#allocation2 + $0x718] sm:$0xff]  ;;  %v547_v52 = vadd.f32 %v4911_v36, %v4886_v55  ;;  %v279_v55 = vld [vmem:[#allocation2 + $0x730] sm:$0xff] }
 0x161   :  { %v913_v1 = vpop.f32.mrf.mxu1  ;;  %4179 = vmatmul.mubr.f32.gmra.mxu0 %v1341_v32  ;;  %v4938_v4 = vpop.f32.mrf.mxu0  ;;  %v280_v57 = vld [vmem:[#allocation2 + $0x738] sm:$0xff] }
 0x162   :  { %v1278_v5 = vmul.f32 0.01, %v912_v6  ;;  %vm1214_vm4 = vcmp.gt.f32.partialorder %v912_v6, 0.0 }
 0x163   :  { %v916_v19 = vpop.f32.mrf.mxu1  ;;  %1155 = vmatmul.mubr.f32.gmra.mxu1 %v263_v60  ;;  %v603_v10 = vpop.f32.mrf.mxu0 }
 0x164   :  { %v917_v12 = vadd.f32 %v916_v19, %v532_v59  ;;  %v1342_v38 = vsel %vm1214_vm4, %v912_v6, %v1278_v5  ;;  %1159 = vmatprep.mubr.f32.mxu1 %v268_v3  ;;  %v552_v3 = vadd.f32 %v4911_v36, %v4890_v62  ;;  %v284_v10 = vld [vmem:[#allocation2 + $0x758] sm:$0xff]  ;;  %v283_v62 = vld [vmem:[#allocation2 + $0x750] sm:$0xff] }
 0x165   :  { %v918_v21 = vpop.f32.mrf.mxu1  ;;  %4181 = vmatprep.mubr.f32.mxu0 %v1342_v38  ;;  %v4942_v23 = vpop.f32.mrf.mxu0 }
 0x166   :  { %v1279_v24 = vmul.f32 0.01, %v917_v12  ;;  %vm1215_vm5 = vcmp.gt.f32.partialorder %v917_v12, 0.0 }
 0x167   :  { %v921_v18 = vpop.f32.mrf.mxu1  ;;  %1160 = vmatmul.mubr.f32.gmra.mxu1 %v267_v15  ;;  %v608_v29 = vpop.f32.mrf.mxu0 }
 0x168   :  { %v922_v30 = vadd.f32 %v921_v18, %v537_v14  ;;  %v1343_v40 = vsel %vm1215_vm5, %v917_v12, %v1279_v24  ;;  %1164 = vmatprep.mubr.f32.mxu1 %v272_v22  ;;  %v557_v22 = vadd.f32 %v4911_v36, %v4894_v8  ;;  %v288_v29 = vld [vmem:[#allocation2 + $0x778] sm:$0xff]  ;;  %v287_v8 = vld [vmem:[#allocation2 + $0x770] sm:$0xff] }
 0x169   :  { %v923_v41 = vpop.f32.mrf.mxu1  ;;  %4182 = vmatmul.mubr.f32.gmra.mxu0 %v1343_v40  ;;  %v4946_v43 = vpop.f32.mrf.mxu0 }
 0x16a   :  { %v1280_v45 = vmul.f32 0.01, %v922_v30  ;;  %vm1216_vm6 = vcmp.gt.f32.partialorder %v922_v30, 0.0 }
 0x16b   :  { %v926_v47 = vpop.f32.mrf.mxu1  ;;  %1165 = vmatmul.mubr.f32.gmra.mxu1 %v271_v44  ;;  %v613_v26 = vpop.f32.mrf.mxu0 }
 0x16c   :  { %v927_v48 = vadd.f32 %v926_v47, %v542_v34  ;;  %v1344_v53 = vsel %vm1216_vm6, %v922_v30, %v1280_v45  ;;  %1169 = vmatprep.mubr.f32.mxu1 %v276_v42  ;;  %v562_v42 = vadd.f32 %v4911_v36, %v4898_v16  ;;  %v292_v26 = vld [vmem:[#allocation2 + $0x798] sm:$0xff]  ;;  %v291_v16 = vld [vmem:[#allocation2 + $0x790] sm:$0xff] }
 0x16d   :  { %v928_v54 = vpop.f32.mrf.mxu1  ;;  %4184 = vmatprep.mubr.f32.mxu0 %v1344_v53  ;;  %v4950_v6 = vpop.f32.mrf.mxu0 }
 0x16e   :  { %v1281_v59 = vmul.f32 0.01, %v927_v48  ;;  %vm1217_vm7 = vcmp.gt.f32.partialorder %v927_v48, 0.0 }
 0x16f   :  { %v931_v32 = vpop.f32.mrf.mxu1  ;;  %1170 = vmatmul.mubr.f32.gmra.mxu1 %v275_v49  ;;  %v618_v60 = vpop.f32.mrf.mxu0 }
 0x170   :  { %v932_v1 = vadd.f32 %v931_v32, %v547_v52  ;;  %v1345_v5 = vsel %vm1217_vm7, %v927_v48, %v1281_v59  ;;  %1174 = vmatprep.mubr.f32.mxu1 %v280_v57  ;;  %v567_v57 = vadd.f32 %v4911_v36, %v4902_v25  ;;  %v296_v60 = vld [vmem:[#allocation2 + $0x7b8] sm:$0xff]  ;;  %v295_v25 = vld [vmem:[#allocation2 + $0x7b0] sm:$0xff] }
 0x171   :  { %v933_v19 = vpop.f32.mrf.mxu1  ;;  %4185 = vmatmul.mubr.f32.gmra.mxu0 %v1345_v5  ;;  %v4954_v12 = vpop.f32.mrf.mxu0 }
 0x172   :  { %v1282_v14 = vmul.f32 0.01, %v932_v1  ;;  %vm1218_vm8 = vcmp.gt.f32.partialorder %v932_v1, 0.0 }
 0x173   :  { %v936_v38 = vpop.f32.mrf.mxu1  ;;  %1175 = vmatmul.mubr.f32.gmra.mxu1 %v279_v55  ;;  %v623_v15 = vpop.f32.mrf.mxu0 }
 0x174   :  { %v937_v21 = vadd.f32 %v936_v38, %v552_v3  ;;  %v1346_v24 = vsel %vm1218_vm8, %v932_v1, %v1282_v14  ;;  %1179 = vmatprep.mubr.f32.mxu1 %v284_v10  ;;  %v572_v10 = vadd.f32 %v4911_v36, %v4906_v35  ;;  %v300_v15 = vld [vmem:[#allocation2 + $0x7d8] sm:$0xff]  ;;  %v299_v35 = vld [vmem:[#allocation2 + $0x7d0] sm:$0xff] }
 0x175   :  { %v938_v18 = vpop.f32.mrf.mxu1  ;;  %4187 = vmatprep.mubr.f32.mxu0 %v1346_v24  ;;  %v4958_v30 = vpop.f32.mrf.mxu0 }
 0x176   :  { %v1283_v34 = vmul.f32 0.01, %v937_v21  ;;  %vm1219_vm9 = vcmp.gt.f32.partialorder %v937_v21, 0.0 }
 0x177   :  { %v941_v40 = vpop.f32.mrf.mxu1  ;;  %1180 = vmatmul.mubr.f32.gmra.mxu1 %v283_v62  ;;  %v628_v44 = vpop.f32.mrf.mxu0 }
 0x178   :  { %v942_v41 = vadd.f32 %v941_v40, %v557_v22  ;;  %v1347_v45 = vsel %vm1219_vm9, %v937_v21, %v1283_v34  ;;  %1184 = vmatprep.mubr.f32.mxu1 %v288_v29  ;;  %v577_v29 = vadd.f32 %v4911_v36, %v4917_v46  ;;  %v304_v44 = vld [vmem:[#allocation2 + $0x7f8] sm:$0xff]  ;;  %v303_v46 = vld [vmem:[#allocation2 + $0x7f0] sm:$0xff] }
 0x179   :  { %v943_v47 = vpop.f32.mrf.mxu1  ;;  %4188 = vmatmul.mubr.f32.gmra.mxu0 %v1347_v45  ;;  %v4962_v48 = vpop.f32.mrf.mxu0 }
 0x17a   :  { %v1284_v52 = vmul.f32 0.01, %v942_v41  ;;  %vm1220_vm10 = vcmp.gt.f32.partialorder %v942_v41, 0.0 }
 0x17b   :  { %v946_v53 = vpop.f32.mrf.mxu1  ;;  %1185 = vmatmul.mubr.f32.gmra.mxu1 %v287_v8  ;;  %v633_v49 = vpop.f32.mrf.mxu0 }
 0x17c   :  { %v947_v54 = vadd.f32 %v946_v53, %v562_v42  ;;  %v1348_v59 = vsel %vm1220_vm10, %v942_v41, %v1284_v52  ;;  %1189 = vmatprep.mubr.f32.mxu1 %v292_v26  ;;  %v582_v26 = vadd.f32 %v4911_v36, %v4921_v58 }
 0x17d   :  { %v948_v32 = vpop.f32.mrf.mxu1  ;;  %4190 = vmatprep.mubr.f32.mxu0 %v1348_v59  ;;  %v4966_v1 = vpop.f32.mrf.mxu0 }
 0x17e   :  { %v1285_v3 = vmul.f32 0.01, %v947_v54  ;;  %vm1221_vm11 = vcmp.gt.f32.partialorder %v947_v54, 0.0  ;;  %v587_v32 = vadd.f32 %v4911_v36, %v4925_v11 }
 0x17f   :  { %v951_v5 = vpop.f32.mrf.mxu1  ;;  %1190 = vmatmul.mubr.f32.gmra.mxu1 %v291_v16  ;;  %v638_v55 = vpop.f32.mrf.mxu0 }
 0x180   :  { %v952_v19 = vadd.f32 %v951_v5, %v567_v57  ;;  %v1349_v14 = vsel %vm1221_vm11, %v947_v54, %v1285_v3  ;;  %1194 = vmatprep.mubr.f32.mxu1 %v296_v60 }
 0x181   :  { %v953_v38 = vpop.f32.mrf.mxu1  ;;  %4191 = vmatmul.mubr.f32.gmra.mxu0 %v1349_v14  ;;  %v4970_v21 = vpop.f32.mrf.mxu0  ;;  %v592_v14 = vadd.f32 %v4911_v36, %v4929_v31 }
 0x182   :  { %v1286_v22 = vmul.f32 0.01, %v952_v19  ;;  %vm1222_vm12 = vcmp.gt.f32.partialorder %v952_v19, 0.0 }
 0x183   :  { %v956_v24 = vpop.f32.mrf.mxu1  ;;  %1195 = vmatmul.mubr.f32.gmra.mxu1 %v295_v25  ;;  %v643_v62 = vpop.f32.mrf.mxu0 }
 0x184   :  { %v957_v18 = vadd.f32 %v956_v24, %v572_v10  ;;  %v1350_v34 = vsel %vm1222_vm12, %v952_v19, %v1286_v22  ;;  %1199 = vmatprep.mubr.f32.mxu1 %v300_v15 }
 0x185   :  { %v958_v40 = vpop.f32.mrf.mxu1  ;;  %4193 = vmatprep.mubr.f32.mxu0 %v1350_v34  ;;  %v4974_v41 = vpop.f32.mrf.mxu0 }
 0x186   :  { %v1287_v42 = vmul.f32 0.01, %v957_v18  ;;  %vm1223_vm13 = vcmp.gt.f32.partialorder %v957_v18, 0.0 }
 0x187   :  { %v961_v45 = vpop.f32.mrf.mxu1  ;;  %1200 = vmatmul.mubr.f32.gmra.mxu1 %v299_v35  ;;  %v648_v8 = vpop.f32.mrf.mxu0 }
 0x188   :  { %v962_v47 = vadd.f32 %v961_v45, %v577_v29  ;;  %v1351_v52 = vsel %vm1223_vm13, %v957_v18, %v1287_v42  ;;  %1204 = vmatprep.mubr.f32.mxu1 %v304_v44  ;;  %v597_v18 = vadd.f32 %v4911_v36, %v4933_v51  ;;  %v602_v45 = vadd.f32 %v4911_v36, %v4938_v4 }
 0x189   :  { %v963_v53 = vpop.f32.mrf.mxu1  ;;  %4194 = vmatmul.mubr.f32.gmra.mxu0 %v1351_v52  ;;  %v4978_v49 = vpop.f32.mrf.mxu0 }
 0x18a   :  { %v1288_v54 = vmul.f32 0.01, %v962_v47  ;;  %vm1224_vm14 = vcmp.gt.f32.partialorder %v962_v47, 0.0 }
 0x18b   :  { %v966_v57 = vpop.f32.mrf.mxu1  ;;  %1205 = vmatmul.mubr.f32.gmra.mxu1 %v303_v46  ;;  %v653_v59 = vpop.f32.mrf.mxu0 }
 0x18c   :  { %v967_v16 = vadd.f32 %v966_v57, %v582_v26  ;;  %v1352_v60 = vsel %vm1224_vm14, %v962_v47, %v1288_v54  ;;  %v607_v54 = vadd.f32 %v4911_v36, %v4942_v23  ;;  %v3884_v59 = vld [vmem:[%s6041_s6] sm:$0xff]   ;;  %v612_v23 = vadd.f32 %v4911_v36, %v4946_v43 }
 0x18d   :  { %v968_v3 = vpop.f32.mrf.mxu1  ;;  %4196 = vmatprep.mubr.f32.mxu0 %v1352_v60  ;;  %v4982_v58 = vpop.f32.mrf.mxu0 }
 0x18e   :  { %v1289_v5 = vmul.f32 0.01, %v967_v16  ;;  %vm1225_vm15 = vcmp.gt.f32.partialorder %v967_v16, 0.0 }
 0x18f   :  { %v971_v55 = vpop.f32.mrf.mxu1  ;;  %v658_v19 = vpop.f32.mrf.mxu0 }
 0x190   :  { %v972_v10 = vadd.f32 %v971_v55, %v587_v32  ;;  %v1353_v25 = vsel %vm1225_vm15, %v967_v16, %v1289_v5  ;;  %v3886_v32 = vunpack.c.h.bf16 %v3884_v59  ;;  %v3885_v55 = vunpack.c.l.bf16 %v3884_v59 }
 0x191   :  { %v973_v38 = vpop.f32.mrf.mxu1  ;;  %4197 = vmatmul.mubr.f32.gmra.mxu0 %v1353_v25  ;;  %v4986_v15 = vpop.f32.mrf.mxu0 }
 0x192   :  { %v1290_v22 = vmul.f32 0.01, %v972_v10  ;;  %vm1226_vm0 = vcmp.gt.f32.partialorder %v972_v10, 0.0  ;;  %4275 = vmatprep.subr.mxu1 %v3886_v32 }
 0x193   :  { %v976_v11 = vpop.f32.mrf.mxu1  ;;  %v663_v24 = vpop.f32.mrf.mxu0  ;;  %4276 = vmatpush3.msra.mxu1 %v3886_v32 }
 0x194   :  { %v977_v62 = vadd.f32 %v976_v11, %v592_v14  ;;  %v1354_v29 = vsel %vm1226_vm0, %v972_v10, %v1290_v22  ;;  %4277 = vmatprep.subr.mxu1 %v3885_v55 }
 0x195   :  { %v978_v34 = vpop.f32.mrf.mxu1  ;;  %4199 = vmatprep.mubr.f32.mxu0 %v1354_v29  ;;  %v4990_v35 = vpop.f32.mrf.mxu0  ;;  %4278 = vmatpush3.msra.mxu1 %v3885_v55 }
 0x196   :  { %vm1227_vm1 = vcmp.gt.f32.partialorder %v977_v62, 0.0  ;;  %v1291_v31 = vmul.f32 0.01, %v977_v62 }
 0x197   :  { %v981_v40 = vpop.f32.mrf.mxu1  ;;  %v668_v44 = vpop.f32.mrf.mxu0 }
 0x198   :  { %v982_v42 = vadd.f32 %v981_v40, %v597_v18  ;;  %v1355_v8 = vsel %vm1227_vm1, %v977_v62, %v1291_v31  ;;  %v617_v62 = vadd.f32 %v4911_v36, %v4950_v6 }
 0x199   :  { %v983_v47 = vpop.f32.mrf.mxu1  ;;  %4200 = vmatmul.mubr.f32.gmra.mxu0 %v1355_v8  ;;  %v4994_v26 = vpop.f32.mrf.mxu0 }
 0x19a   :  { %v1292_v52 = vmul.f32 0.01, %v982_v42  ;;  %vm1228_vm2 = vcmp.gt.f32.partialorder %v982_v42, 0.0 }
 0x19b   :  { %v986_v51 = vpop.f32.mrf.mxu1  ;;  %v673_v46 = vpop.f32.mrf.mxu0 }
 0x19c   :  { %v987_v53 = vadd.f32 %v986_v51, %v602_v45  ;;  %v1356_v57 = vsel %vm1228_vm2, %v982_v42, %v1292_v52  ;;  %v622_v42 = vadd.f32 %v4911_v36, %v4954_v12 }
 0x19d   :  { %v988_v16 = vpop.f32.mrf.mxu1  ;;  %4202 = vmatprep.mubr.f32.mxu0 %v1356_v57  ;;  %v5001_v4 = vpop.f32.mrf.mxu0 }
 0x19e   :  { %vm1229_vm3 = vcmp.gt.f32.partialorder %v987_v53, 0.0  ;;  %v1293_v60 = vmul.f32 0.01, %v987_v53 }
 0x19f   :  { %v991_v3 = vpop.f32.mrf.mxu1  ;;  %v678_v5 = vpop.f32.mrf.mxu0 }
 0x1a0   :  { %v992_v19 = vadd.f32 %v991_v3, %v607_v54  ;;  %v1357_v10 = vsel %vm1229_vm3, %v987_v53, %v1293_v60  ;;  %v627_v53 = vadd.f32 %v4911_v36, %v4958_v30  ;;  %v632_v3 = vadd.f32 %v4911_v36, %v4962_v48 }
 0x1a1   :  { %v993_v14 = vpop.f32.mrf.mxu1  ;;  %4203 = vmatmul.mubr.f32.gmra.mxu0 %v1357_v10  ;;  %v5005_v25 = vpop.f32.mrf.mxu0 }
 0x1a2   :  { %v1294_v38 = vmul.f32 0.01, %v992_v19  ;;  %vm1230_vm4 = vcmp.gt.f32.partialorder %v992_v19, 0.0 }
 0x1a3   :  { %v996_v22 = vpop.f32.mrf.mxu1  ;;  %v683_v11 = vpop.f32.mrf.mxu0 }
 0x1a4   :  { %v997_v24 = vadd.f32 %v996_v22, %v612_v23  ;;  %v1358_v18 = vsel %vm1230_vm4, %v992_v19, %v1294_v38  ;;  %v637_v38 = vadd.f32 %v4911_v36, %v4966_v1 }
 0x1a5   :  { %v998_v29 = vpop.f32.mrf.mxu1  ;;  %4205 = vmatprep.mubr.f32.mxu0 %v1358_v18  ;;  %v5009_v43 = vpop.f32.mrf.mxu0 }
 0x1a6   :  { %vm1231_vm5 = vcmp.gt.f32.partialorder %v997_v24, 0.0  ;;  %v1295_v34 = vmul.f32 0.01, %v997_v24 }
 0x1a7   :  { %v1001_v31 = vpop.f32.mrf.mxu1  ;;  %v688_v40 = vpop.f32.mrf.mxu0 }
 0x1a8   :  { %v1002_v44 = vadd.f32 %v1001_v31, %v617_v62  ;;  %v1359_v45 = vsel %vm1231_vm5, %v997_v24, %v1295_v34  ;;  %v642_v34 = vadd.f32 %v4911_v36, %v4970_v21 }
 0x1a9   :  { %v1003_v8 = vpop.f32.mrf.mxu1  ;;  %4206 = vmatmul.mubr.f32.gmra.mxu0 %v1359_v45  ;;  %v5013_v47 = vpop.f32.mrf.mxu0 }
 0x1aa   :  { %v1296_v52 = vmul.f32 0.01, %v1002_v44  ;;  %vm1232_vm6 = vcmp.gt.f32.partialorder %v1002_v44, 0.0 }
 0x1ab   :  { %v1006_v6 = vpop.f32.mrf.mxu1  ;;  %v693_v51 = vpop.f32.mrf.mxu0 }
 0x1ac   :  { %v1007_v46 = vadd.f32 %v1006_v6, %v622_v42  ;;  %v1360_v54 = vsel %vm1232_vm6, %v1002_v44, %v1296_v52  ;;  %v647_v52 = vadd.f32 %v4911_v36, %v4974_v41 }
 0x1ad   :  { %v1008_v57 = vpop.f32.mrf.mxu1  ;;  %4208 = vmatprep.mubr.f32.mxu0 %v1360_v54  ;;  %v5017_v59 = vpop.f32.mrf.mxu0 }
 0x1ae   :  { %vm1233_vm7 = vcmp.gt.f32.partialorder %v1007_v46, 0.0  ;;  %v1297_v12 = vmul.f32 0.01, %v1007_v46 }
 0x1af   :  { %v1011_v16 = vpop.f32.mrf.mxu1  ;;  %v698_v32 = vpop.f32.mrf.mxu0 }
 0x1b0   :  { %v1012_v60 = vadd.f32 %v1011_v16, %v627_v53  ;;  %v1361_v5 = vsel %vm1233_vm7, %v1007_v46, %v1297_v12  ;;  %v652_v12 = vadd.f32 %v4911_v36, %v4978_v49 }
 0x1b1   :  { %v1013_v55 = vpop.f32.mrf.mxu1  ;;  %4209 = vmatmul.mubr.f32.gmra.mxu0 %v1361_v5  ;;  %v5021_v19 = vpop.f32.mrf.mxu0 }
 0x1b2   :  { %v1298_v23 = vmul.f32 0.01, %v1012_v60  ;;  %vm1234_vm8 = vcmp.gt.f32.partialorder %v1012_v60, 0.0 }
 0x1b3   :  { %v1016_v30 = vpop.f32.mrf.mxu1  ;;  %v703_v10 = vpop.f32.mrf.mxu0 }
 0x1b4   :  { %v1017_v14 = vadd.f32 %v1016_v30, %v632_v3  ;;  %v1362_v22 = vsel %vm1234_vm8, %v1012_v60, %v1298_v23  ;;  %v657_v23 = vadd.f32 %v4911_v36, %v4982_v58 }
 0x1b5   :  { %v1018_v11 = vpop.f32.mrf.mxu1  ;;  %4211 = vmatprep.mubr.f32.mxu0 %v1362_v22  ;;  %v5025_v24 = vpop.f32.mrf.mxu0 }
 0x1b6   :  { %vm1235_vm9 = vcmp.gt.f32.partialorder %v1017_v14, 0.0  ;;  %v1299_v48 = vmul.f32 0.01, %v1017_v14 }
 0x1b7   :  { %v1021_v62 = vpop.f32.mrf.mxu1  ;;  %v708_v18 = vpop.f32.mrf.mxu0 }
 0x1b8   :  { %v1022_v29 = vadd.f32 %v1021_v62, %v637_v38  ;;  %v1363_v31 = vsel %vm1235_vm9, %v1017_v14, %v1299_v48  ;;  %v662_v48 = vadd.f32 %v4911_v36, %v4986_v15 }
 0x1b9   :  { %v1023_v40 = vpop.f32.mrf.mxu1  ;;  %4212 = vmatmul.mubr.f32.gmra.mxu0 %v1363_v31  ;;  %v5029_v44 = vpop.f32.mrf.mxu0 }
 0x1ba   :  { %v1300_v42 = vmul.f32 0.01, %v1022_v29  ;;  %vm1236_vm10 = vcmp.gt.f32.partialorder %v1022_v29, 0.0 }
 0x1bb   :  { %v1026_v1 = vpop.f32.mrf.mxu1  ;;  %v713_v45 = vpop.f32.mrf.mxu0 }
 0x1bc   :  { %v1027_v8 = vadd.f32 %v1026_v1, %v642_v34  ;;  %v1364_v6 = vsel %vm1236_vm10, %v1022_v29, %v1300_v42  ;;  %v667_v42 = vadd.f32 %v4911_v36, %v4990_v35 }
 0x1bd   :  { %v1028_v51 = vpop.f32.mrf.mxu1  ;;  %4214 = vmatprep.mubr.f32.mxu0 %v1364_v6  ;;  %v5033_v46 = vpop.f32.mrf.mxu0 }
 0x1be   :  { %vm1237_vm11 = vcmp.gt.f32.partialorder %v1027_v8, 0.0  ;;  %v1301_v21 = vmul.f32 0.01, %v1027_v8 }
 0x1bf   :  { %v1031_v53 = vpop.f32.mrf.mxu1  ;;  %v718_v54 = vpop.f32.mrf.mxu0 }
 0x1c0   :  { %v1032_v57 = vadd.f32 %v1031_v53, %v647_v52  ;;  %v1365_v16 = vsel %vm1237_vm11, %v1027_v8, %v1301_v21  ;;  %v672_v21 = vadd.f32 %v4911_v36, %v4994_v26 }
 0x1c1   :  { %v1033_v32 = vpop.f32.mrf.mxu1  ;;  %4215 = vmatmul.mubr.f32.gmra.mxu0 %v1365_v16  ;;  %v5037_v60 = vpop.f32.mrf.mxu0 }
 0x1c2   :  { %v1302_v3 = vmul.f32 0.01, %v1032_v57  ;;  %vm1238_vm12 = vcmp.gt.f32.partialorder %v1032_v57, 0.0 }
 0x1c3   :  { %v1036_v41 = vpop.f32.mrf.mxu1  ;;  %v723_v5 = vpop.f32.mrf.mxu0 }
 0x1c4   :  { %v1037_v55 = vadd.f32 %v1036_v41, %v652_v12  ;;  %v1366_v30 = vsel %vm1238_vm12, %v1032_v57, %v1302_v3  ;;  %v677_v3 = vadd.f32 %v4911_v36, %v5001_v4  ;;  %v687_v4 = vadd.f32 %v4911_v36, %v5009_v43 }
 0x1c5   :  { %v1038_v10 = vpop.f32.mrf.mxu1  ;;  %4217 = vmatprep.mubr.f32.mxu0 %v1366_v30  ;;  %v5041_v14 = vpop.f32.mrf.mxu0  ;;  %v682_v30 = vadd.f32 %v4911_v36, %v5005_v25  ;;  %v692_v25 = vadd.f32 %v4911_v36, %v5013_v47  ;;  %v697_v43 = vadd.f32 %v4911_v36, %v5017_v59  ;;  %v702_v47 = vadd.f32 %v4911_v36, %v5021_v19 }
 0x1c6   :  { %vm1239_vm13 = vcmp.gt.f32.partialorder %v1037_v55, 0.0  ;;  %v1303_v49 = vmul.f32 0.01, %v1037_v55  ;;  %v707_v59 = vadd.f32 %v4911_v36, %v5025_v24  ;;  %v712_v19 = vadd.f32 %v4911_v36, %v5029_v44 }
 0x1c7   :  { %v1041_v38 = vpop.f32.mrf.mxu1  ;;  %v728_v22 = vpop.f32.mrf.mxu0  ;;  %v717_v24 = vadd.f32 %v4911_v36, %v5033_v46  ;;  %v722_v44 = vadd.f32 %v4911_v36, %v5037_v60  ;;  %v727_v46 = vadd.f32 %v4911_v36, %v5041_v14 }
 0x1c8   :  { %v1042_v11 = vadd.f32 %v1041_v38, %v657_v23  ;;  %v1367_v62 = vsel %vm1239_vm13, %v1037_v55, %v1303_v49 }
 0x1c9   :  { %v1043_v18 = vpop.f32.mrf.mxu1  ;;  %4218 = vmatmul.mubr.f32.gmra.mxu0 %v1367_v62  ;;  %v5045_v29 = vpop.f32.mrf.mxu0 }
 0x1ca   :  { %v1304_v34 = vmul.f32 0.01, %v1042_v11  ;;  %vm1240_vm14 = vcmp.gt.f32.partialorder %v1042_v11, 0.0  ;;  %v732_v60 = vadd.f32 %v4911_v36, %v5045_v29  ;;  %v5084_v29 = vld [vmem:[%s6038_s3] ss:$0 sm:$0xff] }
 0x1cb   :  { %v1046_v58 = vpop.f32.mrf.mxu1  ;;  %v733_v31 = vpop.f32.mrf.mxu0 }
 0x1cc   :  { %v1047_v40 = vadd.f32 %v1046_v58, %v662_v48  ;;  %v1368_v1 = vsel %vm1240_vm14, %v1042_v11, %v1304_v34 }
 0x1cd   :  { %v1048_v45 = vpop.f32.mrf.mxu1  ;;  %4220 = vmatprep.mubr.f32.mxu0 %v1368_v1  ;;  %v5049_v8 = vpop.f32.mrf.mxu0 }
 0x1ce   :  { %vm1241_vm15 = vcmp.gt.f32.partialorder %v1047_v40, 0.0  ;;  %v1305_v15 = vmul.f32 0.01, %v1047_v40  ;;  %v737_v14 = vadd.f32 %v4911_v36, %v5049_v8 }
 0x1cf   :  { %v1051_v52 = vpop.f32.mrf.mxu1  ;;  %v738_v6 = vpop.f32.mrf.mxu0 }
 0x1d0   :  { %v1052_v51 = vadd.f32 %v1051_v52, %v667_v42  ;;  %v1369_v53 = vsel %vm1241_vm15, %v1047_v40, %v1305_v15 }
 0x1d1   :  { %v1053_v54 = vpop.f32.mrf.mxu1  ;;  %4221 = vmatmul.mubr.f32.gmra.mxu0 %v1369_v53  ;;  %v5053_v57 = vpop.f32.mrf.mxu0 }
 0x1d2   :  { %v1306_v12 = vmul.f32 0.01, %v1052_v51  ;;  %vm1242_vm0 = vcmp.gt.f32.partialorder %v1052_v51, 0.0 }
 0x1d3   :  { %v1056_v35 = vpop.f32.mrf.mxu1  ;;  %v743_v16 = vpop.f32.mrf.mxu0 }
 0x1d4   :  { %v1057_v32 = vadd.f32 %v1056_v35, %v672_v21  ;;  %v1370_v41 = vsel %vm1242_vm0, %v1052_v51, %v1306_v12 }
 0x1d5   :  { %v1058_v5 = vpop.f32.mrf.mxu1  ;;  %4223 = vmatprep.mubr.f32.mxu0 %v1370_v41 }
 0x1d6   :  { %vm1243_vm1 = vcmp.gt.f32.partialorder %v1057_v32, 0.0  ;;  %v1307_v55 = vmul.f32 0.01, %v1057_v32 }
 0x1d7   :  { %v1061_v23 = vpop.f32.mrf.mxu1 }
 0x1d8   :  { %v1062_v26 = vadd.f32 %v1061_v23, %v677_v3  ;;  %v1371_v10 = vsel %vm1243_vm1, %v1057_v32, %v1307_v55 }
 0x1d9   :  { %v1063_v49 = vpop.f32.mrf.mxu1  ;;  %4224 = vmatmul.mubr.f32.gmra.mxu0 %v1371_v10 }
 0x1da   :  { %v1308_v38 = vmul.f32 0.01, %v1062_v26  ;;  %vm1244_vm2 = vcmp.gt.f32.partialorder %v1062_v26, 0.0 }
 0x1db   :  { %v1066_v22 = vpop.f32.mrf.mxu1 }
 0x1dc   :  { %v1067_v11 = vadd.f32 %v1066_v22, %v682_v30  ;;  %v1372_v48 = vsel %vm1244_vm2, %v1062_v26, %v1308_v38 }
 0x1dd   :  { %v1068_v62 = vpop.f32.mrf.mxu1  ;;  %4226 = vmatprep.mubr.f32.mxu0 %v1372_v48 }
 0x1de   :  { %vm1245_vm3 = vcmp.gt.f32.partialorder %v1067_v11, 0.0  ;;  %v1309_v18 = vmul.f32 0.01, %v1067_v11 }
 0x1df   :  { %v1071_v34 = vpop.f32.mrf.mxu1 }
 0x1e0   :  { %v1072_v58 = vadd.f32 %v1071_v34, %v687_v4  ;;  %v1373_v31 = vsel %vm1245_vm3, %v1067_v11, %v1309_v18  ;;  %vm2033_vm3 = vcmask 261120  }
 0x1e1   :  { %v1073_v40 = vpop.f32.mrf.mxu1  ;;  %4227 = vmatmul.mubr.f32.gmra.mxu0 %v1373_v31 }
 0x1e2   :  { %v1310_v42 = vmul.f32 0.01, %v1072_v58  ;;  %vm1246_vm4 = vcmp.gt.f32.partialorder %v1072_v58, 0.0 }
 0x1e3   :  { %v1076_v1 = vpop.f32.mrf.mxu1 }
 0x1e4   :  { %v1077_v45 = vadd.f32 %v1076_v1, %v692_v25  ;;  %v1374_v15 = vsel %vm1246_vm4, %v1072_v58, %v1310_v42 }
 0x1e5   :  { %v1078_v52 = vpop.f32.mrf.mxu1  ;;  %4229 = vmatprep.mubr.f32.mxu0 %v1374_v15 }
 0x1e6   :  { %vm1247_vm5 = vcmp.gt.f32.partialorder %v1077_v45, 0.0  ;;  %v1311_v6 = vmul.f32 0.01, %v1077_v45 }
 0x1e7   :  { %v1081_v51 = vpop.f32.mrf.mxu1 }
 0x1e8   :  { %v1082_v21 = vadd.f32 %v1081_v51, %v697_v43  ;;  %v1375_v53 = vsel %vm1247_vm5, %v1077_v45, %v1311_v6 }
 0x1e9   :  { %v1083_v54 = vpop.f32.mrf.mxu1  ;;  %4230 = vmatmul.mubr.f32.gmra.mxu0 %v1375_v53 }
 0x1ea   :  { %v1312_v12 = vmul.f32 0.01, %v1082_v21  ;;  %vm1248_vm6 = vcmp.gt.f32.partialorder %v1082_v21, 0.0 }
 0x1eb   :  { %v1086_v35 = vpop.f32.mrf.mxu1 }
 0x1ec   :  { %v1087_v16 = vadd.f32 %v1086_v35, %v702_v47  ;;  %v1376_v32 = vsel %vm1248_vm6, %v1082_v21, %v1312_v12  ;;  %v742_v35 = vadd.f32 %v5084_v29, %v5053_v57  ;;  %v752_v57 = vadd.f32 %v5084_v29, %v4846_v2 }
 0x1ed   :  { %v1088_v3 = vpop.f32.mrf.mxu1  ;;  %4232 = vmatprep.mubr.f32.mxu0 %v1376_v32 }
 0x1ee   :  { %vm1249_vm7 = vcmp.gt.f32.partialorder %v1087_v16, 0.0  ;;  %v1313_v41 = vmul.f32 0.01, %v1087_v16 }
 0x1ef   :  { %v1091_v5 = vpop.f32.mrf.mxu1 }
 0x1f0   :  { %v1092_v55 = vadd.f32 %v1091_v5, %v707_v59  ;;  %v1377_v23 = vsel %vm1249_vm7, %v1087_v16, %v1313_v41  ;;  %v747_v5 = vadd.f32 %v5084_v29, %v4844_v61  ;;  %v757_v61 = vadd.f32 %v5084_v29, %v4850_v7 }
 0x1f1   :  { %v1093_v26 = vpop.f32.mrf.mxu1  ;;  %4233 = vmatmul.mubr.f32.gmra.mxu0 %v1377_v23 }
 0x1f2   :  { %v1314_v30 = vmul.f32 0.01, %v1092_v55  ;;  %vm1250_vm8 = vcmp.gt.f32.partialorder %v1092_v55, 0.0 }
 0x1f3   :  { %v1096_v10 = vpop.f32.mrf.mxu1 }
 0x1f4   :  { %v1097_v49 = vadd.f32 %v1096_v10, %v712_v19  ;;  %v1378_v38 = vsel %vm1250_vm8, %v1092_v55, %v1314_v30 }
 0x1f5   :  { %v1098_v22 = vpop.f32.mrf.mxu1  ;;  %4235 = vmatprep.mubr.f32.mxu0 %v1378_v38 }
 0x1f6   :  { %vm1251_vm9 = vcmp.gt.f32.partialorder %v1097_v49, 0.0  ;;  %v1315_v11 = vmul.f32 0.01, %v1097_v49 }
 0x1f7   :  { %v1101_v4 = vpop.f32.mrf.mxu1 }
 0x1f8   :  { %v1102_v48 = vadd.f32 %v1101_v4, %v717_v24  ;;  %v1379_v62 = vsel %vm1251_vm9, %v1097_v49, %v1315_v11 }
 0x1f9   :  { %v1103_v18 = vpop.f32.mrf.mxu1  ;;  %4236 = vmatmul.mubr.f32.gmra.mxu0 %v1379_v62 }
 0x1fa   :  { %v1316_v34 = vmul.f32 0.01, %v1102_v48  ;;  %vm1252_vm10 = vcmp.gt.f32.partialorder %v1102_v48, 0.0 }
 0x1fb   :  { %v1106_v58 = vpop.f32.mrf.mxu1 }
 0x1fc   :  { %v1107_v25 = vadd.f32 %v1106_v58, %v722_v44  ;;  %v1380_v31 = vsel %vm1252_vm10, %v1102_v48, %v1316_v34  ;;  %v5097_v48 = vld [vmem:[%s6040_s5] ss:$0 sm:$0xff]  ;;  %v762_v34 = vadd.f32 %v5084_v29, %v4854_v13 }
 0x1fd   :  { %v1108_v40 = vpop.f32.mrf.mxu1  ;;  %4238 = vmatprep.mubr.f32.mxu0 %v1380_v31 }
 0x1fe   :  { %vm1253_vm11 = vcmp.gt.f32.partialorder %v1107_v25, 0.0  ;;  %v1317_v42 = vmul.f32 0.01, %v1107_v25 }
 0x1ff   :  { %v1111_v1 = vpop.f32.mrf.mxu1 }
 0x200   :  { %v1112_v45 = vadd.f32 %v1111_v1, %v727_v46  ;;  %v1381_v43 = vsel %vm1253_vm11, %v1107_v25, %v1317_v42  ;;  %v767_v42 = vadd.f32 %v5084_v29, %v4863_v20  ;;  %v772_v20 = vadd.f32 %v5084_v29, %v4868_v27 }
 0x201   :  { %v1113_v15 = vpop.f32.mrf.mxu1  ;;  %4239 = vmatmul.mubr.f32.gmra.mxu0 %v1381_v43 }
 0x202   :  { %v1318_v52 = vmul.f32 0.01, %v1112_v45  ;;  %vm1254_vm12 = vcmp.gt.f32.partialorder %v1112_v45, 0.0 }
 0x203   :  { %v1116_v6 = vpop.f32.mrf.mxu1 }
 0x204   :  { %v1117_v51 = vadd.f32 %v1116_v6, %v732_v60  ;;  %v1382_v21 = vsel %vm1254_vm12, %v1112_v45, %v1318_v52 }
 0x205   :  { %v1118_v47 = vpop.f32.mrf.mxu1  ;;  %4241 = vmatprep.mubr.f32.mxu0 %v1382_v21 }
 0x206   :  { %vm1255_vm13 = vcmp.gt.f32.partialorder %v1117_v51, 0.0  ;;  %v1319_v53 = vmul.f32 0.01, %v1117_v51 }
 0x207   :  { %v1121_v54 = vpop.f32.mrf.mxu1 }
 0x208   :  { %v1122_v12 = vadd.f32 %v1121_v54, %v737_v14  ;;  %v1383_v16 = vsel %vm1255_vm13, %v1117_v51, %v1319_v53 }
 0x209   :  { %v1123_v59 = vpop.f32.mrf.mxu1  ;;  %4242 = vmatmul.mubr.f32.gmra.mxu0 %v1383_v16 }
 0x20a   :  { %v1320_v32 = vmul.f32 0.01, %v1122_v12  ;;  %vm1256_vm14 = vcmp.gt.f32.partialorder %v1122_v12, 0.0 }
 0x20b   :  { %v1126_v36 = vpop.f32.mrf.mxu1 }
 0x20c   :  { %v1127_v8 = vadd.f32 %v1126_v36, %v742_v35  ;;  %v1384_v3 = vsel %vm1256_vm14, %v1122_v12, %v1320_v32  ;;  %v777_v32 = vadd.f32 %v5084_v29, %v4872_v33  ;;  %v782_v33 = vadd.f32 %v5084_v29, %v4876_v39 }
 0x20d   :  { %v1128_v41 = vpop.f32.mrf.mxu1  ;;  %4244 = vmatprep.mubr.f32.mxu0 %v1384_v3 }
 0x20e   :  { %vm1257_vm15 = vcmp.gt.f32.partialorder %v1127_v8, 0.0  ;;  %v1321_v55 = vmul.f32 0.01, %v1127_v8 }
 0x20f   :  { %v1131_v19 = vpop.f32.mrf.mxu1 }
 0x210   :  { %v1132_v23 = vadd.f32 %v1131_v19, %v747_v5  ;;  %v1385_v26 = vsel %vm1257_vm15, %v1127_v8, %v1321_v55 }
 0x211   :  { %v1133_v30 = vpop.f32.mrf.mxu1  ;;  %4245 = vmatmul.mubr.f32.gmra.mxu0 %v1385_v26 }
 0x212   :  { %v1322_v10 = vmul.f32 0.01, %v1132_v23  ;;  %vm1258_vm0 = vcmp.gt.f32.partialorder %v1132_v23, 0.0 }
 0x213   :  { %v1136_v49 = vpop.f32.mrf.mxu1 }
 0x214   :  { %v1137_v24 = vadd.f32 %v1136_v49, %v752_v57  ;;  %v1386_v38 = vsel %vm1258_vm0, %v1132_v23, %v1322_v10 }
 0x215   :  { %v1138_v22 = vpop.f32.mrf.mxu1  ;;  %4247 = vmatprep.mubr.f32.mxu0 %v1386_v38 }
 0x216   :  { %vm1259_vm1 = vcmp.gt.f32.partialorder %v1137_v24, 0.0  ;;  %v1323_v11 = vmul.f32 0.01, %v1137_v24 }
 0x217   :  { %v1141_v4 = vpop.f32.mrf.mxu1 }
 0x218   :  { %v1142_v44 = vadd.f32 %v1141_v4, %v757_v61  ;;  %v1387_v2 = vsel %vm1259_vm1, %v1137_v24, %v1323_v11  ;;  %v787_v11 = vadd.f32 %v5084_v29, %v4880_v0  ;;  %v792_v0 = vadd.f32 %v5084_v29, %v4884_v50 }
 0x219   :  { %v1143_v62 = vpop.f32.mrf.mxu1  ;;  %v4177_v18 = vpop.f32.mrf.mxu0  ;;  %4248 = vmatmul.mubr.f32.gmra.mxu0 %v1387_v2 }
 0x21a   :  { %v1324_v58 = vmul.f32 0.01, %v1142_v44  ;;  %v1513_v25 = vadd.f32 %v4177_v18, %v5097_v48  ;;  %vm1260_vm2 = vcmp.gt.f32.partialorder %v1142_v44, 0.0 }
 0x21b   :  { %v1146_v7 = vpop.f32.mrf.mxu1  ;;  %v1507_v46 = vpop.f32.mrf.mxu0 }
 0x21c   :  { %v1147_v31 = vadd.f32 %v1146_v7, %v762_v34  ;;  %v1508_v40 = vadd.f32 %v5097_v48, %v1507_v46  ;;  %v1891_v1 = vmul.f32 0.01, %v1513_v25  ;;  %v1388_v60 = vsel %vm1260_vm2, %v1142_v44, %v1324_v58 }
 0x21d   :  { %v1148_v45 = vpop.f32.mrf.mxu1  ;;  %vm1827_vm4 = vcmp.gt.f32.partialorder %v1513_v25, 0.0  ;;  %4250 = vmatprep.mubr.f32.mxu0 %v1388_v60 }
 0x21e   :  { %vm1261_vm5 = vcmp.gt.f32.partialorder %v1147_v31, 0.0  ;;  %v1325_v43 = vmul.f32 0.01, %v1147_v31  ;;  %v1890_v13 = vmul.f32 0.01, %v1508_v40  ;;  %vm1826_vm6 = vcmp.gt.f32.partialorder %v1508_v40, 0.0 }
 0x21f   :  { %v1151_v15 = vpop.f32.mrf.mxu1  ;;  %v1955_v14 = vsel %vm1827_vm4, %v1513_v25, %v1891_v1 }
 0x220   :  { %v1152_v52 = vadd.f32 %v1151_v15, %v767_v42  ;;  %v1389_v6 = vsel %vm1261_vm5, %v1147_v31, %v1325_v43  ;;  %v1954_v51 = vsel %vm1826_vm6, %v1508_v40, %v1890_v13  ;;  %v797_v13 = vadd.f32 %v5084_v29, %v4888_v56 }
 0x221   :  { %v1153_v21 = vpop.f32.mrf.mxu1  ;;  %v4180_v47 = vpop.f32.mrf.mxu0  ;;  %4251 = vmatmul.mubr.f32.gmra.mxu0 %v1389_v6  ;;  %4279 = vmatprep.mubr.msk.f32.mxu1 %vm2033_vm3, %v1954_v51  ;;  %v802_v56 = vadd.f32 %v5084_v29, %v4892_v63 }
 0x222   :  { %v1326_v53 = vmul.f32 0.01, %v1152_v52  ;;  %v1523_v54 = vadd.f32 %v4180_v47, %v5097_v48  ;;  %4280 = vmatmul.mubr.msk.f32.vlgmr.msra.gmra.mxu1 %vm2033_vm3, %v1955_v14  ;;  %vm1262_vm7 = vcmp.gt.f32.partialorder %v1152_v52, 0.0 }
 0x223   :  { %v1156_v12 = vpop.f32.mrf.mxu1  ;;  %v1517_v35 = vpop.f32.mrf.mxu0 }
 0x224   :  { %v1157_v16 = vadd.f32 %v1156_v12, %v772_v20  ;;  %v1518_v59 = vadd.f32 %v5097_v48, %v1517_v35  ;;  %v1893_v36 = vmul.f32 0.01, %v1523_v54  ;;  %v1390_v3 = vsel %vm1262_vm7, %v1152_v52, %v1326_v53 }
 0x225   :  { %v1158_v8 = vpop.f32.mrf.mxu1  ;;  %vm1829_vm8 = vcmp.gt.f32.partialorder %v1523_v54, 0.0  ;;  %4253 = vmatprep.mubr.f32.mxu0 %v1390_v3  ;;  %v807_v3 = vadd.f32 %v5084_v29, %v4896_v9  ;;  %v812_v9 = vadd.f32 %v5084_v29, %v4900_v17 }
 0x226   :  { %vm1263_vm9 = vcmp.gt.f32.partialorder %v1157_v16, 0.0  ;;  %v1327_v27 = vmul.f32 0.01, %v1157_v16  ;;  %v1892_v41 = vmul.f32 0.01, %v1518_v59  ;;  %vm1828_vm10 = vcmp.gt.f32.partialorder %v1518_v59, 0.0 }
 0x227   :  { %v1161_v5 = vpop.f32.mrf.mxu1  ;;  %v1957_v26 = vsel %vm1829_vm8, %v1523_v54, %v1893_v36 }
 0x228   :  { %v1162_v55 = vadd.f32 %v1161_v5, %v777_v32  ;;  %v1391_v19 = vsel %vm1263_vm9, %v1157_v16, %v1327_v27  ;;  %v1956_v23 = vsel %vm1828_vm10, %v1518_v59, %v1892_v41 }
 0x229   :  { %v1163_v30 = vpop.f32.mrf.mxu1  ;;  %v4183_v57 = vpop.f32.mrf.mxu0  ;;  %4254 = vmatmul.mubr.f32.gmra.mxu0 %v1391_v19  ;;  %4282 = vmatprep.mubr.msk.f32.mxu1 %vm2033_vm3, %v1956_v23 }
 0x22a   :  { %v1328_v10 = vmul.f32 0.01, %v1162_v55  ;;  %v1533_v49 = vadd.f32 %v4183_v57, %v5097_v48  ;;  %4283 = vmatmul.mubr.msk.f32.gmra.mxu1 %vm2033_vm3, %v1957_v26  ;;  %vm1264_vm11 = vcmp.gt.f32.partialorder %v1162_v55, 0.0 }
 0x22b   :  { %v1166_v24 = vpop.f32.mrf.mxu1  ;;  %v1527_v38 = vpop.f32.mrf.mxu0 }
 0x22c   :  { %v1167_v22 = vadd.f32 %v1166_v24, %v782_v33  ;;  %v1528_v61 = vadd.f32 %v5097_v48, %v1527_v38  ;;  %v1895_v4 = vmul.f32 0.01, %v1533_v49  ;;  %v1392_v2 = vsel %vm1264_vm11, %v1162_v55, %v1328_v10 }
 0x22d   :  { %v1168_v44 = vpop.f32.mrf.mxu1  ;;  %vm1831_vm12 = vcmp.gt.f32.partialorder %v1533_v49, 0.0  ;;  %4256 = vmatprep.mubr.f32.mxu0 %v1392_v2 }
 0x22e   :  { %vm1265_vm13 = vcmp.gt.f32.partialorder %v1167_v22, 0.0  ;;  %v1329_v39 = vmul.f32 0.01, %v1167_v22  ;;  %v1894_v62 = vmul.f32 0.01, %v1528_v61  ;;  %vm1830_vm14 = vcmp.gt.f32.partialorder %v1528_v61, 0.0 }
 0x22f   :  { %v1171_v18 = vpop.f32.mrf.mxu1  ;;  %v1959_v7 = vsel %vm1831_vm12, %v1533_v49, %v1895_v4  ;;  %v817_v4 = vadd.f32 %v5084_v29, %v4904_v28  ;;  %v822_v28 = vadd.f32 %v5084_v29, %v4913_v37 }
 0x230   :  { %v1172_v34 = vadd.f32 %v1171_v18, %v787_v11  ;;  %v1393_v58 = vsel %vm1265_vm13, %v1167_v22, %v1329_v39  ;;  %v1958_v25 = vsel %vm1830_vm14, %v1528_v61, %v1894_v62 }
 0x231   :  { %v1173_v46 = vpop.f32.mrf.mxu1  ;;  %v4186_v31 = vpop.f32.mrf.mxu0  ;;  %4257 = vmatmul.mubr.f32.gmra.mxu0 %v1393_v58  ;;  %4285 = vmatprep.mubr.msk.f32.mxu1 %vm2033_vm3, %v1958_v25 }
 0x232   :  { %v1330_v40 = vmul.f32 0.01, %v1172_v34  ;;  %v1543_v42 = vadd.f32 %v4186_v31, %v5097_v48  ;;  %4286 = vmatmul.mubr.msk.f32.gmra.mxu1 %vm2033_vm3, %v1959_v7  ;;  %vm1266_vm15 = vcmp.gt.f32.partialorder %v1172_v34, 0.0 }
 0x233   :  { %v1176_v1 = vpop.f32.mrf.mxu1  ;;  %v1537_v45 = vpop.f32.mrf.mxu0 }
 0x234   :  { %v1177_v60 = vadd.f32 %v1176_v1, %v792_v0  ;;  %v1538_v43 = vadd.f32 %v5097_v48, %v1537_v45  ;;  %v1897_v15 = vmul.f32 0.01, %v1543_v42  ;;  %v1394_v6 = vsel %vm1266_vm15, %v1172_v34, %v1330_v40 }
 0x235   :  { %v1178_v52 = vpop.f32.mrf.mxu1  ;;  %vm1833_vm0 = vcmp.gt.f32.partialorder %v1543_v42, 0.0  ;;  %4259 = vmatprep.mubr.f32.mxu0 %v1394_v6 }
 0x236   :  { %vm1267_vm1 = vcmp.gt.f32.partialorder %v1177_v60, 0.0  ;;  %v1331_v50 = vmul.f32 0.01, %v1177_v60  ;;  %v1896_v51 = vmul.f32 0.01, %v1538_v43  ;;  %vm1832_vm2 = vcmp.gt.f32.partialorder %v1538_v43, 0.0 }
 0x237   :  { %v1181_v14 = vpop.f32.mrf.mxu1  ;;  %v1961_v53 = vsel %vm1833_vm0, %v1543_v42, %v1897_v15 }
 0x238   :  { %v1182_v21 = vadd.f32 %v1181_v14, %v797_v13  ;;  %v1395_v47 = vsel %vm1267_vm1, %v1177_v60, %v1331_v50  ;;  %v1960_v20 = vsel %vm1832_vm2, %v1538_v43, %v1896_v51 }
 0x239   :  { %v1183_v54 = vpop.f32.mrf.mxu1  ;;  %v4189_v12 = vpop.f32.mrf.mxu0  ;;  %4260 = vmatmul.mubr.f32.gmra.mxu0 %v1395_v47  ;;  %4288 = vmatprep.mubr.msk.f32.mxu1 %vm2033_vm3, %v1960_v20 }
 0x23a   :  { %v1332_v35 = vmul.f32 0.01, %v1182_v21  ;;  %v1553_v16 = vadd.f32 %v4189_v12, %v5097_v48  ;;  %4289 = vmatmul.mubr.msk.f32.gmra.mxu1 %vm2033_vm3, %v1961_v53  ;;  %vm1268_vm4 = vcmp.gt.f32.partialorder %v1182_v21, 0.0 }
 0x23b   :  { %v1186_v59 = vpop.f32.mrf.mxu1  ;;  %v1547_v32 = vpop.f32.mrf.mxu0 }
 0x23c   :  { %v1187_v36 = vadd.f32 %v1186_v59, %v802_v56  ;;  %v1548_v8 = vadd.f32 %v5097_v48, %v1547_v32  ;;  %v1899_v27 = vmul.f32 0.01, %v1553_v16  ;;  %v1396_v5 = vsel %vm1268_vm4, %v1182_v21, %v1332_v35 }
 0x23d   :  { %v1188_v41 = vpop.f32.mrf.mxu1  ;;  %vm1835_vm5 = vcmp.gt.f32.partialorder %v1553_v16, 0.0  ;;  %4262 = vmatprep.mubr.f32.mxu0 %v1396_v5 }
 0x23e   :  { %vm1269_vm6 = vcmp.gt.f32.partialorder %v1187_v36, 0.0  ;;  %v1333_v63 = vmul.f32 0.01, %v1187_v36  ;;  %v1898_v55 = vmul.f32 0.01, %v1548_v8  ;;  %vm1834_vm7 = vcmp.gt.f32.partialorder %v1548_v8, 0.0 }
 0x23f   :  { %v1191_v19 = vpop.f32.mrf.mxu1  ;;  %v1963_v57 = vsel %vm1835_vm5, %v1553_v16, %v1899_v27 }
 0x240   :  { %v1192_v23 = vadd.f32 %v1191_v19, %v807_v3  ;;  %v1397_v26 = vsel %vm1269_vm6, %v1187_v36, %v1333_v63  ;;  %v1962_v30 = vsel %vm1834_vm7, %v1548_v8, %v1898_v55 }
 0x241   :  { %v1193_v33 = vpop.f32.mrf.mxu1  ;;  %v4192_v10 = vpop.f32.mrf.mxu0  ;;  %4263 = vmatmul.mubr.f32.gmra.mxu0 %v1397_v26  ;;  %4291 = vmatprep.mubr.msk.f32.mxu1 %vm2033_vm3, %v1962_v30 }
 0x242   :  { %v1334_v49 = vmul.f32 0.01, %v1192_v23  ;;  %v1563_v24 = vadd.f32 %v4192_v10, %v5097_v48  ;;  %4292 = vmatmul.mubr.msk.f32.gmra.mxu1 %vm2033_vm3, %v1963_v57  ;;  %vm1270_vm8 = vcmp.gt.f32.partialorder %v1192_v23, 0.0 }
 0x243   :  { %v1196_v38 = vpop.f32.mrf.mxu1  ;;  %v1557_v22 = vpop.f32.mrf.mxu0 }
 0x244   :  { %v1197_v61 = vadd.f32 %v1196_v38, %v812_v9  ;;  %v1558_v11 = vadd.f32 %v5097_v48, %v1557_v22  ;;  %v1901_v44 = vmul.f32 0.01, %v1563_v24  ;;  %v1398_v39 = vsel %vm1270_vm8, %v1192_v23, %v1334_v49  ;;  %v2803_v23 = vld [vmem:[%s6043_s8] sm:$0xf] }
 0x245   :  { %v1198_v2 = vpop.f32.mrf.mxu1  ;;  %vm1837_vm9 = vcmp.gt.f32.partialorder %v1563_v24, 0.0  ;;  %4265 = vmatprep.mubr.f32.mxu0 %v1398_v39  ;;  %v2804_v30 = vunpack.c.l.bf16 %v2803_v23 }
 0x246   :  { %vm1271_vm10 = vcmp.gt.f32.partialorder %v1197_v61, 0.0  ;;  %v1335_v17 = vmul.f32 0.01, %v1197_v61  ;;  %v1900_v62 = vmul.f32 0.01, %v1558_v11  ;;  %vm1836_vm11 = vcmp.gt.f32.partialorder %v1558_v11, 0.0 }
 0x247   :  { %v1201_v18 = vpop.f32.mrf.mxu1  ;;  %v1965_v7 = vsel %vm1837_vm9, %v1563_v24, %v1901_v44  ;;  %4375 = vmatprep.subr.mxu0 %v2804_v30 }
 0x248   :  { %v1202_v34 = vadd.f32 %v1201_v18, %v817_v4  ;;  %v1399_v58 = vsel %vm1271_vm10, %v1197_v61, %v1335_v17  ;;  %v1964_v25 = vsel %vm1836_vm11, %v1558_v11, %v1900_v62  ;;  %4376 = vmatpush3.msra.mxu0 %v2804_v30 }
 0x249   :  { %v1203_v46 = vpop.f32.mrf.mxu1  ;;  %v4195_v31 = vpop.f32.mrf.mxu0  ;;  %4266 = vmatmul.mubr.f32.gmra.mxu0 %v1399_v58  ;;  %4294 = vmatprep.mubr.msk.f32.mxu1 %vm2033_vm3, %v1964_v25 }
 0x24a   :  { %v1336_v0 = vmul.f32 0.01, %v1202_v34  ;;  %v1573_v40 = vadd.f32 %v4195_v31, %v5097_v48  ;;  %4295 = vmatmul.mubr.msk.f32.gmra.mxu1 %vm2033_vm3, %v1965_v7  ;;  %vm1272_vm12 = vcmp.gt.f32.partialorder %v1202_v34, 0.0 }
 0x24b   :  { %v1206_v42 = vpop.f32.mrf.mxu1  ;;  %v1567_v1 = vpop.f32.mrf.mxu0 }
 0x24c   :  { %v1207_v45 = vadd.f32 %v1206_v42, %v822_v28  ;;  %v1568_v60 = vadd.f32 %v5097_v48, %v1567_v1  ;;  %v1903_v43 = vmul.f32 0.01, %v1573_v40  ;;  %v1400_v15 = vsel %vm1272_vm12, %v1202_v34, %v1336_v0 }
 0x24d   :  { %v1208_v13 = vpop.f32.mrf.mxu1  ;;  %vm1839_vm13 = vcmp.gt.f32.partialorder %v1573_v40, 0.0  ;;  %4268 = vmatprep.mubr.f32.mxu0 %v1400_v15 }
 0x24e   :  { %vm1273_vm14 = vcmp.gt.f32.partialorder %v1207_v45, 0.0  ;;  %v1337_v52 = vmul.f32 0.01, %v1207_v45  ;;  %v1902_v6 = vmul.f32 0.01, %v1568_v60  ;;  %vm1838_vm15 = vcmp.gt.f32.partialorder %v1568_v60, 0.0 }
 0x24f   :  { %v1967_v50 = vsel %vm1839_vm13, %v1573_v40, %v1903_v43 }
 0x250   :  { %v1401_v37 = vsel %vm1273_vm14, %v1207_v45, %v1337_v52  ;;  %v1966_v29 = vsel %vm1838_vm15, %v1568_v60, %v1902_v6 }
 0x251   :  { %v4198_v51 = vpop.f32.mrf.mxu0  ;;  %4269 = vmatmul.mubr.f32.gmra.mxu0 %v1401_v37  ;;  %4297 = vmatprep.mubr.msk.f32.mxu1 %vm2033_vm3, %v1966_v29 }
 0x252   :  { %v1583_v14 = vadd.f32 %v4198_v51, %v5097_v48  ;;  %4298 = vmatmul.mubr.msk.f32.gmra.mxu1 %vm2033_vm3, %v1967_v50 }
 0x253   :  { %v1577_v21 = vpop.f32.mrf.mxu0 }
 0x254   :  { %v1578_v47 = vadd.f32 %v5097_v48, %v1577_v21  ;;  %v1905_v20 = vmul.f32 0.01, %v1583_v14  ;;  %vm1841_vm0 = vcmp.gt.f32.partialorder %v1583_v14, 0.0 }
 0x256   :  { %v1904_v53 = vmul.f32 0.01, %v1578_v47  ;;  %vm1840_vm1 = vcmp.gt.f32.partialorder %v1578_v47, 0.0  ;;  %v1969_v12 = vsel %vm1841_vm0, %v1583_v14, %v1905_v20 }
 0x258   :  { %v1968_v54 = vsel %vm1840_vm1, %v1578_v47, %v1904_v53 }
 0x259   :  { %v4201_v56 = vpop.f32.mrf.mxu0  ;;  %4300 = vmatprep.mubr.msk.f32.mxu1 %vm2033_vm3, %v1968_v54 }
 0x25a   :  { %v1593_v35 = vadd.f32 %v4201_v56, %v5097_v48  ;;  %4301 = vmatmul.mubr.msk.f32.gmra.mxu1 %vm2033_vm3, %v1969_v12 }
 0x25b   :  { %v1587_v16 = vpop.f32.mrf.mxu0 }
 0x25c   :  { %v1588_v59 = vadd.f32 %v5097_v48, %v1587_v16  ;;  %v1907_v32 = vmul.f32 0.01, %v1593_v35  ;;  %vm1843_vm2 = vcmp.gt.f32.partialorder %v1593_v35, 0.0 }
 0x25e   :  { %vm1842_vm4 = vcmp.gt.f32.partialorder %v1588_v59, 0.0  ;;  %v1906_v36 = vmul.f32 0.01, %v1588_v59  ;;  %v1971_v3 = vsel %vm1843_vm2, %v1593_v35, %v1907_v32 }
 0x260   :  { %v1970_v8 = vsel %vm1842_vm4, %v1588_v59, %v1906_v36 }
 0x261   :  { %v4204_v27 = vpop.f32.mrf.mxu0  ;;  %4303 = vmatprep.mubr.msk.f32.mxu1 %vm2033_vm3, %v1970_v8 }
 0x262   :  { %v1603_v41 = vadd.f32 %v4204_v27, %v5097_v48  ;;  %4304 = vmatmul.mubr.msk.f32.gmra.mxu1 %vm2033_vm3, %v1971_v3 }
 0x263   :  { %v1597_v5 = vpop.f32.mrf.mxu0 }
 0x264   :  { %v1598_v63 = vadd.f32 %v5097_v48, %v1597_v5  ;;  %v1909_v55 = vmul.f32 0.01, %v1603_v41  ;;  %vm1845_vm5 = vcmp.gt.f32.partialorder %v1603_v41, 0.0 }
 0x266   :  { %vm1844_vm6 = vcmp.gt.f32.partialorder %v1598_v63, 0.0  ;;  %v1908_v19 = vmul.f32 0.01, %v1598_v63  ;;  %v1973_v57 = vsel %vm1845_vm5, %v1603_v41, %v1909_v55 }
 0x268   :  { %v1972_v26 = vsel %vm1844_vm6, %v1598_v63, %v1908_v19 }
 0x269   :  { %v4207_v33 = vpop.f32.mrf.mxu0  ;;  %4306 = vmatprep.mubr.msk.f32.mxu1 %vm2033_vm3, %v1972_v26 }
 0x26a   :  { %v1613_v10 = vadd.f32 %v4207_v33, %v5097_v48  ;;  %4307 = vmatmul.mubr.msk.f32.gmra.mxu1 %vm2033_vm3, %v1973_v57 }
 0x26b   :  { %v1607_v9 = vpop.f32.mrf.mxu0 }
 0x26c   :  { %v1608_v49 = vadd.f32 %v5097_v48, %v1607_v9  ;;  %v1911_v24 = vmul.f32 0.01, %v1613_v10  ;;  %vm1847_vm7 = vcmp.gt.f32.partialorder %v1613_v10, 0.0 }
 0x26e   :  { %vm1846_vm8 = vcmp.gt.f32.partialorder %v1608_v49, 0.0  ;;  %v1910_v38 = vmul.f32 0.01, %v1608_v49  ;;  %v1975_v61 = vsel %vm1847_vm7, %v1613_v10, %v1911_v24 }
 0x270   :  { %v1974_v22 = vsel %vm1846_vm8, %v1608_v49, %v1910_v38 }
 0x271   :  { %v4210_v11 = vpop.f32.mrf.mxu0  ;;  %4309 = vmatprep.mubr.msk.f32.mxu1 %vm2033_vm3, %v1974_v22 }
 0x272   :  { %v1623_v4 = vadd.f32 %v4210_v11, %v5097_v48  ;;  %4310 = vmatmul.mubr.msk.f32.gmra.mxu1 %vm2033_vm3, %v1975_v61 }
 0x273   :  { %v1617_v44 = vpop.f32.mrf.mxu0 }
 0x274   :  { %v1618_v2 = vadd.f32 %v5097_v48, %v1617_v44  ;;  %v1913_v39 = vmul.f32 0.01, %v1623_v4  ;;  %vm1849_vm9 = vcmp.gt.f32.partialorder %v1623_v4, 0.0 }
 0x276   :  { %vm1848_vm10 = vcmp.gt.f32.partialorder %v1618_v2, 0.0  ;;  %v1912_v17 = vmul.f32 0.01, %v1618_v2  ;;  %v1977_v18 = vsel %vm1849_vm9, %v1623_v4, %v1913_v39 }
 0x278   :  { %v1976_v62 = vsel %vm1848_vm10, %v1618_v2, %v1912_v17 }
 0x279   :  { %v4213_v34 = vpop.f32.mrf.mxu0  ;;  %4312 = vmatprep.mubr.msk.f32.mxu1 %vm2033_vm3, %v1976_v62 }
 0x27a   :  { %v1633_v58 = vadd.f32 %v4213_v34, %v5097_v48  ;;  %4313 = vmatmul.mubr.msk.f32.gmra.mxu1 %vm2033_vm3, %v1977_v18 }
 0x27b   :  { %v1627_v25 = vpop.f32.mrf.mxu0 }
 0x27c   :  { %v1628_v7 = vadd.f32 %v5097_v48, %v1627_v25  ;;  %v1915_v46 = vmul.f32 0.01, %v1633_v58  ;;  %vm1851_vm11 = vcmp.gt.f32.partialorder %v1633_v58, 0.0 }
 0x27e   :  { %vm1850_vm12 = vcmp.gt.f32.partialorder %v1628_v7, 0.0  ;;  %v1914_v31 = vmul.f32 0.01, %v1628_v7  ;;  %v1979_v0 = vsel %vm1851_vm11, %v1633_v58, %v1915_v46 }
 0x280   :  { %v1978_v28 = vsel %vm1850_vm12, %v1628_v7, %v1914_v31 }
 0x281   :  { %v4216_v40 = vpop.f32.mrf.mxu0  ;;  %4315 = vmatprep.mubr.msk.f32.mxu1 %vm2033_vm3, %v1978_v28 }
 0x282   :  { %v1643_v42 = vadd.f32 %v4216_v40, %v5097_v48  ;;  %4316 = vmatmul.mubr.msk.f32.gmra.mxu1 %vm2033_vm3, %v1979_v0 }
 0x283   :  { %v1637_v1 = vpop.f32.mrf.mxu0 }
 0x284   :  { %v1638_v45 = vadd.f32 %v5097_v48, %v1637_v1  ;;  %v1917_v60 = vmul.f32 0.01, %v1643_v42  ;;  %vm1853_vm13 = vcmp.gt.f32.partialorder %v1643_v42, 0.0 }
 0x286   :  { %vm1852_vm14 = vcmp.gt.f32.partialorder %v1638_v45, 0.0  ;;  %v1916_v43 = vmul.f32 0.01, %v1638_v45  ;;  %v1981_v15 = vsel %vm1853_vm13, %v1643_v42, %v1917_v60 }
 0x288   :  { %v1980_v13 = vsel %vm1852_vm14, %v1638_v45, %v1916_v43 }
 0x289   :  { %v4219_v52 = vpop.f32.mrf.mxu0  ;;  %4318 = vmatprep.mubr.msk.f32.mxu1 %vm2033_vm3, %v1980_v13 }
 0x28a   :  { %v1653_v6 = vadd.f32 %v4219_v52, %v5097_v48  ;;  %4319 = vmatmul.mubr.msk.f32.gmra.mxu1 %vm2033_vm3, %v1981_v15 }
 0x28b   :  { %v1647_v37 = vpop.f32.mrf.mxu0 }
 0x28c   :  { %v1648_v29 = vadd.f32 %v5097_v48, %v1647_v37  ;;  %v1919_v50 = vmul.f32 0.01, %v1653_v6  ;;  %vm1855_vm15 = vcmp.gt.f32.partialorder %v1653_v6, 0.0 }
 0x28e   :  { %vm1854_vm0 = vcmp.gt.f32.partialorder %v1648_v29, 0.0  ;;  %v1918_v51 = vmul.f32 0.01, %v1648_v29  ;;  %v1983_v21 = vsel %vm1855_vm15, %v1653_v6, %v1919_v50 }
 0x290   :  { %v1982_v14 = vsel %vm1854_vm0, %v1648_v29, %v1918_v51 }
 0x291   :  { %v4222_v47 = vpop.f32.mrf.mxu0  ;;  %4321 = vmatprep.mubr.msk.f32.mxu1 %vm2033_vm3, %v1982_v14 }
 0x292   :  { %v1663_v20 = vadd.f32 %v4222_v47, %v5097_v48  ;;  %4322 = vmatmul.mubr.msk.f32.gmra.mxu1 %vm2033_vm3, %v1983_v21 }
 0x293   :  { %v1657_v53 = vpop.f32.mrf.mxu0 }
 0x294   :  { %v1658_v54 = vadd.f32 %v5097_v48, %v1657_v53  ;;  %v1921_v12 = vmul.f32 0.01, %v1663_v20  ;;  %vm1857_vm1 = vcmp.gt.f32.partialorder %v1663_v20, 0.0 }
 0x296   :  { %vm1856_vm2 = vcmp.gt.f32.partialorder %v1658_v54, 0.0  ;;  %v1920_v56 = vmul.f32 0.01, %v1658_v54  ;;  %v1985_v16 = vsel %vm1857_vm1, %v1663_v20, %v1921_v12 }
 0x298   :  { %v1984_v35 = vsel %vm1856_vm2, %v1658_v54, %v1920_v56 }
 0x299   :  { %v4225_v59 = vpop.f32.mrf.mxu0  ;;  %4324 = vmatprep.mubr.msk.f32.mxu1 %vm2033_vm3, %v1984_v35 }
 0x29a   :  { %v1673_v32 = vadd.f32 %v4225_v59, %v5097_v48  ;;  %4325 = vmatmul.mubr.msk.f32.gmra.mxu1 %vm2033_vm3, %v1985_v16 }
 0x29b   :  { %v1667_v36 = vpop.f32.mrf.mxu0 }
 0x29c   :  { %v1668_v8 = vadd.f32 %v5097_v48, %v1667_v36  ;;  %v1923_v3 = vmul.f32 0.01, %v1673_v32  ;;  %vm1859_vm4 = vcmp.gt.f32.partialorder %v1673_v32, 0.0 }
 0x29e   :  { %vm1858_vm5 = vcmp.gt.f32.partialorder %v1668_v8, 0.0  ;;  %v1922_v27 = vmul.f32 0.01, %v1668_v8  ;;  %v1987_v5 = vsel %vm1859_vm4, %v1673_v32, %v1923_v3 }
 0x2a0   :  { %v1986_v41 = vsel %vm1858_vm5, %v1668_v8, %v1922_v27 }
 0x2a1   :  { %v4228_v63 = vpop.f32.mrf.mxu0  ;;  %4327 = vmatprep.mubr.msk.f32.mxu1 %vm2033_vm3, %v1986_v41 }
 0x2a2   :  { %v1683_v55 = vadd.f32 %v4228_v63, %v5097_v48  ;;  %4328 = vmatmul.mubr.msk.f32.gmra.mxu1 %vm2033_vm3, %v1987_v5  ;;  %v5229_v63 = vld [vmem:[%s6042_s7] ss:$0 sm:$0xff] }
 0x2a3   :  { %v1677_v19 = vpop.f32.mrf.mxu0 }
 0x2a4   :  { %v1678_v23 = vadd.f32 %v5097_v48, %v1677_v19  ;;  %v1925_v26 = vmul.f32 0.01, %v1683_v55  ;;  %vm1861_vm6 = vcmp.gt.f32.partialorder %v1683_v55, 0.0 }
 0x2a6   :  { %vm1860_vm7 = vcmp.gt.f32.partialorder %v1678_v23, 0.0  ;;  %v1924_v30 = vmul.f32 0.01, %v1678_v23  ;;  %v1989_v33 = vsel %vm1861_vm6, %v1683_v55, %v1925_v26 }
 0x2a8   :  { %v1988_v57 = vsel %vm1860_vm7, %v1678_v23, %v1924_v30 }
 0x2a9   :  { %v4231_v10 = vpop.f32.mrf.mxu0  ;;  %4330 = vmatprep.mubr.msk.f32.mxu1 %vm2033_vm3, %v1988_v57 }
 0x2aa   :  { %v1693_v9 = vadd.f32 %v4231_v10, %v5097_v48  ;;  %4331 = vmatmul.mubr.msk.f32.gmra.mxu1 %vm2033_vm3, %v1989_v33 }
 0x2ab   :  { %v1687_v49 = vpop.f32.mrf.mxu0 }
 0x2ac   :  { %v1688_v24 = vadd.f32 %v5097_v48, %v1687_v49  ;;  %v1927_v38 = vmul.f32 0.01, %v1693_v9  ;;  %vm1863_vm8 = vcmp.gt.f32.partialorder %v1693_v9, 0.0 }
 0x2ae   :  { %vm1862_vm9 = vcmp.gt.f32.partialorder %v1688_v24, 0.0  ;;  %v1926_v22 = vmul.f32 0.01, %v1688_v24  ;;  %v1991_v11 = vsel %vm1863_vm8, %v1693_v9, %v1927_v38 }
 0x2b0   :  { %v1990_v61 = vsel %vm1862_vm9, %v1688_v24, %v1926_v22 }
 0x2b1   :  { %v4234_v4 = vpop.f32.mrf.mxu0  ;;  %4333 = vmatprep.mubr.msk.f32.mxu1 %vm2033_vm3, %v1990_v61 }
 0x2b2   :  { %v1703_v44 = vadd.f32 %v4234_v4, %v5097_v48  ;;  %4334 = vmatmul.mubr.msk.f32.gmra.mxu1 %vm2033_vm3, %v1991_v11 }
 0x2b3   :  { %v1697_v2 = vpop.f32.mrf.mxu0 }
 0x2b4   :  { %v1698_v39 = vadd.f32 %v5097_v48, %v1697_v2  ;;  %v1929_v17 = vmul.f32 0.01, %v1703_v44  ;;  %vm1865_vm10 = vcmp.gt.f32.partialorder %v1703_v44, 0.0 }
 0x2b6   :  { %vm1864_vm11 = vcmp.gt.f32.partialorder %v1698_v39, 0.0  ;;  %v1928_v62 = vmul.f32 0.01, %v1698_v39  ;;  %v1993_v34 = vsel %vm1865_vm10, %v1703_v44, %v1929_v17 }
 0x2b8   :  { %v1992_v18 = vsel %vm1864_vm11, %v1698_v39, %v1928_v62  ;;  %vm2812_vm11 = vcmask 64512  }
 0x2b9   :  { %v4237_v58 = vpop.f32.mrf.mxu0  ;;  %4336 = vmatprep.mubr.msk.f32.mxu1 %vm2033_vm3, %v1992_v18 }
 0x2ba   :  { %v1713_v25 = vadd.f32 %v4237_v58, %v5097_v48  ;;  %4337 = vmatmul.mubr.msk.f32.gmra.mxu1 %vm2033_vm3, %v1993_v34 }
 0x2bb   :  { %v1707_v7 = vpop.f32.mrf.mxu0 }
 0x2bc   :  { %v1708_v46 = vadd.f32 %v5097_v48, %v1707_v7  ;;  %v1931_v31 = vmul.f32 0.01, %v1713_v25  ;;  %vm1867_vm12 = vcmp.gt.f32.partialorder %v1713_v25, 0.0 }
 0x2be   :  { %vm1866_vm13 = vcmp.gt.f32.partialorder %v1708_v46, 0.0  ;;  %v1930_v28 = vmul.f32 0.01, %v1708_v46  ;;  %v1995_v40 = vsel %vm1867_vm12, %v1713_v25, %v1931_v31 }
 0x2c0   :  { %v1994_v0 = vsel %vm1866_vm13, %v1708_v46, %v1930_v28 }
 0x2c1   :  { %v4240_v42 = vpop.f32.mrf.mxu0  ;;  %4339 = vmatprep.mubr.msk.f32.mxu1 %vm2033_vm3, %v1994_v0 }
 0x2c2   :  { %v1723_v1 = vadd.f32 %v4240_v42, %v5097_v48  ;;  %4340 = vmatmul.mubr.msk.f32.gmra.mxu1 %vm2033_vm3, %v1995_v40 }
 0x2c3   :  { %v1717_v45 = vpop.f32.mrf.mxu0 }
 0x2c4   :  { %v1718_v60 = vadd.f32 %v5097_v48, %v1717_v45  ;;  %v1933_v43 = vmul.f32 0.01, %v1723_v1  ;;  %vm1869_vm14 = vcmp.gt.f32.partialorder %v1723_v1, 0.0 }
 0x2c6   :  { %vm1868_vm15 = vcmp.gt.f32.partialorder %v1718_v60, 0.0  ;;  %v1932_v13 = vmul.f32 0.01, %v1718_v60  ;;  %v1997_v52 = vsel %vm1869_vm14, %v1723_v1, %v1933_v43 }
 0x2c8   :  { %v1996_v15 = vsel %vm1868_vm15, %v1718_v60, %v1932_v13 }
 0x2c9   :  { %v4243_v6 = vpop.f32.mrf.mxu0  ;;  %4342 = vmatprep.mubr.msk.f32.mxu1 %vm2033_vm3, %v1996_v15 }
 0x2ca   :  { %v1733_v37 = vadd.f32 %v4243_v6, %v5097_v48  ;;  %4343 = vmatmul.mubr.msk.f32.gmra.mxu1 %vm2033_vm3, %v1997_v52 }
 0x2cb   :  { %v1727_v29 = vpop.f32.mrf.mxu0 }
 0x2cc   :  { %v1728_v50 = vadd.f32 %v5097_v48, %v1727_v29  ;;  %v1935_v51 = vmul.f32 0.01, %v1733_v37  ;;  %vm1871_vm0 = vcmp.gt.f32.partialorder %v1733_v37, 0.0 }
 0x2ce   :  { %vm1870_vm1 = vcmp.gt.f32.partialorder %v1728_v50, 0.0  ;;  %v1934_v14 = vmul.f32 0.01, %v1728_v50  ;;  %v1999_v47 = vsel %vm1871_vm0, %v1733_v37, %v1935_v51 }
 0x2d0   :  { %v1998_v21 = vsel %vm1870_vm1, %v1728_v50, %v1934_v14 }
 0x2d1   :  { %v4246_v20 = vpop.f32.mrf.mxu0  ;;  %4345 = vmatprep.mubr.msk.f32.mxu1 %vm2033_vm3, %v1998_v21 }
 0x2d2   :  { %v1743_v53 = vadd.f32 %v4246_v20, %v5097_v48  ;;  %4346 = vmatmul.mubr.msk.f32.gmra.mxu1 %vm2033_vm3, %v1999_v47 }
 0x2d3   :  { %v1737_v54 = vpop.f32.mrf.mxu0 }
 0x2d4   :  { %v1738_v12 = vadd.f32 %v5097_v48, %v1737_v54  ;;  %v1937_v56 = vmul.f32 0.01, %v1743_v53  ;;  %vm1873_vm2 = vcmp.gt.f32.partialorder %v1743_v53, 0.0 }
 0x2d6   :  { %vm1872_vm4 = vcmp.gt.f32.partialorder %v1738_v12, 0.0  ;;  %v1936_v35 = vmul.f32 0.01, %v1738_v12  ;;  %v2001_v59 = vsel %vm1873_vm2, %v1743_v53, %v1937_v56 }
 0x2d8   :  { %v2000_v16 = vsel %vm1872_vm4, %v1738_v12, %v1936_v35 }
 0x2d9   :  { %v4249_v32 = vpop.f32.mrf.mxu0  ;;  %4348 = vmatprep.mubr.msk.f32.mxu1 %vm2033_vm3, %v2000_v16 }
 0x2da   :  { %v1753_v36 = vadd.f32 %v4249_v32, %v5097_v48  ;;  %4349 = vmatmul.mubr.msk.f32.gmra.mxu1 %vm2033_vm3, %v2001_v59 }
 0x2db   :  { %v1747_v8 = vpop.f32.mrf.mxu0 }
 0x2dc   :  { %v1748_v3 = vadd.f32 %v5097_v48, %v1747_v8  ;;  %v1939_v27 = vmul.f32 0.01, %v1753_v36  ;;  %vm1875_vm5 = vcmp.gt.f32.partialorder %v1753_v36, 0.0 }
 0x2de   :  { %vm1874_vm6 = vcmp.gt.f32.partialorder %v1748_v3, 0.0  ;;  %v1938_v41 = vmul.f32 0.01, %v1748_v3  ;;  %v2003_v55 = vsel %vm1875_vm5, %v1753_v36, %v1939_v27 }
 0x2e0   :  { %v2002_v5 = vsel %vm1874_vm6, %v1748_v3, %v1938_v41 }
 0x2e1   :  { %v4252_v19 = vpop.f32.mrf.mxu0  ;;  %4351 = vmatprep.mubr.msk.f32.mxu1 %vm2033_vm3, %v2002_v5 }
 0x2e2   :  { %v1763_v23 = vadd.f32 %v4252_v19, %v5097_v48  ;;  %v4281_v26 = vpop.f32.mrf.mxu1  ;;  %4352 = vmatmul.mubr.msk.f32.gmra.mxu1 %vm2033_vm3, %v2003_v55 }
 0x2e3   :  { %v2298_v30 = vadd.f32 %v4281_v26, %v5229_v63  ;;  %v1757_v57 = vpop.f32.mrf.mxu0 }
 0x2e4   :  { %v1758_v33 = vadd.f32 %v5097_v48, %v1757_v57  ;;  %v2292_v10 = vpop.f32.mrf.mxu1  ;;  %v1941_v9 = vmul.f32 0.01, %v1763_v23  ;;  %vm1877_vm7 = vcmp.gt.f32.partialorder %v1763_v23, 0.0 }
 0x2e5   :  { %v2293_v49 = vadd.f32 %v5229_v63, %v2292_v10  ;;  %v2676_v24 = vmul.f32 0.01, %v2298_v30  ;;  %vm2612_vm9 = vcmp.gt.f32.partialorder %v2298_v30, 0.0 }
 0x2e6   :  { %vm1876_vm8 = vcmp.gt.f32.partialorder %v1758_v33, 0.0  ;;  %v1940_v38 = vmul.f32 0.01, %v1758_v33  ;;  %v2005_v11 = vsel %vm1877_vm7, %v1763_v23, %v1941_v9 }
 0x2e7   :  { %vm2611_vm10 = vcmp.gt.f32.partialorder %v2293_v49, 0.0  ;;  %v2675_v22 = vmul.f32 0.01, %v2293_v49  ;;  %v2740_v2 = vsel %vm2612_vm9, %v2298_v30, %v2676_v24 }
 0x2e8   :  { %v2004_v61 = vsel %vm1876_vm8, %v1758_v33, %v1940_v38 }
 0x2e9   :  { %v4255_v4 = vpop.f32.mrf.mxu0  ;;  %4354 = vmatprep.mubr.msk.f32.mxu1 %vm2033_vm3, %v2004_v61  ;;  %v2739_v44 = vsel %vm2611_vm10, %v2293_v49, %v2675_v22 }
 0x2ea   :  { %v1773_v39 = vadd.f32 %v4255_v4, %v5097_v48  ;;  %v4284_v17 = vpop.f32.mrf.mxu1  ;;  %4355 = vmatmul.mubr.msk.f32.gmra.mxu1 %vm2033_vm3, %v2005_v11  ;;  %4377 = vmatprep.mubr.msk.f32.mxu0 %vm2812_vm11, %v2739_v44 }
 0x2eb   :  { %v2308_v62 = vadd.f32 %v4284_v17, %v5229_v63  ;;  %v1767_v18 = vpop.f32.mrf.mxu0  ;;  %4378 = vmatmul.mubr.msk.f32.vlgmr.msra.gmra.mxu0 %vm2812_vm11, %v2740_v2 }
 0x2ec   :  { %v1768_v34 = vadd.f32 %v5097_v48, %v1767_v18  ;;  %v2302_v58 = vpop.f32.mrf.mxu1  ;;  %v1943_v25 = vmul.f32 0.01, %v1773_v39  ;;  %vm1879_vm12 = vcmp.gt.f32.partialorder %v1773_v39, 0.0 }
 0x2ed   :  { %v2303_v7 = vadd.f32 %v5229_v63, %v2302_v58  ;;  %v2678_v46 = vmul.f32 0.01, %v2308_v62  ;;  %vm2614_vm14 = vcmp.gt.f32.partialorder %v2308_v62, 0.0 }
 0x2ee   :  { %vm1878_vm13 = vcmp.gt.f32.partialorder %v1768_v34, 0.0  ;;  %v1942_v31 = vmul.f32 0.01, %v1768_v34  ;;  %v2007_v40 = vsel %vm1879_vm12, %v1773_v39, %v1943_v25 }
 0x2ef   :  { %vm2613_vm15 = vcmp.gt.f32.partialorder %v2303_v7, 0.0  ;;  %v2677_v28 = vmul.f32 0.01, %v2303_v7  ;;  %v2742_v45 = vsel %vm2614_vm14, %v2308_v62, %v2678_v46 }
 0x2f0   :  { %v2006_v0 = vsel %vm1878_vm13, %v1768_v34, %v1942_v31 }
 0x2f1   :  { %v4258_v42 = vpop.f32.mrf.mxu0  ;;  %4357 = vmatprep.mubr.msk.f32.mxu1 %vm2033_vm3, %v2006_v0  ;;  %v2741_v1 = vsel %vm2613_vm15, %v2303_v7, %v2677_v28 }
 0x2f2   :  { %v1783_v60 = vadd.f32 %v4258_v42, %v5097_v48  ;;  %v4287_v43 = vpop.f32.mrf.mxu1  ;;  %4358 = vmatmul.mubr.msk.f32.gmra.mxu1 %vm2033_vm3, %v2007_v40  ;;  %4380 = vmatprep.mubr.msk.f32.mxu0 %vm2812_vm11, %v2741_v1 }
 0x2f3   :  { %v2318_v13 = vadd.f32 %v4287_v43, %v5229_v63  ;;  %v1777_v15 = vpop.f32.mrf.mxu0  ;;  %4381 = vmatmul.mubr.msk.f32.gmra.mxu0 %vm2812_vm11, %v2742_v45 }
 0x2f4   :  { %v1778_v52 = vadd.f32 %v5097_v48, %v1777_v15  ;;  %v2312_v6 = vpop.f32.mrf.mxu1  ;;  %v1945_v37 = vmul.f32 0.01, %v1783_v60  ;;  %vm1881_vm0 = vcmp.gt.f32.partialorder %v1783_v60, 0.0 }
 0x2f5   :  { %v2313_v29 = vadd.f32 %v5229_v63, %v2312_v6  ;;  %v2680_v50 = vmul.f32 0.01, %v2318_v13  ;;  %vm2616_vm2 = vcmp.gt.f32.partialorder %v2318_v13, 0.0 }
 0x2f6   :  { %vm1880_vm1 = vcmp.gt.f32.partialorder %v1778_v52, 0.0  ;;  %v1944_v51 = vmul.f32 0.01, %v1778_v52  ;;  %v2009_v47 = vsel %vm1881_vm0, %v1783_v60, %v1945_v37 }
 0x2f7   :  { %vm2615_vm4 = vcmp.gt.f32.partialorder %v2313_v29, 0.0  ;;  %v2679_v14 = vmul.f32 0.01, %v2313_v29  ;;  %v2744_v54 = vsel %vm2616_vm2, %v2318_v13, %v2680_v50 }
 0x2f8   :  { %v2008_v21 = vsel %vm1880_vm1, %v1778_v52, %v1944_v51 }
 0x2f9   :  { %v4261_v20 = vpop.f32.mrf.mxu0  ;;  %4360 = vmatprep.mubr.msk.f32.mxu1 %vm2033_vm3, %v2008_v21  ;;  %v2743_v53 = vsel %vm2615_vm4, %v2313_v29, %v2679_v14 }
 0x2fa   :  { %v1793_v12 = vadd.f32 %v4261_v20, %v5097_v48  ;;  %v4290_v56 = vpop.f32.mrf.mxu1  ;;  %4361 = vmatmul.mubr.msk.f32.gmra.mxu1 %vm2033_vm3, %v2009_v47  ;;  %4383 = vmatprep.mubr.msk.f32.mxu0 %vm2812_vm11, %v2743_v53 }
 0x2fb   :  { %v2328_v35 = vadd.f32 %v4290_v56, %v5229_v63  ;;  %v1787_v16 = vpop.f32.mrf.mxu0  ;;  %4384 = vmatmul.mubr.msk.f32.gmra.mxu0 %vm2812_vm11, %v2744_v54 }
 0x2fc   :  { %v1788_v59 = vadd.f32 %v5097_v48, %v1787_v16  ;;  %v2322_v32 = vpop.f32.mrf.mxu1  ;;  %v1947_v36 = vmul.f32 0.01, %v1793_v12  ;;  %vm1883_vm5 = vcmp.gt.f32.partialorder %v1793_v12, 0.0  ;;  %v4542_v48 = vld [vmem:[%s6040_s5] ss:$0 sm:$0xff] }
 0x2fd   :  { %v2323_v8 = vadd.f32 %v5229_v63, %v2322_v32  ;;  %v2682_v3 = vmul.f32 0.01, %v2328_v35  ;;  %vm2618_vm7 = vcmp.gt.f32.partialorder %v2328_v35, 0.0 }
 0x2fe   :  { %vm1882_vm6 = vcmp.gt.f32.partialorder %v1788_v59, 0.0  ;;  %v1946_v27 = vmul.f32 0.01, %v1788_v59  ;;  %v2011_v55 = vsel %vm1883_vm5, %v1793_v12, %v1947_v36 }
 0x2ff   :  { %vm2617_vm8 = vcmp.gt.f32.partialorder %v2323_v8, 0.0  ;;  %v2681_v41 = vmul.f32 0.01, %v2323_v8  ;;  %v2746_v26 = vsel %vm2618_vm7, %v2328_v35, %v2682_v3 }
 0x300   :  { %v2010_v5 = vsel %vm1882_vm6, %v1788_v59, %v1946_v27 }
 0x301   :  { %v4264_v19 = vpop.f32.mrf.mxu0  ;;  %4363 = vmatprep.mubr.msk.f32.mxu1 %vm2033_vm3, %v2010_v5  ;;  %v2745_v23 = vsel %vm2617_vm8, %v2323_v8, %v2681_v41 }
 0x302   :  { %v1803_v30 = vadd.f32 %v4542_v48, %v4264_v19  ;;  %v4293_v57 = vpop.f32.mrf.mxu1  ;;  %4364 = vmatmul.mubr.msk.f32.gmra.mxu1 %vm2033_vm3, %v2011_v55  ;;  %4386 = vmatprep.mubr.msk.f32.mxu0 %vm2812_vm11, %v2745_v23 }
 0x303   :  { %v2338_v33 = vadd.f32 %v4293_v57, %v5229_v63  ;;  %v1797_v10 = vpop.f32.mrf.mxu0  ;;  %4387 = vmatmul.mubr.msk.f32.gmra.mxu0 %vm2812_vm11, %v2746_v26 }
 0x304   :  { %v1798_v9 = vadd.f32 %v4542_v48, %v1797_v10  ;;  %v2332_v49 = vpop.f32.mrf.mxu1  ;;  %v1949_v24 = vmul.f32 0.01, %v1803_v30  ;;  %vm1885_vm9 = vcmp.gt.f32.partialorder %v1803_v30, 0.0 }
 0x305   :  { %v2333_v38 = vadd.f32 %v5229_v63, %v2332_v49  ;;  %v2684_v22 = vmul.f32 0.01, %v2338_v33  ;;  %vm2620_vm12 = vcmp.gt.f32.partialorder %v2338_v33, 0.0 }
 0x306   :  { %vm1884_vm10 = vcmp.gt.f32.partialorder %v1798_v9, 0.0  ;;  %v1948_v61 = vmul.f32 0.01, %v1798_v9  ;;  %v2013_v44 = vsel %vm1885_vm9, %v1803_v30, %v1949_v24 }
 0x307   :  { %vm2619_vm13 = vcmp.gt.f32.partialorder %v2333_v38, 0.0  ;;  %v2683_v11 = vmul.f32 0.01, %v2333_v38  ;;  %v2748_v17 = vsel %vm2620_vm12, %v2338_v33, %v2684_v22 }
 0x308   :  { %v2012_v4 = vsel %vm1884_vm10, %v1798_v9, %v1948_v61 }
 0x309   :  { %v4267_v2 = vpop.f32.mrf.mxu0  ;;  %4366 = vmatprep.mubr.msk.f32.mxu1 %vm2033_vm3, %v2012_v4  ;;  %v2747_v39 = vsel %vm2619_vm13, %v2333_v38, %v2683_v11 }
 0x30a   :  { %v1813_v62 = vadd.f32 %v4542_v48, %v4267_v2  ;;  %v4296_v18 = vpop.f32.mrf.mxu1  ;;  %4367 = vmatmul.mubr.msk.f32.gmra.mxu1 %vm2033_vm3, %v2013_v44  ;;  %4389 = vmatprep.mubr.msk.f32.mxu0 %vm2812_vm11, %v2747_v39 }
 0x30b   :  { %v2348_v34 = vadd.f32 %v4296_v18, %v5229_v63  ;;  %v1807_v58 = vpop.f32.mrf.mxu0  ;;  %4390 = vmatmul.mubr.msk.f32.gmra.mxu0 %vm2812_vm11, %v2748_v17 }
 0x30c   :  { %v1808_v25 = vadd.f32 %v4542_v48, %v1807_v58  ;;  %v2342_v7 = vpop.f32.mrf.mxu1  ;;  %v1951_v46 = vmul.f32 0.01, %v1813_v62  ;;  %vm1887_vm14 = vcmp.gt.f32.partialorder %v1813_v62, 0.0 }
 0x30d   :  { %v2343_v31 = vadd.f32 %v5229_v63, %v2342_v7  ;;  %v2686_v28 = vmul.f32 0.01, %v2348_v34  ;;  %vm2622_vm0 = vcmp.gt.f32.partialorder %v2348_v34, 0.0 }
 0x30e   :  { %vm1886_vm15 = vcmp.gt.f32.partialorder %v1808_v25, 0.0  ;;  %v1950_v0 = vmul.f32 0.01, %v1808_v25  ;;  %v2015_v1 = vsel %vm1887_vm14, %v1813_v62, %v1951_v46 }
 0x30f   :  { %vm2621_vm1 = vcmp.gt.f32.partialorder %v2343_v31, 0.0  ;;  %v2685_v40 = vmul.f32 0.01, %v2343_v31  ;;  %v2750_v43 = vsel %vm2622_vm0, %v2348_v34, %v2686_v28 }
 0x310   :  { %v2014_v42 = vsel %vm1886_vm15, %v1808_v25, %v1950_v0 }
 0x311   :  { %v4270_v45 = vpop.f32.mrf.mxu0  ;;  %4369 = vmatprep.mubr.msk.f32.mxu1 %vm2033_vm3, %v2014_v42  ;;  %v2749_v60 = vsel %vm2621_vm1, %v2343_v31, %v2685_v40 }
 0x312   :  { %v1823_v13 = vadd.f32 %v4542_v48, %v4270_v45  ;;  %v4299_v15 = vpop.f32.mrf.mxu1  ;;  %4370 = vmatmul.mubr.msk.f32.gmra.mxu1 %vm2033_vm3, %v2015_v1  ;;  %4392 = vmatprep.mubr.msk.f32.mxu0 %vm2812_vm11, %v2749_v60 }
 0x313   :  { %v2358_v52 = vadd.f32 %v4299_v15, %v5229_v63  ;;  %v1817_v6 = vpop.f32.mrf.mxu0  ;;  %4393 = vmatmul.mubr.msk.f32.gmra.mxu0 %vm2812_vm11, %v2750_v43 }
 0x314   :  { %v1818_v37 = vadd.f32 %v4542_v48, %v1817_v6  ;;  %v2352_v29 = vpop.f32.mrf.mxu1  ;;  %v1953_v50 = vmul.f32 0.01, %v1823_v13  ;;  %vm1889_vm2 = vcmp.gt.f32.partialorder %v1823_v13, 0.0 }
 0x315   :  { %v2353_v51 = vadd.f32 %v5229_v63, %v2352_v29  ;;  %v2688_v14 = vmul.f32 0.01, %v2358_v52  ;;  %vm2624_vm5 = vcmp.gt.f32.partialorder %v2358_v52, 0.0 }
 0x316   :  { %vm1888_vm4 = vcmp.gt.f32.partialorder %v1818_v37, 0.0  ;;  %v1952_v21 = vmul.f32 0.01, %v1818_v37  ;;  %v2017_v53 = vsel %vm1889_vm2, %v1823_v13, %v1953_v50 }
 0x317   :  { %vm2623_vm6 = vcmp.gt.f32.partialorder %v2353_v51, 0.0  ;;  %v2687_v47 = vmul.f32 0.01, %v2353_v51  ;;  %v2752_v12 = vsel %vm2624_vm5, %v2358_v52, %v2688_v14 }
 0x318   :  { %v2016_v20 = vsel %vm1888_vm4, %v1818_v37, %v1952_v21 }
 0x319   :  { %4372 = vmatprep.mubr.msk.f32.mxu1 %vm2033_vm3, %v2016_v20  ;;  %v2751_v54 = vsel %vm2623_vm6, %v2353_v51, %v2687_v47 }
 0x31a   :  { %v4302_v56 = vpop.f32.mrf.mxu1  ;;  %4373 = vmatmul.mubr.msk.f32.gmra.mxu1 %vm2033_vm3, %v2017_v53  ;;  %4395 = vmatprep.mubr.msk.f32.mxu0 %vm2812_vm11, %v2751_v54 }
 0x31b   :  { %v2368_v35 = vadd.f32 %v4302_v56, %v5229_v63  ;;  %4396 = vmatmul.mubr.msk.f32.gmra.mxu0 %vm2812_vm11, %v2752_v12 }
 0x31c   :  { %v2362_v16 = vpop.f32.mrf.mxu1 }
 0x31d   :  { %v2363_v59 = vadd.f32 %v5229_v63, %v2362_v16  ;;  %v2690_v32 = vmul.f32 0.01, %v2368_v35  ;;  %vm2626_vm7 = vcmp.gt.f32.partialorder %v2368_v35, 0.0 }
 0x31f   :  { %vm2625_vm8 = vcmp.gt.f32.partialorder %v2363_v59, 0.0  ;;  %v2689_v36 = vmul.f32 0.01, %v2363_v59  ;;  %v2754_v3 = vsel %vm2626_vm7, %v2368_v35, %v2690_v32 }
 0x321   :  { %v2753_v8 = vsel %vm2625_vm8, %v2363_v59, %v2689_v36 }
 0x322   :  { %v4305_v27 = vpop.f32.mrf.mxu1  ;;  %4398 = vmatprep.mubr.msk.f32.mxu0 %vm2812_vm11, %v2753_v8 }
 0x323   :  { %v2378_v41 = vadd.f32 %v4305_v27, %v5229_v63  ;;  %4399 = vmatmul.mubr.msk.f32.gmra.mxu0 %vm2812_vm11, %v2754_v3 }
 0x324   :  { %v2372_v5 = vpop.f32.mrf.mxu1 }
 0x325   :  { %v2373_v55 = vadd.f32 %v5229_v63, %v2372_v5  ;;  %v2692_v19 = vmul.f32 0.01, %v2378_v41  ;;  %vm2628_vm3 = vcmp.gt.f32.partialorder %v2378_v41, 0.0 }
 0x327   :  { %vm2627_vm9 = vcmp.gt.f32.partialorder %v2373_v55, 0.0  ;;  %v2691_v23 = vmul.f32 0.01, %v2373_v55  ;;  %v2756_v48 = vsel %vm2628_vm3, %v2378_v41, %v2692_v19 }
 0x329   :  { %v2755_v26 = vsel %vm2627_vm9, %v2373_v55, %v2691_v23 }
 0x32a   :  { %v4308_v30 = vpop.f32.mrf.mxu1  ;;  %4401 = vmatprep.mubr.msk.f32.mxu0 %vm2812_vm11, %v2755_v26 }
 0x32b   :  { %v2388_v57 = vadd.f32 %v4308_v30, %v5229_v63  ;;  %4402 = vmatmul.mubr.msk.f32.gmra.mxu0 %vm2812_vm11, %v2756_v48 }
 0x32c   :  { %v2382_v33 = vpop.f32.mrf.mxu1 }
 0x32d   :  { %v2383_v10 = vadd.f32 %v5229_v63, %v2382_v33  ;;  %v2694_v9 = vmul.f32 0.01, %v2388_v57  ;;  %vm2630_vm10 = vcmp.gt.f32.partialorder %v2388_v57, 0.0 }
 0x32f   :  { %vm2629_vm12 = vcmp.gt.f32.partialorder %v2383_v10, 0.0  ;;  %v2693_v49 = vmul.f32 0.01, %v2383_v10  ;;  %v2758_v38 = vsel %vm2630_vm10, %v2388_v57, %v2694_v9 }
 0x331   :  { %v2757_v24 = vsel %vm2629_vm12, %v2383_v10, %v2693_v49 }
 0x332   :  { %v4311_v22 = vpop.f32.mrf.mxu1  ;;  %4404 = vmatprep.mubr.msk.f32.mxu0 %vm2812_vm11, %v2757_v24 }
 0x333   :  { %v2398_v61 = vadd.f32 %v4311_v22, %v5229_v63  ;;  %4405 = vmatmul.mubr.msk.f32.gmra.mxu0 %vm2812_vm11, %v2758_v38 }
 0x334   :  { %v2392_v11 = vpop.f32.mrf.mxu1 }
 0x335   :  { %v2393_v4 = vadd.f32 %v5229_v63, %v2392_v11  ;;  %v2696_v44 = vmul.f32 0.01, %v2398_v61  ;;  %vm2632_vm13 = vcmp.gt.f32.partialorder %v2398_v61, 0.0 }
 0x337   :  { %vm2631_vm14 = vcmp.gt.f32.partialorder %v2393_v4, 0.0  ;;  %v2695_v2 = vmul.f32 0.01, %v2393_v4  ;;  %v2760_v17 = vsel %vm2632_vm13, %v2398_v61, %v2696_v44 }
 0x339   :  { %v2759_v39 = vsel %vm2631_vm14, %v2393_v4, %v2695_v2 }
 0x33a   :  { %v4314_v62 = vpop.f32.mrf.mxu1  ;;  %4407 = vmatprep.mubr.msk.f32.mxu0 %vm2812_vm11, %v2759_v39 }
 0x33b   :  { %v2408_v18 = vadd.f32 %v4314_v62, %v5229_v63  ;;  %4408 = vmatmul.mubr.msk.f32.gmra.mxu0 %vm2812_vm11, %v2760_v17 }
 0x33c   :  { %v2402_v34 = vpop.f32.mrf.mxu1 }
 0x33d   :  { %v2403_v58 = vadd.f32 %v5229_v63, %v2402_v34  ;;  %v2698_v25 = vmul.f32 0.01, %v2408_v18  ;;  %vm2634_vm15 = vcmp.gt.f32.partialorder %v2408_v18, 0.0 }
 0x33f   :  { %vm2633_vm0 = vcmp.gt.f32.partialorder %v2403_v58, 0.0  ;;  %v2697_v7 = vmul.f32 0.01, %v2403_v58  ;;  %v2762_v31 = vsel %vm2634_vm15, %v2408_v18, %v2698_v25 }
 0x341   :  { %v2761_v46 = vsel %vm2633_vm0, %v2403_v58, %v2697_v7 }
 0x342   :  { %v4317_v28 = vpop.f32.mrf.mxu1  ;;  %4410 = vmatprep.mubr.msk.f32.mxu0 %vm2812_vm11, %v2761_v46 }
 0x343   :  { %v2418_v0 = vadd.f32 %v4317_v28, %v5229_v63  ;;  %4411 = vmatmul.mubr.msk.f32.gmra.mxu0 %vm2812_vm11, %v2762_v31 }
 0x344   :  { %v2412_v40 = vpop.f32.mrf.mxu1 }
 0x345   :  { %v2413_v42 = vadd.f32 %v5229_v63, %v2412_v40  ;;  %v2700_v1 = vmul.f32 0.01, %v2418_v0  ;;  %vm2636_vm1 = vcmp.gt.f32.partialorder %v2418_v0, 0.0 }
 0x347   :  { %vm2635_vm2 = vcmp.gt.f32.partialorder %v2413_v42, 0.0  ;;  %v2699_v45 = vmul.f32 0.01, %v2413_v42  ;;  %v2764_v43 = vsel %vm2636_vm1, %v2418_v0, %v2700_v1 }
 0x349   :  { %v2763_v60 = vsel %vm2635_vm2, %v2413_v42, %v2699_v45 }
 0x34a   :  { %v4320_v13 = vpop.f32.mrf.mxu1  ;;  %4413 = vmatprep.mubr.msk.f32.mxu0 %vm2812_vm11, %v2763_v60 }
 0x34b   :  { %v2428_v15 = vadd.f32 %v4320_v13, %v5229_v63  ;;  %4414 = vmatmul.mubr.msk.f32.gmra.mxu0 %vm2812_vm11, %v2764_v43 }
 0x34c   :  { %v2422_v52 = vpop.f32.mrf.mxu1 }
 0x34d   :  { %v2423_v6 = vadd.f32 %v5229_v63, %v2422_v52  ;;  %v2702_v37 = vmul.f32 0.01, %v2428_v15  ;;  %vm2638_vm4 = vcmp.gt.f32.partialorder %v2428_v15, 0.0 }
 0x34f   :  { %vm2637_vm5 = vcmp.gt.f32.partialorder %v2423_v6, 0.0  ;;  %v2701_v29 = vmul.f32 0.01, %v2423_v6  ;;  %v2766_v51 = vsel %vm2638_vm4, %v2428_v15, %v2702_v37 }
 0x351   :  { %v2765_v50 = vsel %vm2637_vm5, %v2423_v6, %v2701_v29 }
 0x352   :  { %v4323_v14 = vpop.f32.mrf.mxu1  ;;  %4416 = vmatprep.mubr.msk.f32.mxu0 %vm2812_vm11, %v2765_v50 }
 0x353   :  { %v2438_v21 = vadd.f32 %v4323_v14, %v5229_v63  ;;  %4417 = vmatmul.mubr.msk.f32.gmra.mxu0 %vm2812_vm11, %v2766_v51 }
 0x354   :  { %v2432_v47 = vpop.f32.mrf.mxu1 }
 0x355   :  { %v2433_v20 = vadd.f32 %v5229_v63, %v2432_v47  ;;  %v2704_v53 = vmul.f32 0.01, %v2438_v21  ;;  %vm2640_vm6 = vcmp.gt.f32.partialorder %v2438_v21, 0.0 }
 0x357   :  { %vm2639_vm7 = vcmp.gt.f32.partialorder %v2433_v20, 0.0  ;;  %v2703_v54 = vmul.f32 0.01, %v2433_v20  ;;  %v2768_v56 = vsel %vm2640_vm6, %v2438_v21, %v2704_v53 }
 0x359   :  { %v2767_v12 = vsel %vm2639_vm7, %v2433_v20, %v2703_v54 }
 0x35a   :  { %v4326_v35 = vpop.f32.mrf.mxu1  ;;  %4419 = vmatprep.mubr.msk.f32.mxu0 %vm2812_vm11, %v2767_v12 }
 0x35b   :  { %v2448_v16 = vadd.f32 %v4326_v35, %v5229_v63  ;;  %4420 = vmatmul.mubr.msk.f32.gmra.mxu0 %vm2812_vm11, %v2768_v56 }
 0x35c   :  { %v2442_v59 = vpop.f32.mrf.mxu1 }
 0x35d   :  { %v2443_v32 = vadd.f32 %v5229_v63, %v2442_v59  ;;  %v2706_v36 = vmul.f32 0.01, %v2448_v16  ;;  %vm2642_vm8 = vcmp.gt.f32.partialorder %v2448_v16, 0.0 }
 0x35f   :  { %vm2641_vm3 = vcmp.gt.f32.partialorder %v2443_v32, 0.0  ;;  %v2705_v8 = vmul.f32 0.01, %v2443_v32  ;;  %v2770_v27 = vsel %vm2642_vm8, %v2448_v16, %v2706_v36 }
 0x361   :  { %v2769_v3 = vsel %vm2641_vm3, %v2443_v32, %v2705_v8 }
 0x362   :  { %v4329_v41 = vpop.f32.mrf.mxu1  ;;  %4422 = vmatprep.mubr.msk.f32.mxu0 %vm2812_vm11, %v2769_v3 }
 0x363   :  { %v2458_v5 = vadd.f32 %v4329_v41, %v5229_v63  ;;  %4423 = vmatmul.mubr.msk.f32.gmra.mxu0 %vm2812_vm11, %v2770_v27 }
 0x364   :  { %v2452_v55 = vpop.f32.mrf.mxu1 }
 0x365   :  { %v2453_v19 = vadd.f32 %v5229_v63, %v2452_v55  ;;  %v2708_v23 = vmul.f32 0.01, %v2458_v5  ;;  %vm2644_vm9 = vcmp.gt.f32.partialorder %v2458_v5, 0.0 }
 0x367   :  { %vm2643_vm10 = vcmp.gt.f32.partialorder %v2453_v19, 0.0  ;;  %v2707_v26 = vmul.f32 0.01, %v2453_v19  ;;  %v2772_v30 = vsel %vm2644_vm9, %v2458_v5, %v2708_v23 }
 0x369   :  { %v2771_v48 = vsel %vm2643_vm10, %v2453_v19, %v2707_v26  ;;  %v3390_v19 = vlaneseq }
 0x36a   :  { %v4332_v57 = vpop.f32.mrf.mxu1  ;;  %4425 = vmatprep.mubr.msk.f32.mxu0 %vm2812_vm11, %v2771_v48 }
 0x36b   :  { %v2468_v33 = vadd.f32 %v4332_v57, %v5229_v63  ;;  %4426 = vmatmul.mubr.msk.f32.gmra.mxu0 %vm2812_vm11, %v2772_v30  ;;  %v5356_v57 = vand.u32 127, %v3390_v19 }
 0x36c   :  { %v2462_v10 = vpop.f32.mrf.mxu1 }
 0x36d   :  { %v2463_v9 = vadd.f32 %v5229_v63, %v2462_v10  ;;  %v2710_v49 = vmul.f32 0.01, %v2468_v33  ;;  %vm2646_vm12 = vcmp.gt.f32.partialorder %v2468_v33, 0.0  ;;  %v5361_v10 = vld [vmem:[%s6044_s9] ss:$0 sm:$0xff] }
 0x36f   :  { %vm2645_vm13 = vcmp.gt.f32.partialorder %v2463_v9, 0.0  ;;  %v2709_v24 = vmul.f32 0.01, %v2463_v9  ;;  %v2774_v22 = vsel %vm2646_vm12, %v2468_v33, %v2710_v49 }
 0x371   :  { %v2773_v38 = vsel %vm2645_vm13, %v2463_v9, %v2709_v24  ;;  %vm3392_vm13 = vcmp.lt.s32.totalorder %v5356_v57, 2 }
 0x372   :  { %v4335_v61 = vpop.f32.mrf.mxu1  ;;  %4428 = vmatprep.mubr.msk.f32.mxu0 %vm2812_vm11, %v2773_v38 }
 0x373   :  { %v2478_v11 = vadd.f32 %v4335_v61, %v5229_v63  ;;  %4429 = vmatmul.mubr.msk.f32.gmra.mxu0 %vm2812_vm11, %v2774_v22  ;;  %v3394_v22 = vld [vmem:[%s6036_s1 + $0x8] sm:$0xff] }
 0x374   :  { %v2472_v4 = vpop.f32.mrf.mxu1 }
 0x375   :  { %v2473_v44 = vadd.f32 %v5229_v63, %v2472_v4  ;;  %v2712_v2 = vmul.f32 0.01, %v2478_v11  ;;  %vm2648_vm14 = vcmp.gt.f32.partialorder %v2478_v11, 0.0 }
 0x377   :  { %vm2647_vm15 = vcmp.gt.f32.partialorder %v2473_v44, 0.0  ;;  %v2711_v39 = vmul.f32 0.01, %v2473_v44  ;;  %v2776_v62 = vsel %vm2648_vm14, %v2478_v11, %v2712_v2  ;;  %vm3521_vm14 = vcmask 31744   ;;  %v3393_v2 = vld [vmem:[%s6036_s1] sm:$0xff] }
 0x379   :  { %v2775_v17 = vsel %vm2647_vm15, %v2473_v44, %v2711_v39 }
 0x37a   :  { %v4338_v18 = vpop.f32.mrf.mxu1  ;;  %4431 = vmatprep.mubr.msk.f32.mxu0 %vm2812_vm11, %v2775_v17 }
 0x37b   :  { %v2488_v34 = vadd.f32 %v4338_v18, %v5229_v63  ;;  %4432 = vmatmul.mubr.msk.f32.gmra.mxu0 %vm2812_vm11, %v2776_v62 }
 0x37c   :  { %v2482_v58 = vpop.f32.mrf.mxu1 }
 0x37d   :  { %v2483_v25 = vadd.f32 %v5229_v63, %v2482_v58  ;;  %v2714_v7 = vmul.f32 0.01, %v2488_v34  ;;  %vm2650_vm0 = vcmp.gt.f32.partialorder %v2488_v34, 0.0 }
 0x37f   :  { %vm2649_vm1 = vcmp.gt.f32.partialorder %v2483_v25, 0.0  ;;  %v2713_v46 = vmul.f32 0.01, %v2483_v25  ;;  %v2778_v28 = vsel %vm2650_vm0, %v2488_v34, %v2714_v7 }
 0x381   :  { %v2777_v31 = vsel %vm2649_vm1, %v2483_v25, %v2713_v46 }
 0x382   :  { %v4341_v0 = vpop.f32.mrf.mxu1  ;;  %4434 = vmatprep.mubr.msk.f32.mxu0 %vm2812_vm11, %v2777_v31 }
 0x383   :  { %v2498_v40 = vadd.f32 %v4341_v0, %v5229_v63  ;;  %4435 = vmatmul.mubr.msk.f32.gmra.mxu0 %vm2812_vm11, %v2778_v28  ;;  %v3396_v28 = vld [vmem:[%s6036_s1 + $0x18] sm:$0xff] }
 0x384   :  { %v2492_v42 = vpop.f32.mrf.mxu1 }
 0x385   :  { %v2493_v1 = vadd.f32 %v5229_v63, %v2492_v42  ;;  %v2716_v45 = vmul.f32 0.01, %v2498_v40  ;;  %vm2652_vm2 = vcmp.gt.f32.partialorder %v2498_v40, 0.0 }
 0x387   :  { %vm2651_vm4 = vcmp.gt.f32.partialorder %v2493_v1, 0.0  ;;  %v2715_v60 = vmul.f32 0.01, %v2493_v1  ;;  %v2780_v13 = vsel %vm2652_vm2, %v2498_v40, %v2716_v45  ;;  %v3395_v45 = vld [vmem:[%s6036_s1 + $0x10] sm:$0xff] }
 0x389   :  { %v2779_v43 = vsel %vm2651_vm4, %v2493_v1, %v2715_v60 }
 0x38a   :  { %v4344_v15 = vpop.f32.mrf.mxu1  ;;  %4437 = vmatprep.mubr.msk.f32.mxu0 %vm2812_vm11, %v2779_v43 }
 0x38b   :  { %v2508_v52 = vadd.f32 %v4344_v15, %v5229_v63  ;;  %4438 = vmatmul.mubr.msk.f32.gmra.mxu0 %vm2812_vm11, %v2780_v13 }
 0x38c   :  { %v2502_v6 = vpop.f32.mrf.mxu1 }
 0x38d   :  { %v2503_v37 = vadd.f32 %v5229_v63, %v2502_v6  ;;  %v2718_v29 = vmul.f32 0.01, %v2508_v52  ;;  %vm2654_vm5 = vcmp.gt.f32.partialorder %v2508_v52, 0.0 }
 0x38f   :  { %vm2653_vm6 = vcmp.gt.f32.partialorder %v2503_v37, 0.0  ;;  %v2717_v50 = vmul.f32 0.01, %v2503_v37  ;;  %v2782_v14 = vsel %vm2654_vm5, %v2508_v52, %v2718_v29 }
 0x391   :  { %v2781_v51 = vsel %vm2653_vm6, %v2503_v37, %v2717_v50 }
 0x392   :  { %v4347_v21 = vpop.f32.mrf.mxu1  ;;  %4440 = vmatprep.mubr.msk.f32.mxu0 %vm2812_vm11, %v2781_v51 }
 0x393   :  { %v2518_v47 = vadd.f32 %v4347_v21, %v5229_v63  ;;  %4441 = vmatmul.mubr.msk.f32.gmra.mxu0 %vm2812_vm11, %v2782_v14  ;;  %v3398_v14 = vld [vmem:[%s6036_s1 + $0x28] sm:$0xff] }
 0x394   :  { %v2512_v20 = vpop.f32.mrf.mxu1 }
 0x395   :  { %v2513_v53 = vadd.f32 %v5229_v63, %v2512_v20  ;;  %v2720_v54 = vmul.f32 0.01, %v2518_v47  ;;  %vm2656_vm7 = vcmp.gt.f32.partialorder %v2518_v47, 0.0 }
 0x397   :  { %vm2655_vm8 = vcmp.gt.f32.partialorder %v2513_v53, 0.0  ;;  %v2719_v12 = vmul.f32 0.01, %v2513_v53  ;;  %v2784_v35 = vsel %vm2656_vm7, %v2518_v47, %v2720_v54  ;;  %v3397_v54 = vld [vmem:[%s6036_s1 + $0x20] sm:$0xff] }
 0x399   :  { %v2783_v56 = vsel %vm2655_vm8, %v2513_v53, %v2719_v12 }
 0x39a   :  { %v4350_v16 = vpop.f32.mrf.mxu1  ;;  %4443 = vmatprep.mubr.msk.f32.mxu0 %vm2812_vm11, %v2783_v56 }
 0x39b   :  { %v2528_v59 = vadd.f32 %v4350_v16, %v5229_v63  ;;  %4444 = vmatmul.mubr.msk.f32.gmra.mxu0 %vm2812_vm11, %v2784_v35 }
 0x39c   :  { %v2522_v32 = vpop.f32.mrf.mxu1 }
 0x39d   :  { %v2523_v36 = vadd.f32 %v5229_v63, %v2522_v32  ;;  %v2722_v8 = vmul.f32 0.01, %v2528_v59  ;;  %vm2658_vm3 = vcmp.gt.f32.partialorder %v2528_v59, 0.0 }
 0x39f   :  { %vm2657_vm9 = vcmp.gt.f32.partialorder %v2523_v36, 0.0  ;;  %v2721_v3 = vmul.f32 0.01, %v2523_v36  ;;  %v2786_v41 = vsel %vm2658_vm3, %v2528_v59, %v2722_v8 }
 0x3a1   :  { %v2785_v27 = vsel %vm2657_vm9, %v2523_v36, %v2721_v3 }
 0x3a2   :  { %v4353_v5 = vpop.f32.mrf.mxu1  ;;  %4446 = vmatprep.mubr.msk.f32.mxu0 %vm2812_vm11, %v2785_v27 }
 0x3a3   :  { %v2538_v55 = vadd.f32 %v4353_v5, %v5229_v63  ;;  %4447 = vmatmul.mubr.msk.f32.gmra.mxu0 %vm2812_vm11, %v2786_v41  ;;  %v3400_v41 = vld [vmem:[%s6036_s1 + $0x38] sm:$0xff] }
 0x3a4   :  { %v2532_v23 = vpop.f32.mrf.mxu1 }
 0x3a5   :  { %v2533_v26 = vadd.f32 %v5229_v63, %v2532_v23  ;;  %v2724_v48 = vmul.f32 0.01, %v2538_v55  ;;  %vm2660_vm10 = vcmp.gt.f32.partialorder %v2538_v55, 0.0 }
 0x3a7   :  { %vm2659_vm12 = vcmp.gt.f32.partialorder %v2533_v26, 0.0  ;;  %v2723_v30 = vmul.f32 0.01, %v2533_v26  ;;  %v2788_v9 = vsel %vm2660_vm10, %v2538_v55, %v2724_v48 }
 0x3a9   :  { %v2787_v33 = vsel %vm2659_vm12, %v2533_v26, %v2723_v30  ;;  %v3399_v26 = vld [vmem:[%s6036_s1 + $0x30] sm:$0xff] }
 0x3aa   :  { %v4356_v49 = vpop.f32.mrf.mxu1  ;;  %4449 = vmatprep.mubr.msk.f32.mxu0 %vm2812_vm11, %v2787_v33 }
 0x3ab   :  { %v2548_v24 = vadd.f32 %v4356_v49, %v5229_v63  ;;  %v4379_v38 = vpop.f32.mrf.mxu0  ;;  %4450 = vmatmul.mubr.msk.f32.gmra.mxu0 %vm2812_vm11, %v2788_v9 }
 0x3ac   :  { %v3077_v61 = vadd.f32 %v4379_v38, %v5361_v10  ;;  %v2542_v11 = vpop.f32.mrf.mxu1 }
 0x3ad   :  { %v2543_v4 = vadd.f32 %v5229_v63, %v2542_v11  ;;  %v3071_v44 = vpop.f32.mrf.mxu0  ;;  %v2726_v39 = vmul.f32 0.01, %v2548_v24  ;;  %vm2662_vm15 = vcmp.gt.f32.partialorder %v2548_v24, 0.0 }
 0x3ae   :  { %v3458_v17 = vsel %vm3392_vm13, %v3394_v22, %v3077_v61  ;;  %v3072_v62 = vadd.f32 %v5361_v10, %v3071_v44 }
 0x3af   :  { %3523 = vst.msk [vmem:[%s6045_s10 + $0x8] sm:$0xff] %vm3521_vm14, %v3458_v17  ;;  %vm2661_vm0 = vcmp.gt.f32.partialorder %v2543_v4, 0.0  ;;  %v2725_v18 = vmul.f32 0.01, %v2543_v4  ;;  %v2790_v25 = vsel %vm2662_vm15, %v2548_v24, %v2726_v39 }
 0x3b0   :  { %v3457_v34 = vsel %vm3392_vm13, %v3393_v2, %v3072_v62  ;;  %v3401_v62 = vld [vmem:[%s6036_s1 + $0x40] sm:$0xff] }
 0x3b1   :  { %3522 = vst.msk [vmem:[%s6045_s10] sm:$0xff] %vm3521_vm14, %v3457_v34  ;;  %v2789_v58 = vsel %vm2661_vm0, %v2543_v4, %v2725_v18  ;;  %v3402_v4 = vld [vmem:[%s6036_s1 + $0x48] sm:$0xff] }
 0x3b2   :  { %v4359_v7 = vpop.f32.mrf.mxu1  ;;  %4452 = vmatprep.mubr.msk.f32.mxu0 %vm2812_vm11, %v2789_v58 }
 0x3b3   :  { %v2558_v46 = vadd.f32 %v4359_v7, %v5229_v63  ;;  %v4382_v31 = vpop.f32.mrf.mxu0  ;;  %4453 = vmatmul.mubr.msk.f32.gmra.mxu0 %vm2812_vm11, %v2790_v25 }
 0x3b4   :  { %v3087_v0 = vadd.f32 %v4382_v31, %v5361_v10  ;;  %v2552_v40 = vpop.f32.mrf.mxu1 }
 0x3b5   :  { %v2553_v42 = vadd.f32 %v5229_v63, %v2552_v40  ;;  %v3081_v1 = vpop.f32.mrf.mxu0  ;;  %v2728_v60 = vmul.f32 0.01, %v2558_v46  ;;  %vm2664_vm1 = vcmp.gt.f32.partialorder %v2558_v46, 0.0 }
 0x3b6   :  { %v3460_v43 = vsel %vm3392_vm13, %v3396_v28, %v3087_v0  ;;  %v3082_v13 = vadd.f32 %v5361_v10, %v3081_v1 }
 0x3b7   :  { %3525 = vst.msk [vmem:[%s6045_s10 + $0x18] sm:$0xff] %vm3521_vm14, %v3460_v43  ;;  %vm2663_vm2 = vcmp.gt.f32.partialorder %v2553_v42, 0.0  ;;  %v2727_v15 = vmul.f32 0.01, %v2553_v42  ;;  %v2792_v37 = vsel %vm2664_vm1, %v2558_v46, %v2728_v60 }
 0x3b8   :  { %v3459_v52 = vsel %vm3392_vm13, %v3395_v45, %v3082_v13  ;;  %v3403_v13 = vld [vmem:[%s6036_s1 + $0x50] sm:$0xff] }
 0x3b9   :  { %3524 = vst.msk [vmem:[%s6045_s10 + $0x10] sm:$0xff] %vm3521_vm14, %v3459_v52  ;;  %v2791_v6 = vsel %vm2663_vm2, %v2553_v42, %v2727_v15  ;;  %v3404_v42 = vld [vmem:[%s6036_s1 + $0x58] sm:$0xff] }
 0x3ba   :  { %v4362_v29 = vpop.f32.mrf.mxu1  ;;  %4455 = vmatprep.mubr.msk.f32.mxu0 %vm2812_vm11, %v2791_v6 }
 0x3bb   :  { %v2568_v50 = vadd.f32 %v4362_v29, %v5229_v63  ;;  %v4385_v51 = vpop.f32.mrf.mxu0  ;;  %4456 = vmatmul.mubr.msk.f32.gmra.mxu0 %vm2812_vm11, %v2792_v37 }
 0x3bc   :  { %v3097_v21 = vadd.f32 %v4385_v51, %v5361_v10  ;;  %v2562_v47 = vpop.f32.mrf.mxu1 }
 0x3bd   :  { %v2563_v20 = vadd.f32 %v5229_v63, %v2562_v47  ;;  %v3091_v53 = vpop.f32.mrf.mxu0  ;;  %v2730_v12 = vmul.f32 0.01, %v2568_v50  ;;  %vm2666_vm4 = vcmp.gt.f32.partialorder %v2568_v50, 0.0 }
 0x3be   :  { %v3462_v56 = vsel %vm3392_vm13, %v3398_v14, %v3097_v21  ;;  %v3092_v35 = vadd.f32 %v5361_v10, %v3091_v53  ;;  %v4543_v14 = vld [vmem:[%s6042_s7] ss:$0 sm:$0xff] }
 0x3bf   :  { %3527 = vst.msk [vmem:[%s6045_s10 + $0x28] sm:$0xff] %vm3521_vm14, %v3462_v56  ;;  %vm2665_vm5 = vcmp.gt.f32.partialorder %v2563_v20, 0.0  ;;  %v2729_v16 = vmul.f32 0.01, %v2563_v20  ;;  %v2794_v36 = vsel %vm2666_vm4, %v2568_v50, %v2730_v12 }
 0x3c0   :  { %v3461_v59 = vsel %vm3392_vm13, %v3397_v54, %v3092_v35  ;;  %v3405_v35 = vld [vmem:[%s6036_s1 + $0x60] sm:$0xff] }
 0x3c1   :  { %3526 = vst.msk [vmem:[%s6045_s10 + $0x20] sm:$0xff] %vm3521_vm14, %v3461_v59  ;;  %v2793_v32 = vsel %vm2665_vm5, %v2563_v20, %v2729_v16  ;;  %v3406_v20 = vld [vmem:[%s6036_s1 + $0x68] sm:$0xff] }
 0x3c2   :  { %v4365_v8 = vpop.f32.mrf.mxu1  ;;  %4458 = vmatprep.mubr.msk.f32.mxu0 %vm2812_vm11, %v2793_v32 }
 0x3c3   :  { %v2578_v3 = vadd.f32 %v4365_v8, %v5229_v63  ;;  %v4388_v27 = vpop.f32.mrf.mxu0  ;;  %4459 = vmatmul.mubr.msk.f32.gmra.mxu0 %vm2812_vm11, %v2794_v36 }
 0x3c4   :  { %v3107_v5 = vadd.f32 %v4388_v27, %v5361_v10  ;;  %v2572_v55 = vpop.f32.mrf.mxu1 }
 0x3c5   :  { %v2573_v19 = vadd.f32 %v5229_v63, %v2572_v55  ;;  %v3101_v23 = vpop.f32.mrf.mxu0  ;;  %v2732_v48 = vmul.f32 0.01, %v2578_v3  ;;  %vm2668_vm6 = vcmp.gt.f32.partialorder %v2578_v3, 0.0 }
 0x3c6   :  { %v3464_v30 = vsel %vm3392_vm13, %v3400_v41, %v3107_v5  ;;  %v3102_v33 = vadd.f32 %v5361_v10, %v3101_v23  ;;  %v3408_v5 = vld [vmem:[%s6036_s1 + $0x78] sm:$0xff]  ;;  %v3407_v23 = vld [vmem:[%s6036_s1 + $0x70] sm:$0xff] }
 0x3c7   :  { %3529 = vst.msk [vmem:[%s6045_s10 + $0x38] sm:$0xff] %vm3521_vm14, %v3464_v30  ;;  %vm2667_vm7 = vcmp.gt.f32.partialorder %v2573_v19, 0.0  ;;  %v2731_v9 = vmul.f32 0.01, %v2573_v19  ;;  %v2796_v38 = vsel %vm2668_vm6, %v2578_v3, %v2732_v48 }
 0x3c8   :  { %v3463_v49 = vsel %vm3392_vm13, %v3399_v26, %v3102_v33 }
 0x3c9   :  { %3528 = vst.msk [vmem:[%s6045_s10 + $0x30] sm:$0xff] %vm3521_vm14, %v3463_v49  ;;  %v2795_v24 = vsel %vm2667_vm7, %v2573_v19, %v2731_v9  ;;  %v3410_v9 = vld [vmem:[%s6036_s1 + $0x88] sm:$0xff] }
 0x3ca   :  { %v4368_v22 = vpop.f32.mrf.mxu1  ;;  %4461 = vmatprep.mubr.msk.f32.mxu0 %vm2812_vm11, %v2795_v24 }
 0x3cb   :  { %v2588_v61 = vadd.f32 %v4368_v22, %v5229_v63  ;;  %v4391_v11 = vpop.f32.mrf.mxu0  ;;  %4462 = vmatmul.mubr.msk.f32.gmra.mxu0 %vm2812_vm11, %v2796_v38  ;;  %v3409_v38 = vld [vmem:[%s6036_s1 + $0x80] sm:$0xff] }
 0x3cc   :  { %v3117_v44 = vadd.f32 %v4391_v11, %v5361_v10  ;;  %v2582_v2 = vpop.f32.mrf.mxu1 }
 0x3cd   :  { %v2583_v39 = vadd.f32 %v5229_v63, %v2582_v2  ;;  %v3111_v17 = vpop.f32.mrf.mxu0  ;;  %v2734_v18 = vmul.f32 0.01, %v2588_v61  ;;  %vm2670_vm8 = vcmp.gt.f32.partialorder %v2588_v61, 0.0 }
 0x3ce   :  { %v3466_v34 = vsel %vm3392_vm13, %v3402_v4, %v3117_v44  ;;  %v3112_v58 = vadd.f32 %v5361_v10, %v3111_v17  ;;  %v3412_v44 = vld [vmem:[%s6036_s1 + $0x98] sm:$0xff]  ;;  %v3411_v17 = vld [vmem:[%s6036_s1 + $0x90] sm:$0xff] }
 0x3cf   :  { %3531 = vst.msk [vmem:[%s6045_s10 + $0x48] sm:$0xff] %vm3521_vm14, %v3466_v34  ;;  %vm2669_vm3 = vcmp.gt.f32.partialorder %v2583_v39, 0.0  ;;  %v2733_v25 = vmul.f32 0.01, %v2583_v39  ;;  %v2798_v31 = vsel %vm2670_vm8, %v2588_v61, %v2734_v18 }
 0x3d0   :  { %v3465_v7 = vsel %vm3392_vm13, %v3401_v62, %v3112_v58 }
 0x3d1   :  { %3530 = vst.msk [vmem:[%s6045_s10 + $0x40] sm:$0xff] %vm3521_vm14, %v3465_v7  ;;  %v2797_v46 = vsel %vm2669_vm3, %v2583_v39, %v2733_v25  ;;  %v3414_v25 = vld [vmem:[%s6036_s1 + $0xa8] sm:$0xff] }
 0x3d2   :  { %v4371_v28 = vpop.f32.mrf.mxu1  ;;  %4464 = vmatprep.mubr.msk.f32.mxu0 %vm2812_vm11, %v2797_v46 }
 0x3d3   :  { %v2598_v0 = vadd.f32 %v4371_v28, %v5229_v63  ;;  %v4394_v40 = vpop.f32.mrf.mxu0  ;;  %4465 = vmatmul.mubr.msk.f32.gmra.mxu0 %vm2812_vm11, %v2798_v31  ;;  %v3413_v31 = vld [vmem:[%s6036_s1 + $0xa0] sm:$0xff] }
 0x3d4   :  { %v3127_v1 = vadd.f32 %v4394_v40, %v5361_v10  ;;  %v2592_v45 = vpop.f32.mrf.mxu1 }
 0x3d5   :  { %v2593_v60 = vadd.f32 %v5229_v63, %v2592_v45  ;;  %v3121_v43 = vpop.f32.mrf.mxu0  ;;  %v2736_v15 = vmul.f32 0.01, %v2598_v0  ;;  %vm2672_vm9 = vcmp.gt.f32.partialorder %v2598_v0, 0.0 }
 0x3d6   :  { %v3468_v52 = vsel %vm3392_vm13, %v3404_v42, %v3127_v1  ;;  %v3122_v6 = vadd.f32 %v5361_v10, %v3121_v43  ;;  %v3416_v1 = vld [vmem:[%s6036_s1 + $0xb8] sm:$0xff]  ;;  %v3415_v43 = vld [vmem:[%s6036_s1 + $0xb0] sm:$0xff] }
 0x3d7   :  { %3533 = vst.msk [vmem:[%s6045_s10 + $0x58] sm:$0xff] %vm3521_vm14, %v3468_v52  ;;  %vm2671_vm10 = vcmp.gt.f32.partialorder %v2593_v60, 0.0  ;;  %v2735_v37 = vmul.f32 0.01, %v2593_v60  ;;  %v2800_v50 = vsel %vm2672_vm9, %v2598_v0, %v2736_v15 }
 0x3d8   :  { %v3467_v63 = vsel %vm3392_vm13, %v3403_v13, %v3122_v6 }
 0x3d9   :  { %3532 = vst.msk [vmem:[%s6045_s10 + $0x50] sm:$0xff] %vm3521_vm14, %v3467_v63  ;;  %v2799_v29 = vsel %vm2671_vm10, %v2593_v60, %v2735_v37  ;;  %v3418_v37 = vld [vmem:[%s6036_s1 + $0xc8] sm:$0xff] }
 0x3da   :  { %v4374_v51 = vpop.f32.mrf.mxu1  ;;  %4467 = vmatprep.mubr.msk.f32.mxu0 %vm2812_vm11, %v2799_v29 }
 0x3db   :  { %v2608_v21 = vadd.f32 %v4543_v14, %v4374_v51  ;;  %v4397_v47 = vpop.f32.mrf.mxu0  ;;  %4468 = vmatmul.mubr.msk.f32.gmra.mxu0 %vm2812_vm11, %v2800_v50  ;;  %v3417_v50 = vld [vmem:[%s6036_s1 + $0xc0] sm:$0xff] }
 0x3dc   :  { %v3137_v53 = vadd.f32 %v4397_v47, %v5361_v10  ;;  %v2602_v54 = vpop.f32.mrf.mxu1 }
 0x3dd   :  { %v2603_v12 = vadd.f32 %v4543_v14, %v2602_v54  ;;  %v3131_v56 = vpop.f32.mrf.mxu0  ;;  %v2738_v16 = vmul.f32 0.01, %v2608_v21  ;;  %vm2674_vm12 = vcmp.gt.f32.partialorder %v2608_v21, 0.0 }
 0x3de   :  { %v3470_v59 = vsel %vm3392_vm13, %v3406_v20, %v3137_v53  ;;  %v3132_v32 = vadd.f32 %v5361_v10, %v3131_v56  ;;  %v3420_v20 = vld [vmem:[%s6036_s1 + $0xd8] sm:$0xff] }
 0x3df   :  { %3535 = vst.msk [vmem:[%s6045_s10 + $0x68] sm:$0xff] %vm3521_vm14, %v3470_v59  ;;  %vm2673_vm15 = vcmp.gt.f32.partialorder %v2603_v12, 0.0  ;;  %v2737_v36 = vmul.f32 0.01, %v2603_v12  ;;  %v2802_v27 = vsel %vm2674_vm12, %v2608_v21, %v2738_v16 }
 0x3e0   :  { %v3469_v8 = vsel %vm3392_vm13, %v3405_v35, %v3132_v32  ;;  %v3422_v32 = vld [vmem:[%s6036_s1 + $0xe8] sm:$0xff] }
 0x3e1   :  { %3534 = vst.msk [vmem:[%s6045_s10 + $0x60] sm:$0xff] %vm3521_vm14, %v3469_v8  ;;  %v2801_v3 = vsel %vm2673_vm15, %v2603_v12, %v2737_v36  ;;  %v3419_v12 = vld [vmem:[%s6036_s1 + $0xd0] sm:$0xff] }
 0x3e2   :  { %4470 = vmatprep.mubr.msk.f32.mxu0 %vm2812_vm11, %v2801_v3  ;;  %v3421_v3 = vld [vmem:[%s6036_s1 + $0xe0] sm:$0xff] }
 0x3e3   :  { %v4400_v41 = vpop.f32.mrf.mxu0  ;;  %4471 = vmatmul.mubr.msk.f32.gmra.mxu0 %vm2812_vm11, %v2802_v27 }
 0x3e4   :  { %v3147_v55 = vadd.f32 %v4400_v41, %v5361_v10 }
 0x3e5   :  { %v3141_v19 = vpop.f32.mrf.mxu0 }
 0x3e6   :  { %v3472_v26 = vsel %vm3392_vm13, %v3408_v5, %v3147_v55  ;;  %v3142_v48 = vadd.f32 %v5361_v10, %v3141_v19  ;;  %v3424_v19 = vld [vmem:[%s6036_s1 + $0xf8] sm:$0xff] }
 0x3e7   :  { %3537 = vst.msk [vmem:[%s6045_s10 + $0x78] sm:$0xff] %vm3521_vm14, %v3472_v26 }
 0x3e8   :  { %v3471_v30 = vsel %vm3392_vm13, %v3407_v23, %v3142_v48  ;;  %v3423_v48 = vld [vmem:[%s6036_s1 + $0xf0] sm:$0xff] }
 0x3e9   :  { %3536 = vst.msk [vmem:[%s6045_s10 + $0x70] sm:$0xff] %vm3521_vm14, %v3471_v30 }
 0x3eb   :  { %v4403_v33 = vpop.f32.mrf.mxu0 }
 0x3ec   :  { %v3157_v49 = vadd.f32 %v4403_v33, %v5361_v10 }
 0x3ed   :  { %v3151_v24 = vpop.f32.mrf.mxu0 }
 0x3ee   :  { %v3474_v22 = vsel %vm3392_vm13, %v3410_v9, %v3157_v49  ;;  %v3152_v61 = vadd.f32 %v5361_v10, %v3151_v24  ;;  %v3426_v24 = vld [vmem:[%s6036_s1 + $0x108] sm:$0xff] }
 0x3ef   :  { %3539 = vst.msk [vmem:[%s6045_s10 + $0x88] sm:$0xff] %vm3521_vm14, %v3474_v22 }
 0x3f0   :  { %v3473_v11 = vsel %vm3392_vm13, %v3409_v38, %v3152_v61  ;;  %v3425_v61 = vld [vmem:[%s6036_s1 + $0x100] sm:$0xff] }
 0x3f1   :  { %3538 = vst.msk [vmem:[%s6045_s10 + $0x80] sm:$0xff] %vm3521_vm14, %v3473_v11 }
 0x3f3   :  { %v4406_v4 = vpop.f32.mrf.mxu0 }
 0x3f4   :  { %v3167_v2 = vadd.f32 %v4406_v4, %v5361_v10 }
 0x3f5   :  { %v3161_v39 = vpop.f32.mrf.mxu0 }
 0x3f6   :  { %v3476_v62 = vsel %vm3392_vm13, %v3412_v44, %v3167_v2  ;;  %v3162_v18 = vadd.f32 %v5361_v10, %v3161_v39  ;;  %v3428_v39 = vld [vmem:[%s6036_s1 + $0x118] sm:$0xff] }
 0x3f7   :  { %3541 = vst.msk [vmem:[%s6045_s10 + $0x98] sm:$0xff] %vm3521_vm14, %v3476_v62 }
 0x3f8   :  { %v3475_v34 = vsel %vm3392_vm13, %v3411_v17, %v3162_v18  ;;  %v3427_v18 = vld [vmem:[%s6036_s1 + $0x110] sm:$0xff] }
 0x3f9   :  { %3540 = vst.msk [vmem:[%s6045_s10 + $0x90] sm:$0xff] %vm3521_vm14, %v3475_v34 }
 0x3fb   :  { %v4409_v58 = vpop.f32.mrf.mxu0 }
 0x3fc   :  { %v3177_v7 = vadd.f32 %v4409_v58, %v5361_v10 }
 0x3fd   :  { %v3171_v46 = vpop.f32.mrf.mxu0 }
 0x3fe   :  { %v3478_v28 = vsel %vm3392_vm13, %v3414_v25, %v3177_v7  ;;  %v3172_v0 = vadd.f32 %v5361_v10, %v3171_v46  ;;  %v3430_v46 = vld [vmem:[%s6036_s1 + $0x128] sm:$0xff] }
 0x3ff   :  { %3543 = vst.msk [vmem:[%s6045_s10 + $0xa8] sm:$0xff] %vm3521_vm14, %v3478_v28 }
 0x400   :  { %v3477_v40 = vsel %vm3392_vm13, %v3413_v31, %v3172_v0  ;;  %v3429_v0 = vld [vmem:[%s6036_s1 + $0x120] sm:$0xff] }
 0x401   :  { %3542 = vst.msk [vmem:[%s6045_s10 + $0xa0] sm:$0xff] %vm3521_vm14, %v3477_v40 }
 0x403   :  { %v4412_v42 = vpop.f32.mrf.mxu0 }
 0x404   :  { %v3187_v45 = vadd.f32 %v4412_v42, %v5361_v10 }
 0x405   :  { %v3181_v60 = vpop.f32.mrf.mxu0 }
 0x406   :  { %v3480_v13 = vsel %vm3392_vm13, %v3416_v1, %v3187_v45  ;;  %v3182_v15 = vadd.f32 %v5361_v10, %v3181_v60  ;;  %v3432_v60 = vld [vmem:[%s6036_s1 + $0x138] sm:$0xff] }
 0x407   :  { %3545 = vst.msk [vmem:[%s6045_s10 + $0xb8] sm:$0xff] %vm3521_vm14, %v3480_v13 }
 0x408   :  { %v3479_v52 = vsel %vm3392_vm13, %v3415_v43, %v3182_v15  ;;  %v3431_v15 = vld [vmem:[%s6036_s1 + $0x130] sm:$0xff] }
 0x409   :  { %3544 = vst.msk [vmem:[%s6045_s10 + $0xb0] sm:$0xff] %vm3521_vm14, %v3479_v52 }
 0x40b   :  { %v4415_v6 = vpop.f32.mrf.mxu0 }
 0x40c   :  { %v3197_v63 = vadd.f32 %v4415_v6, %v5361_v10 }
 0x40d   :  { %v3191_v29 = vpop.f32.mrf.mxu0 }
 0x40e   :  { %v3482_v51 = vsel %vm3392_vm13, %v3418_v37, %v3197_v63  ;;  %v3192_v14 = vadd.f32 %v5361_v10, %v3191_v29  ;;  %v3434_v29 = vld [vmem:[%s6036_s1 + $0x148] sm:$0xff] }
 0x40f   :  { %3547 = vst.msk [vmem:[%s6045_s10 + $0xc8] sm:$0xff] %vm3521_vm14, %v3482_v51 }
 0x410   :  { %v3481_v21 = vsel %vm3392_vm13, %v3417_v50, %v3192_v14  ;;  %v3433_v14 = vld [vmem:[%s6036_s1 + $0x140] sm:$0xff] }
 0x411   :  { %3546 = vst.msk [vmem:[%s6045_s10 + $0xc0] sm:$0xff] %vm3521_vm14, %v3481_v21 }
 0x413   :  { %v4418_v47 = vpop.f32.mrf.mxu0 }
 0x414   :  { %v3207_v53 = vadd.f32 %v4418_v47, %v5361_v10 }
 0x415   :  { %v3201_v54 = vpop.f32.mrf.mxu0 }
 0x416   :  { %v3484_v56 = vsel %vm3392_vm13, %v3420_v20, %v3207_v53  ;;  %v3202_v35 = vadd.f32 %v5361_v10, %v3201_v54  ;;  %v3436_v54 = vld [vmem:[%s6036_s1 + $0x158] sm:$0xff] }
 0x417   :  { %3549 = vst.msk [vmem:[%s6045_s10 + $0xd8] sm:$0xff] %vm3521_vm14, %v3484_v56 }
 0x418   :  { %v3483_v16 = vsel %vm3392_vm13, %v3419_v12, %v3202_v35  ;;  %v3435_v35 = vld [vmem:[%s6036_s1 + $0x150] sm:$0xff] }
 0x419   :  { %3548 = vst.msk [vmem:[%s6045_s10 + $0xd0] sm:$0xff] %vm3521_vm14, %v3483_v16 }
 0x41b   :  { %v4421_v59 = vpop.f32.mrf.mxu0 }
 0x41c   :  { %v3217_v36 = vadd.f32 %v4421_v59, %v5361_v10 }
 0x41d   :  { %v3211_v8 = vpop.f32.mrf.mxu0 }
 0x41e   :  { %v3486_v27 = vsel %vm3392_vm13, %v3422_v32, %v3217_v36  ;;  %v3212_v41 = vadd.f32 %v5361_v10, %v3211_v8  ;;  %v3438_v8 = vld [vmem:[%s6036_s1 + $0x168] sm:$0xff] }
 0x41f   :  { %3551 = vst.msk [vmem:[%s6045_s10 + $0xe8] sm:$0xff] %vm3521_vm14, %v3486_v27 }
 0x420   :  { %v3485_v5 = vsel %vm3392_vm13, %v3421_v3, %v3212_v41  ;;  %v3437_v41 = vld [vmem:[%s6036_s1 + $0x160] sm:$0xff] }
 0x421   :  { %3550 = vst.msk [vmem:[%s6045_s10 + $0xe0] sm:$0xff] %vm3521_vm14, %v3485_v5 }
 0x423   :  { %v4424_v55 = vpop.f32.mrf.mxu0 }
 0x424   :  { %v3227_v23 = vadd.f32 %v4424_v55, %v5361_v10 }
 0x425   :  { %v3221_v26 = vpop.f32.mrf.mxu0 }
 0x426   :  { %v3488_v30 = vsel %vm3392_vm13, %v3424_v19, %v3227_v23  ;;  %v3222_v33 = vadd.f32 %v5361_v10, %v3221_v26  ;;  %v3440_v26 = vld [vmem:[%s6036_s1 + $0x178] sm:$0xff] }
 0x427   :  { %3553 = vst.msk [vmem:[%s6045_s10 + $0xf8] sm:$0xff] %vm3521_vm14, %v3488_v30 }
 0x428   :  { %v3487_v9 = vsel %vm3392_vm13, %v3423_v48, %v3222_v33  ;;  %v3439_v33 = vld [vmem:[%s6036_s1 + $0x170] sm:$0xff] }
 0x429   :  { %3552 = vst.msk [vmem:[%s6045_s10 + $0xf0] sm:$0xff] %vm3521_vm14, %v3487_v9 }
 0x42b   :  { %v4427_v49 = vpop.f32.mrf.mxu0 }
 0x42c   :  { %v3237_v38 = vadd.f32 %v4427_v49, %v5361_v10 }
 0x42d   :  { %v3231_v22 = vpop.f32.mrf.mxu0 }
 0x42e   :  { %v3490_v11 = vsel %vm3392_vm13, %v3426_v24, %v3237_v38  ;;  %v3232_v4 = vadd.f32 %v5361_v10, %v3231_v22  ;;  %v3442_v22 = vld [vmem:[%s6036_s1 + $0x188] sm:$0xff] }
 0x42f   :  { %3555 = vst.msk [vmem:[%s6045_s10 + $0x108] sm:$0xff] %vm3521_vm14, %v3490_v11 }
 0x430   :  { %v3489_v44 = vsel %vm3392_vm13, %v3425_v61, %v3232_v4  ;;  %v3441_v4 = vld [vmem:[%s6036_s1 + $0x180] sm:$0xff] }
 0x431   :  { %3554 = vst.msk [vmem:[%s6045_s10 + $0x100] sm:$0xff] %vm3521_vm14, %v3489_v44 }
 0x433   :  { %v4430_v2 = vpop.f32.mrf.mxu0 }
 0x434   :  { %v3247_v17 = vadd.f32 %v4430_v2, %v5361_v10 }
 0x435   :  { %v3241_v62 = vpop.f32.mrf.mxu0 }
 0x436   :  { %v3492_v34 = vsel %vm3392_vm13, %v3428_v39, %v3247_v17  ;;  %v3242_v58 = vadd.f32 %v5361_v10, %v3241_v62  ;;  %v3444_v62 = vld [vmem:[%s6036_s1 + $0x198] sm:$0xff] }
 0x437   :  { %3557 = vst.msk [vmem:[%s6045_s10 + $0x118] sm:$0xff] %vm3521_vm14, %v3492_v34 }
 0x438   :  { %v3491_v25 = vsel %vm3392_vm13, %v3427_v18, %v3242_v58  ;;  %v3443_v58 = vld [vmem:[%s6036_s1 + $0x190] sm:$0xff] }
 0x439   :  { %3556 = vst.msk [vmem:[%s6045_s10 + $0x110] sm:$0xff] %vm3521_vm14, %v3491_v25 }
 0x43b   :  { %v4433_v7 = vpop.f32.mrf.mxu0 }
 0x43c   :  { %v3257_v31 = vadd.f32 %v4433_v7, %v5361_v10 }
 0x43d   :  { %v3251_v28 = vpop.f32.mrf.mxu0 }
 0x43e   :  { %v3494_v40 = vsel %vm3392_vm13, %v3430_v46, %v3257_v31  ;;  %v3252_v42 = vadd.f32 %v5361_v10, %v3251_v28  ;;  %v3446_v28 = vld [vmem:[%s6036_s1 + $0x1a8] sm:$0xff] }
 0x43f   :  { %3559 = vst.msk [vmem:[%s6045_s10 + $0x128] sm:$0xff] %vm3521_vm14, %v3494_v40 }
 0x440   :  { %v3493_v1 = vsel %vm3392_vm13, %v3429_v0, %v3252_v42  ;;  %v3445_v42 = vld [vmem:[%s6036_s1 + $0x1a0] sm:$0xff] }
 0x441   :  { %3558 = vst.msk [vmem:[%s6045_s10 + $0x120] sm:$0xff] %vm3521_vm14, %v3493_v1 }
 0x443   :  { %v4436_v45 = vpop.f32.mrf.mxu0 }
 0x444   :  { %v3267_v43 = vadd.f32 %v4436_v45, %v5361_v10 }
 0x445   :  { %v3261_v13 = vpop.f32.mrf.mxu0 }
 0x446   :  { %v3496_v52 = vsel %vm3392_vm13, %v3432_v60, %v3267_v43  ;;  %v3262_v6 = vadd.f32 %v5361_v10, %v3261_v13  ;;  %v3448_v13 = vld [vmem:[%s6036_s1 + $0x1b8] sm:$0xff] }
 0x447   :  { %3561 = vst.msk [vmem:[%s6045_s10 + $0x138] sm:$0xff] %vm3521_vm14, %v3496_v52 }
 0x448   :  { %v3495_v37 = vsel %vm3392_vm13, %v3431_v15, %v3262_v6  ;;  %v3447_v6 = vld [vmem:[%s6036_s1 + $0x1b0] sm:$0xff] }
 0x449   :  { %3560 = vst.msk [vmem:[%s6045_s10 + $0x130] sm:$0xff] %vm3521_vm14, %v3495_v37 }
 0x44b   :  { %v4439_v63 = vpop.f32.mrf.mxu0 }
 0x44c   :  { %v3277_v50 = vadd.f32 %v4439_v63, %v5361_v10 }
 0x44d   :  { %v3271_v51 = vpop.f32.mrf.mxu0 }
 0x44e   :  { %v3498_v21 = vsel %vm3392_vm13, %v3434_v29, %v3277_v50  ;;  %v3272_v47 = vadd.f32 %v5361_v10, %v3271_v51  ;;  %v3450_v51 = vld [vmem:[%s6036_s1 + $0x1c8] sm:$0xff] }
 0x44f   :  { %3563 = vst.msk [vmem:[%s6045_s10 + $0x148] sm:$0xff] %vm3521_vm14, %v3498_v21 }
 0x450   :  { %v3497_v20 = vsel %vm3392_vm13, %v3433_v14, %v3272_v47  ;;  %v3449_v47 = vld [vmem:[%s6036_s1 + $0x1c0] sm:$0xff] }
 0x451   :  { %3562 = vst.msk [vmem:[%s6045_s10 + $0x140] sm:$0xff] %vm3521_vm14, %v3497_v20 }
 0x453   :  { %v4442_v53 = vpop.f32.mrf.mxu0 }
 0x454   :  { %v3287_v12 = vadd.f32 %v4442_v53, %v5361_v10 }
 0x455   :  { %v3281_v56 = vpop.f32.mrf.mxu0 }
 0x456   :  { %v3500_v16 = vsel %vm3392_vm13, %v3436_v54, %v3287_v12  ;;  %v3282_v59 = vadd.f32 %v5361_v10, %v3281_v56  ;;  %v3452_v56 = vld [vmem:[%s6036_s1 + $0x1d8] sm:$0xff] }
 0x457   :  { %3565 = vst.msk [vmem:[%s6045_s10 + $0x158] sm:$0xff] %vm3521_vm14, %v3500_v16 }
 0x458   :  { %v3499_v32 = vsel %vm3392_vm13, %v3435_v35, %v3282_v59  ;;  %v3451_v59 = vld [vmem:[%s6036_s1 + $0x1d0] sm:$0xff] }
 0x459   :  { %3564 = vst.msk [vmem:[%s6045_s10 + $0x150] sm:$0xff] %vm3521_vm14, %v3499_v32 }
 0x45b   :  { %v4445_v36 = vpop.f32.mrf.mxu0 }
 0x45c   :  { %v3297_v3 = vadd.f32 %v4445_v36, %v5361_v10 }
 0x45d   :  { %v3291_v27 = vpop.f32.mrf.mxu0 }
 0x45e   :  { %v3502_v5 = vsel %vm3392_vm13, %v3438_v8, %v3297_v3  ;;  %v3292_v55 = vadd.f32 %v5361_v10, %v3291_v27  ;;  %v3454_v27 = vld [vmem:[%s6036_s1 + $0x1e8] sm:$0xff] }
 0x45f   :  { %3567 = vst.msk [vmem:[%s6045_s10 + $0x168] sm:$0xff] %vm3521_vm14, %v3502_v5 }
 0x460   :  { %v3501_v19 = vsel %vm3392_vm13, %v3437_v41, %v3292_v55  ;;  %v3453_v55 = vld [vmem:[%s6036_s1 + $0x1e0] sm:$0xff] }
 0x461   :  { %3566 = vst.msk [vmem:[%s6045_s10 + $0x160] sm:$0xff] %vm3521_vm14, %v3501_v19 }
 0x463   :  { %v4448_v23 = vpop.f32.mrf.mxu0 }
 0x464   :  { %v3307_v48 = vadd.f32 %v4448_v23, %v5361_v10 }
 0x465   :  { %v3301_v30 = vpop.f32.mrf.mxu0 }
 0x466   :  { %v3504_v9 = vsel %vm3392_vm13, %v3440_v26, %v3307_v48  ;;  %v3302_v49 = vadd.f32 %v5361_v10, %v3301_v30  ;;  %v3456_v30 = vld [vmem:[%s6036_s1 + $0x1f8] sm:$0xff] }
 0x467   :  { %3569 = vst.msk [vmem:[%s6045_s10 + $0x178] sm:$0xff] %vm3521_vm14, %v3504_v9 }
 0x468   :  { %v3503_v24 = vsel %vm3392_vm13, %v3439_v33, %v3302_v49  ;;  %v3455_v49 = vld [vmem:[%s6036_s1 + $0x1f0] sm:$0xff] }
 0x469   :  { %3568 = vst.msk [vmem:[%s6045_s10 + $0x170] sm:$0xff] %vm3521_vm14, %v3503_v24 }
 0x46b   :  { %v4451_v38 = vpop.f32.mrf.mxu0 }
 0x46c   :  { %v3317_v61 = vadd.f32 %v4451_v38, %v5361_v10 }
 0x46d   :  { %v3311_v11 = vpop.f32.mrf.mxu0 }
 0x46e   :  { %v3506_v44 = vsel %vm3392_vm13, %v3442_v22, %v3317_v61  ;;  %v3312_v2 = vadd.f32 %v5361_v10, %v3311_v11 }
 0x46f   :  { %3571 = vst.msk [vmem:[%s6045_s10 + $0x188] sm:$0xff] %vm3521_vm14, %v3506_v44 }
 0x470   :  { %v3505_v39 = vsel %vm3392_vm13, %v3441_v4, %v3312_v2 }
 0x471   :  { %3570 = vst.msk [vmem:[%s6045_s10 + $0x180] sm:$0xff] %vm3521_vm14, %v3505_v39 }
 0x473   :  { %v4454_v17 = vpop.f32.mrf.mxu0 }
 0x474   :  { %v3327_v18 = vadd.f32 %v4454_v17, %v5361_v10 }
 0x475   :  { %v3321_v34 = vpop.f32.mrf.mxu0 }
 0x476   :  { %v3508_v25 = vsel %vm3392_vm13, %v3444_v62, %v3327_v18  ;;  %v3322_v7 = vadd.f32 %v5361_v10, %v3321_v34 }
 0x477   :  { %3573 = vst.msk [vmem:[%s6045_s10 + $0x198] sm:$0xff] %vm3521_vm14, %v3508_v25 }
 0x478   :  { %v3507_v46 = vsel %vm3392_vm13, %v3443_v58, %v3322_v7 }
 0x479   :  { %3572 = vst.msk [vmem:[%s6045_s10 + $0x190] sm:$0xff] %vm3521_vm14, %v3507_v46 }
 0x47b   :  { %v4457_v31 = vpop.f32.mrf.mxu0 }
 0x47c   :  { %v3337_v0 = vadd.f32 %v4457_v31, %v5361_v10 }
 0x47d   :  { %v3331_v40 = vpop.f32.mrf.mxu0 }
 0x47e   :  { %v3510_v1 = vsel %vm3392_vm13, %v3446_v28, %v3337_v0  ;;  %v3332_v45 = vadd.f32 %v5361_v10, %v3331_v40 }
 0x47f   :  { %3575 = vst.msk [vmem:[%s6045_s10 + $0x1a8] sm:$0xff] %vm3521_vm14, %v3510_v1 }
 0x480   :  { %v3509_v60 = vsel %vm3392_vm13, %v3445_v42, %v3332_v45 }
 0x481   :  { %3574 = vst.msk [vmem:[%s6045_s10 + $0x1a0] sm:$0xff] %vm3521_vm14, %v3509_v60 }
 0x483   :  { %v4460_v43 = vpop.f32.mrf.mxu0 }
 0x484   :  { %v3347_v15 = vadd.f32 %v4460_v43, %v5361_v10 }
 0x485   :  { %v3341_v52 = vpop.f32.mrf.mxu0 }
 0x486   :  { %v3512_v37 = vsel %vm3392_vm13, %v3448_v13, %v3347_v15  ;;  %v3342_v63 = vadd.f32 %v5361_v10, %v3341_v52 }
 0x487   :  { %3577 = vst.msk [vmem:[%s6045_s10 + $0x1b8] sm:$0xff] %vm3521_vm14, %v3512_v37 }
 0x488   :  { %v3511_v29 = vsel %vm3392_vm13, %v3447_v6, %v3342_v63 }
 0x489   :  { %3576 = vst.msk [vmem:[%s6045_s10 + $0x1b0] sm:$0xff] %vm3521_vm14, %v3511_v29 }
 0x48b   :  { %v4463_v50 = vpop.f32.mrf.mxu0 }
 0x48c   :  { %v3357_v14 = vadd.f32 %v4463_v50, %v5361_v10 }
 0x48d   :  { %v3351_v21 = vpop.f32.mrf.mxu0 }
 0x48e   :  { %v3514_v20 = vsel %vm3392_vm13, %v3450_v51, %v3357_v14  ;;  %v3352_v53 = vadd.f32 %v5361_v10, %v3351_v21 }
 0x48f   :  { %3579 = vst.msk [vmem:[%s6045_s10 + $0x1c8] sm:$0xff] %vm3521_vm14, %v3514_v20 }
 0x490   :  { %v3513_v54 = vsel %vm3392_vm13, %v3449_v47, %v3352_v53 }
 0x491   :  { %3578 = vst.msk [vmem:[%s6045_s10 + $0x1c0] sm:$0xff] %vm3521_vm14, %v3513_v54 }
 0x493   :  { %v4466_v12 = vpop.f32.mrf.mxu0 }
 0x494   :  { %v3367_v35 = vadd.f32 %v4466_v12, %v5361_v10 }
 0x495   :  { %v3361_v16 = vpop.f32.mrf.mxu0 }
 0x496   :  { %v3516_v32 = vsel %vm3392_vm13, %v3452_v56, %v3367_v35  ;;  %v3362_v36 = vadd.f32 %v5361_v10, %v3361_v16 }
 0x497   :  { %3581 = vst.msk [vmem:[%s6045_s10 + $0x1d8] sm:$0xff] %vm3521_vm14, %v3516_v32 }
 0x498   :  { %v3515_v8 = vsel %vm3392_vm13, %v3451_v59, %v3362_v36 }
 0x499   :  { %3580 = vst.msk [vmem:[%s6045_s10 + $0x1d0] sm:$0xff] %vm3521_vm14, %v3515_v8 }
 0x49b   :  { %v4469_v3 = vpop.f32.mrf.mxu0 }
 0x49c   :  { %v3377_v41 = vadd.f32 %v4469_v3, %v5361_v10 }
 0x49d   :  { %v3371_v5 = vpop.f32.mrf.mxu0 }
 0x49e   :  { %v3518_v19 = vsel %vm3392_vm13, %v3454_v27, %v3377_v41  ;;  %v3372_v23 = vadd.f32 %v5361_v10, %v3371_v5 }
 0x49f   :  { %3583 = vst.msk [vmem:[%s6045_s10 + $0x1e8] sm:$0xff] %vm3521_vm14, %v3518_v19 }
 0x4a0   :  { %v3517_v26 = vsel %vm3392_vm13, %v3453_v55, %v3372_v23 }
 0x4a1   :  { %3582 = vst.msk [vmem:[%s6045_s10 + $0x1e0] sm:$0xff] %vm3521_vm14, %v3517_v26 }
 0x4a3   :  { %v4472_v48 = vpop.f32.mrf.mxu0 }
 0x4a4   :  { %v3387_v33 = vadd.f32 %v4472_v48, %v5361_v10 }
 0x4a5   :  { %v3381_v9 = vpop.f32.mrf.mxu0 }
 0x4a6   :  { %v3520_v24 = vsel %vm3392_vm13, %v3456_v30, %v3387_v33  ;;  %v3382_v38 = vadd.f32 %v5361_v10, %v3381_v9 }
 0x4a7   :  { %3585 = vst.msk [vmem:[%s6045_s10 + $0x1f8] sm:$0xff] %vm3521_vm14, %v3520_v24 }
 0x4a8   :  { %v3519_v22 = vsel %vm3392_vm13, %v3455_v49, %v3382_v38 }
 0x4a9   :  { %3584 = vst.msk [vmem:[%s6045_s10 + $0x1f0] sm:$0xff] %vm3521_vm14, %v3519_v22 }
 0x4aa   :  { %3590 = vsyncpa [#allocation3], 1 }

</bundles_post_ra>
